<compile_context>
chip_gen: v6e
topology: v6e:2x2x1
jax: 0.10.0
libtpu: 0.0.40
codegen_flags: <defaults>
</compile_context>

<pallas_src>
import functools
import math

import jax
import jax.numpy as jnp
from jax.experimental import pallas as pl
from jax.experimental.pallas import tpu as pltpu


# ----------------------------------------------------------------------------- helpers
def _round_up(x, m):
    return (x + m - 1) // m * m


_P1 = pltpu.CompilerParams(dimension_semantics=("parallel",))
_P2 = pltpu.CompilerParams(dimension_semantics=("parallel", "parallel"))


def _tile_rows(x, tm):
    """Pick a row tile. Small M -> one full-extent block (no pad / no slice copies)."""
    M = x.shape[0]
    if M <= tm:
        return x, M, M, 1
    TM = _round_up(min(tm, M), 8)
    Mp = _round_up(M, TM)
    if Mp != M:
        x = jnp.pad(x, ((0, Mp - M), (0, 0)))
    return x, M, TM, Mp // TM


def _ln_rows(x, g, b, eps):
    mean = jnp.mean(x, axis=-1, keepdims=True)
    xc = x - mean
    var = jnp.mean(xc * xc, axis=-1, keepdims=True)
    return xc * jax.lax.rsqrt(var + eps) * g + b


# ----------------------------------------------------------------------------- kernels
def _linear_kernel(x_ref, w_ref, b_ref, o_ref, *, activation):
    # x:(TM,K) f32  w:(K,N) bf16 resident  b:(1,N) f32  o:(TM,N)
    acc = jnp.dot(x_ref[...].astype(jnp.bfloat16), w_ref[...],
                  preferred_element_type=jnp.float32) + b_ref[...]
    if activation == "gelu":
        acc = jax.nn.gelu(acc, approximate=True)
    o_ref[...] = acc.astype(o_ref.dtype)


def pallas_linear(x, w_bf16, b, activation=None, out_dtype=jnp.float32, tm=256):
    K, N = w_bf16.shape
    x, M0, TM, nblk = _tile_rows(x, tm)
    out = pl.pallas_call(
        functools.partial(_linear_kernel, activation=activation),
        out_shape=jax.ShapeDtypeStruct((x.shape[0], N), out_dtype),
        grid=(nblk,),
        in_specs=[pl.BlockSpec((TM, K), lambda i: (i, 0)),
                  pl.BlockSpec((K, N), lambda i: (0, 0)),
                  pl.BlockSpec((1, N), lambda i: (0, 0))],
        out_specs=pl.BlockSpec((TM, N), lambda i: (i, 0)),
        compiler_params=_P1,
    )(x, w_bf16, b.reshape(1, N))
    return out if out.shape[0] == M0 else out[:M0]


def _ln_linear_kernel(x_ref, g_ref, b_ref, w_ref, o_ref, *, eps, activation):
    # fused LayerNorm (f32) + matmul (bf16 MXU, f32 acc). No bias (to_qkv has bias=False).
    h = _ln_rows(x_ref[...].astype(jnp.float32), g_ref[...], b_ref[...], eps)
    acc = jnp.dot(h.astype(jnp.bfloat16), w_ref[...], preferred_element_type=jnp.float32)
    if activation == "gelu":
        acc = jax.nn.gelu(acc, approximate=True)
    o_ref[...] = acc.astype(o_ref.dtype)


def pallas_ln_linear(x, gamma, beta, w_bf16, activation=None,
                     out_dtype=jnp.bfloat16, eps=1e-5, tm=256):
    K, N = w_bf16.shape
    x, M0, TM, nblk = _tile_rows(x, tm)
    out = pl.pallas_call(
        functools.partial(_ln_linear_kernel, eps=eps, activation=activation),
        out_shape=jax.ShapeDtypeStruct((x.shape[0], N), out_dtype),
        grid=(nblk,),
        in_specs=[pl.BlockSpec((TM, K), lambda i: (i, 0)),
                  pl.BlockSpec((1, K), lambda i: (0, 0)),
                  pl.BlockSpec((1, K), lambda i: (0, 0)),
                  pl.BlockSpec((K, N), lambda i: (0, 0))],
        out_specs=pl.BlockSpec((TM, N), lambda i: (i, 0)),
        compiler_params=_P1,
    )(x, gamma.reshape(1, K), beta.reshape(1, K), w_bf16)
    return out if out.shape[0] == M0 else out[:M0]


def _ln_ffn_kernel(x_ref, g_ref, b_ref, w1_ref, b1_ref, w2_ref, b2_ref, o_ref, *, eps):
    # fused LN + FF1 + GELU + FF2 + residual; the (TM, 4D) hidden never leaves VMEM.
    x = x_ref[...].astype(jnp.float32)
    h = _ln_rows(x, g_ref[...], b_ref[...], eps)
    h1 = jnp.dot(h.astype(jnp.bfloat16), w1_ref[...],
                 preferred_element_type=jnp.float32) + b1_ref[...]
    h1 = jax.nn.gelu(h1, approximate=True)
    h2 = jnp.dot(h1.astype(jnp.bfloat16), w2_ref[...],
                 preferred_element_type=jnp.float32) + b2_ref[...]
    o_ref[...] = (x + h2).astype(o_ref.dtype)


def pallas_ln_ffn(x, gamma, beta, w1_bf16, b1, w2_bf16, b2, eps=1e-5, tm=256):
    D, Dh = w1_bf16.shape
    x, M0, TM, nblk = _tile_rows(x, tm)
    out = pl.pallas_call(
        functools.partial(_ln_ffn_kernel, eps=eps),
        out_shape=jax.ShapeDtypeStruct((x.shape[0], D), jnp.float32),
        grid=(nblk,),
        in_specs=[pl.BlockSpec((TM, D), lambda i: (i, 0)),
                  pl.BlockSpec((1, D), lambda i: (0, 0)),
                  pl.BlockSpec((1, D), lambda i: (0, 0)),
                  pl.BlockSpec((D, Dh), lambda i: (0, 0)),
                  pl.BlockSpec((1, Dh), lambda i: (0, 0)),
                  pl.BlockSpec((Dh, D), lambda i: (0, 0)),
                  pl.BlockSpec((1, D), lambda i: (0, 0))],
        out_specs=pl.BlockSpec((TM, D), lambda i: (i, 0)),
        compiler_params=_P1,
    )(x, gamma.reshape(1, D), beta.reshape(1, D),
      w1_bf16, b1.reshape(1, Dh), w2_bf16, b2.reshape(1, D))
    return out if out.shape[0] == M0 else out[:M0]


def _attn_kernel(q_ref, k_ref, v_ref, x_ref, wo_ref, bo_ref, o_ref, *, heads):
    # q/k/v:(1,H,n,dh) bf16 (softmax scale already folded into W_q)  x:(1,n,D) f32 residual
    # wo:(H,dh,D) bf16 resident  bo:(1,D) f32  o:(1,n,D) f32
    q, k, v = q_ref[0], k_ref[0], v_ref[0]
    s = jnp.einsum("hqd,hkd->hqk", q, k, preferred_element_type=jnp.float32)
    s = s - jnp.max(s, axis=-1, keepdims=True)
    p = jnp.exp(s)
    p = p * pl.reciprocal(jnp.sum(p, axis=-1, keepdims=True), approx=True)
    o = jnp.einsum("hqk,hkd->hqd", p.astype(jnp.bfloat16), v,
                   preferred_element_type=jnp.float32)                 # (H, n, dh) f32
    acc = x_ref[0] + bo_ref[...]                                       # residual + out bias
    for h in range(heads):                                             # fused out-projection
        acc = acc + jnp.dot(o[h].astype(jnp.bfloat16), wo_ref[h],
                            preferred_element_type=jnp.float32)
    o_ref[0] = acc.astype(o_ref.dtype)


def pallas_attention_block(x, q, k, v, w_out_h, b_out):
    """x:(B,n,D) f32, q/k/v:(B,H,n,dh) bf16 -> x + Attn(x) @ W_out + b_out   (B,n,D) f32."""
    B, n, D = x.shape
    H, dh = q.shape[1], q.shape[3]
    qkv_spec = pl.BlockSpec((1, H, n, dh), lambda b: (b, 0, 0, 0))
    x_spec = pl.BlockSpec((1, n, D), lambda b: (b, 0, 0))
    return pl.pallas_call(
        functools.partial(_attn_kernel, heads=H),
        out_shape=jax.ShapeDtypeStruct((B, n, D), jnp.float32),
        grid=(B,),
        in_specs=[qkv_spec, qkv_spec, qkv_spec, x_spec,
                  pl.BlockSpec((H, dh, D), lambda b: (0, 0, 0)),
                  pl.BlockSpec((1, D), lambda b: (0, 0))],
        out_specs=x_spec,
        compiler_params=_P1,
    )(q, k, v, x, w_out_h, b_out.reshape(1, D))


def _conv1x1_kernel(x_ref, w_ref, b_ref, o_ref):
    # x:(1,Cin,TP) f32  w:(Cout,Cin) bf16 resident  b:(Cout,1) f32  o:(1,Cout,TP) f32
    acc = jnp.dot(w_ref[...], x_ref[0].astype(jnp.bfloat16),
                  preferred_element_type=jnp.float32)                  # lane-dense (Cout, TP)
    o_ref[0] = (acc + b_ref[...]).astype(o_ref.dtype)


def pallas_conv1x1(x, w_oi_bf16, b, tp=512):
    """Channel-first 1x1 conv.  x:(B,Cin,P) f32, w:(Cout,Cin) bf16, b:(Cout,) -> (B,Cout,P)."""
    B, Cin, P = x.shape
    Cout = w_oi_bf16.shape[0]
    TP = P if P <= tp else tp
    assert P % TP == 0 and (TP == P or TP % 128 == 0)
    return pl.pallas_call(
        _conv1x1_kernel,
        out_shape=jax.ShapeDtypeStruct((B, Cout, P), jnp.float32),
        grid=(B, P // TP),
        in_specs=[pl.BlockSpec((1, Cin, TP), lambda bi, j: (bi, 0, j)),
                  pl.BlockSpec((Cout, Cin), lambda bi, j: (0, 0)),
                  pl.BlockSpec((Cout, 1), lambda bi, j: (0, 0))],
        out_specs=pl.BlockSpec((1, Cout, TP), lambda bi, j: (bi, 0, j)),
        compiler_params=_P2,
    )(x, w_oi_bf16, b.reshape(Cout, 1))


# --------------------------------------------------------------------- pure-JAX reference ops
def _ref_ln(x, g, b, eps=1e-5):
    mean = jnp.mean(x, axis=-1, keepdims=True)
    xc = x - mean
    var = jnp.mean(xc * xc, axis=-1, keepdims=True)
    return xc * jax.lax.rsqrt(var + eps) * g.reshape(1, -1) + b.reshape(1, -1)


def ref_linear(x, w_bf16, b, activation=None, out_dtype=jnp.float32):
    acc = jnp.dot(x.astype(jnp.bfloat16), w_bf16,
                  preferred_element_type=jnp.float32) + b.reshape(1, -1)
    if activation == "gelu":
        acc = jax.nn.gelu(acc, approximate=True)
    return acc.astype(out_dtype)


def ref_ln_linear(x, gamma, beta, w_bf16, activation=None, out_dtype=jnp.bfloat16, eps=1e-5):
    h = _ref_ln(x, gamma, beta, eps)
    acc = jnp.dot(h.astype(jnp.bfloat16), w_bf16, preferred_element_type=jnp.float32)
    if activation == "gelu":
        acc = jax.nn.gelu(acc, approximate=True)
    return acc.astype(out_dtype)


def ref_ln_ffn(x, gamma, beta, w1, b1, w2, b2, eps=1e-5):
    h = _ref_ln(x, gamma, beta, eps)
    h1 = jax.nn.gelu(jnp.dot(h.astype(jnp.bfloat16), w1,
                             preferred_element_type=jnp.float32) + b1.reshape(1, -1),
                     approximate=True)
    h2 = jnp.dot(h1.astype(jnp.bfloat16), w2,
                 preferred_element_type=jnp.float32) + b2.reshape(1, -1)
    return x + h2


def ref_attention_block(x, q, k, v, w_out_h, b_out):
    B, n, D = x.shape
    s = jnp.einsum("bhqd,bhkd->bhqk", q, k, preferred_element_type=jnp.float32)
    s = s - jnp.max(s, axis=-1, keepdims=True)
    p = jnp.exp(s)
    p = p / jnp.sum(p, axis=-1, keepdims=True)
    o = jnp.einsum("bhqk,bhkd->bhqd", p.astype(jnp.bfloat16), v,
                   preferred_element_type=jnp.float32)
    o = o.transpose(0, 2, 1, 3).reshape(B * n, D)
    out = jnp.dot(o.astype(jnp.bfloat16), w_out_h.reshape(D, D),
                  preferred_element_type=jnp.float32) + b_out.reshape(1, -1)
    return x + out.reshape(B, n, D)


def ref_conv1x1(x, w_oi, b):
    acc = jnp.einsum("oc,bcp->bop", w_oi, x.astype(jnp.bfloat16),
                     preferred_element_type=jnp.float32)
    return acc + b.reshape(1, -1, 1)


def make_ops(use_pallas):
    if use_pallas:
        return dict(linear=pallas_linear, ln_linear=pallas_ln_linear, ln_ffn=pallas_ln_ffn,
                    attention=pallas_attention_block, conv1x1=pallas_conv1x1)
    return dict(linear=ref_linear, ln_linear=ref_ln_linear, ln_ffn=ref_ln_ffn,
                attention=ref_attention_block, conv1x1=ref_conv1x1)


# ----------------------------------------------------------------------------- model glue
def upsample_bilinear_2x(x):
    """(B, C, H, W) -> (B, C, 2H, 2W); matches torch Upsample(2, 'bilinear', align_corners=False)."""
    B, C, H, W = x.shape

    def idx_w(n):
        out = jnp.arange(2 * n, dtype=jnp.float32)
        src = jnp.clip((out + 0.5) / 2.0 - 0.5, 0.0, None)
        i0 = jnp.clip(jnp.floor(src).astype(jnp.int32), 0, n - 1)
        i1 = jnp.minimum(i0 + 1, n - 1)
        w1 = src - i0.astype(jnp.float32)
        return i0, i1, 1.0 - w1, w1

    hi0, hi1, hw0, hw1 = idx_w(H)
    wi0, wi1, ww0, ww1 = idx_w(W)
    xh = x[:, :, hi0, :] * hw0[None, None, :, None] + x[:, :, hi1, :] * hw1[None, None, :, None]
    return xh[:, :, :, wi0] * ww0[None, None, None, :] + xh[:, :, :, wi1] * ww1[None, None, None, :]


def depth_only_forward(params, text_feat, img, *, ops, cfg):
    D, H_heads, patch = cfg["dim"], cfg["heads"], cfg["patch"]
    dh = D // H_heads
    B = img.shape[0]

    # --- encode_text (CLIP features precomputed; see TODO at top of file) ---
    n_txt = text_feat.shape[1]
    t = jnp.concatenate([jnp.broadcast_to(params["text_token"], (B, 1, D)), text_feat], axis=1)
    t = t + params["text_pos_embedding"][:, : n_txt + 1]

    # --- encode_image: patchify + linear patch embedding ---
    _, C, Hh, Ww = img.shape
    gh, gw = Hh // patch, Ww // patch
    patches = img.reshape(B, C, gh, patch, gw, patch)
    patches = patches.transpose(0, 2, 4, 3, 5, 1).reshape(B * gh * gw, patch * patch * C)
    xi = ops["linear"](patches, params["patch_w"], params["patch_b"]).reshape(B, gh * gw, D)
    xi = jnp.concatenate([jnp.broadcast_to(params["image_token"], (B, 1, D)), xi], axis=1)
    xi = xi + params["image_pos_embedding"][:, : gh * gw + 1]

    # --- token-type embeddings (indices are constant 0 / 1) ---
    t = t + params["token_type"][0][None, None, :]
    xi = xi + params["token_type"][1][None, None, :]

    x = jnp.concatenate([t, xi], axis=1)                      # (B, n_total, D) f32 residual stream
    n_text, n_img = t.shape[1], xi.shape[1]
    n_total = n_text + n_img

    # --- transformer encoder: 3 fused pallas_calls per layer ---
    for layer in params["layers"]:
        xf = x.reshape(B * n_total, D)
        qkv = ops["ln_linear"](xf, layer["ln1_g"], layer["ln1_b"], layer["w_qkv"],
                               out_dtype=jnp.bfloat16)        # fused LN1 + QKV (bias-free)
        qkv = qkv.reshape(B, n_total, 3, H_heads, dh)
        q = qkv[:, :, 0].transpose(0, 2, 1, 3)                # (B, H, n, dh) bf16
        k = qkv[:, :, 1].transpose(0, 2, 1, 3)
        v = qkv[:, :, 2].transpose(0, 2, 1, 3)
        # fused attention + output projection + residual (scale folded into W_q at init)
        x = ops["attention"](x, q, k, v, layer["w_out_h"], layer["b_out"])
        # fused LN2 + FF1(GELU) + FF2 + residual
        x = ops["ln_ffn"](x.reshape(B * n_total, D), layer["ln2_g"], layer["ln2_b"],
                          layer["ff_w1"], layer["ff_b1"],
                          layer["ff_w2"], layer["ff_b2"]).reshape(B, n_total, D)

    # --- heads ---
    all_head = jnp.concatenate([x[:, 0, :], x[:, n_text, :]], axis=1)          # (B, 2*D)

    # --- ConvDecoder on image tokens, channel-first throughout ---
    image_feat = x[:, -n_img:-1, :]                                            # (B, gh*gw, D)
    y = image_feat.reshape(B, gh, gw, D).transpose(0, 3, 1, 2)                 # (B, D, gh, gw)
    h_cur, w_cur = gh, gw
    n_dec = len(params["dec"])
    for i, (w_dec, b_dec) in enumerate(params["dec"]):
        c_in = y.shape[1]
        y = ops["conv1x1"](y.reshape(B, c_in, h_cur * w_cur), w_dec, b_dec)
        y = y.reshape(B, y.shape[1], h_cur, w_cur)
        if i != n_dec - 1:
            y = upsample_bilinear_2x(y)
            h_cur, w_cur = 2 * h_cur, 2 * w_cur

    position_heatmap = y.reshape(B, h_cur, w_cur)                              # squeeze of (B,1,H,W)
    return position_heatmap, all_head


# ----------------------------------------------------------------------------- init
def init_params(key, cfg):
    dim, depth, heads = cfg["dim"], cfg["depth"], cfg["heads"]
    dh = dim // heads
    mlp_dim = dim * cfg["mlp_ratio"]
    patch, channels, image_size = cfg["patch"], cfg["channels"], cfg["image_size"]
    patch_dim = channels * patch * patch
    num_patches = (image_size // patch) ** 2
    scale = dh ** -0.5

    keys = iter(jax.random.split(key, 16 + 8 * depth + 16))

    def unif(shape, fan_in):
        bnd = 1.0 / math.sqrt(fan_in)
        return jax.random.uniform(next(keys), shape, jnp.float32, -bnd, bnd)

    def norm(shape, s=1.0):
        return s * jax.random.normal(next(keys), shape, jnp.float32)

    params = {
        "patch_w": unif((patch_dim, dim), patch_dim).astype(jnp.bfloat16),
        "patch_b": unif((dim,), patch_dim),
        "image_pos_embedding": norm((1, num_patches + 1, dim)),
        "image_token": norm((1, 1, dim)),
        "text_token": norm((1, 1, dim)),
        "text_pos_embedding": norm((1, 78, dim)),
        "token_type": norm((2, dim), 0.02),
        "layers": [],
        "dec": [],
    }
    for _ in range(depth):
        w_qkv = unif((dim, 3 * dim), dim)
        # fold the attention scale dh**-0.5 into the Q projection (exact re-parameterization)
        w_qkv = w_qkv.at[:, :dim].multiply(scale)
        w_out = unif((dim, dim), dim)
        params["layers"].append({
            "ln1_g": jnp.ones((dim,), jnp.float32), "ln1_b": jnp.zeros((dim,), jnp.float32),
            "w_qkv": w_qkv.astype(jnp.bfloat16),                      # to_qkv has bias=False
            "w_out_h": w_out.reshape(heads, dh, dim).astype(jnp.bfloat16),
            "b_out": unif((dim,), dim),
            "ln2_g": jnp.ones((dim,), jnp.float32), "ln2_b": jnp.zeros((dim,), jnp.float32),
            "ff_w1": unif((dim, mlp_dim), dim).astype(jnp.bfloat16), "ff_b1": unif((mlp_dim,), dim),
            "ff_w2": unif((mlp_dim, dim), mlp_dim).astype(jnp.bfloat16), "ff_b2": unif((dim,), mlp_dim),
        })
    c_in = [dim, dim // 2, dim // 2, dim // 4, dim // 4]
    c_out = [dim // 2, dim // 2, dim // 4, dim // 4, 1]
    for ci, co in zip(c_in, c_out):
        # Conv2d 1x1 weight stored channel-first (C_out, C_in) bf16
        params["dec"].append((unif((co, ci), ci).astype(jnp.bfloat16), unif((co,), ci)))
    return params


# ----------------------------------------------------------------------------- main
if __name__ == "__main__":
    CFG = dict(dim=128, depth=2, heads=4, mlp_ratio=4, patch=16,
               channels=1, image_size=32, text_len=7)
    B = 2

    key = jax.random.PRNGKey(0)
    k_img, k_txt, k_par = jax.random.split(key, 3)
    img = jax.random.normal(k_img, (B, CFG["channels"], CFG["image_size"], CFG["image_size"]),
                            jnp.float32)
    text_feat = jax.random.normal(k_txt, (B, CFG["text_len"], CFG["dim"]), jnp.float32)
    params = init_params(k_par, CFG)

    pallas_fwd = jax.jit(functools.partial(depth_only_forward, ops=make_ops(True), cfg=CFG))
    ref_fwd = jax.jit(functools.partial(depth_only_forward, ops=make_ops(False), cfg=CFG))

    heat, all_head = jax.block_until_ready(pallas_fwd(params, text_feat, img))
    heat_ref, all_head_ref = jax.block_until_ready(ref_fwd(params, text_feat, img))

    assert heat.shape == (B, CFG["image_size"], CFG["image_size"]), heat.shape
    assert all_head.shape == (B, 2 * CFG["dim"]), all_head.shape
    assert bool(jnp.all(jnp.isfinite(heat))) and bool(jnp.all(jnp.isfinite(all_head)))
    assert bool(jnp.allclose(heat, heat_ref, atol=3e-2, rtol=3e-2)), \
        float(jnp.max(jnp.abs(heat - heat_ref)))
    assert bool(jnp.allclose(all_head, all_head_ref, atol=3e-2, rtol=3e-2)), \
        float(jnp.max(jnp.abs(all_head - all_head_ref)))

    print("KERNEL_OK")
</pallas_src>

<mosaic_0001>
module attributes {stable_mosaic.version = 11 : i64} {
  func.func @_linear_kernel(%arg0: i32, %arg1: memref<8x256xf32, #tpu.memory_space<vmem>>, %arg2: memref<256x128xbf16, #tpu.memory_space<vmem>>, %arg3: memref<1x128xf32, #tpu.memory_space<vmem>>, %arg4: memref<8x128xf32, #tpu.memory_space<vmem>>) attributes {dimension_semantics = [#tpu.dimension_semantics<parallel>], iteration_bounds = array<i64: 1>, scalar_prefetch = 0 : i64, scratch_operands = 0 : i64, tpu.core_type = #tpu.core_type<tc>, window_params = [{transform_indices = @transform_0, window_bounds = array<i64: 8, 256>}, {pipeline_mode = #tpu.pipeline_mode<synchronous>, transform_indices = @transform_1, window_bounds = array<i64: 256, 128>}, {pipeline_mode = #tpu.pipeline_mode<synchronous>, transform_indices = @transform_2, window_bounds = array<i64: 1, 128>}, {transform_indices = @transform_3, window_bounds = array<i64: 8, 128>}]} {
    %c0 = arith.constant 0 : index
    %c0_0 = arith.constant 0 : index
    %0 = vector.load %arg1[%c0, %c0_0] : memref<8x256xf32, #tpu.memory_space<vmem>>, vector<8x256xf32>
    %1 = arith.truncf %0 : vector<8x256xf32> to vector<8x256xbf16>
    %c0_1 = arith.constant 0 : index
    %c0_2 = arith.constant 0 : index
    %2 = vector.load %arg2[%c0_1, %c0_2] : memref<256x128xbf16, #tpu.memory_space<vmem>>, vector<256x128xbf16>
    %cst = arith.constant dense<0.000000e+00> : vector<8x128xf32>
    %3 = tpu.matmul %1, %2, %cst {dimension_numbers = #tpu.dot_dimension_numbers<[1], [0], [0], [1], [0, 0, 1, 1], [], []>} : vector<8x256xbf16>, vector<256x128xbf16>, vector<8x128xf32> -> vector<8x128xf32>
    %c0_3 = arith.constant 0 : index
    %c0_4 = arith.constant 0 : index
    %4 = vector.load %arg3[%c0_3, %c0_4] : memref<1x128xf32, #tpu.memory_space<vmem>>, vector<1x128xf32>
    %5 = vector.broadcast %4 : vector<1x128xf32> to vector<8x128xf32>
    %6 = arith.addf %3, %5 : vector<8x128xf32>
    %c0_5 = arith.constant 0 : index
    %c0_6 = arith.constant 0 : index
    %7 = vector.load %arg4[%c0_5, %c0_6] : memref<8x128xf32, #tpu.memory_space<vmem>>, vector<8x128xf32>
    tpu.vector_store %arg4[%c0_5, %c0_6], %6 {strides = array<i32>} : memref<8x128xf32, #tpu.memory_space<vmem>>, vector<8x128xf32>,
    return
  }
  func.func @transform_0(%arg0: i32) -> (i32, i32) {
    %c0_i32 = arith.constant 0 : i32
    %c0_i32_0 = arith.constant 0 : i32
    return %arg0, %c0_i32 : i32, i32
  }
  func.func @transform_1(%arg0: i32) -> (i32, i32) {
    %c0_i32 = arith.constant 0 : i32
    %c0_i32_0 = arith.constant 0 : i32
    %c0_i32_1 = arith.constant 0 : i32
    return %c0_i32, %c0_i32_0 : i32, i32
  }
  func.func @transform_2(%arg0: i32) -> (i32, i32) {
    %c0_i32 = arith.constant 0 : i32
    %c0_i32_0 = arith.constant 0 : i32
    %c0_i32_1 = arith.constant 0 : i32
    return %c0_i32, %c0_i32_0 : i32, i32
  }
  func.func @transform_3(%arg0: i32) -> (i32, i32) {
    %c0_i32 = arith.constant 0 : i32
    %c0_i32_0 = arith.constant 0 : i32
    return %arg0, %c0_i32 : i32, i32
  }
}

module attributes {stable_mosaic.version = 11 : i64} {
  func.func @_ln_linear_kernel(%arg0: i32, %arg1: memref<26x128xf32, #tpu.memory_space<vmem>>, %arg2: memref<1x128xf32, #tpu.memory_space<vmem>>, %arg3: memref<1x128xf32, #tpu.memory_space<vmem>>, %arg4: memref<128x384xbf16, #tpu.memory_space<vmem>>, %arg5: memref<26x384xbf16, #tpu.memory_space<vmem>>) attributes {dimension_semantics = [#tpu.dimension_semantics<parallel>], iteration_bounds = array<i64: 1>, scalar_prefetch = 0 : i64, scratch_operands = 0 : i64, tpu.core_type = #tpu.core_type<tc>, window_params = [{transform_indices = @transform_0, window_bounds = array<i64: 26, 128>}, {pipeline_mode = #tpu.pipeline_mode<synchronous>, transform_indices = @transform_1, window_bounds = array<i64: 1, 128>}, {pipeline_mode = #tpu.pipeline_mode<synchronous>, transform_indices = @transform_2, window_bounds = array<i64: 1, 128>}, {pipeline_mode = #tpu.pipeline_mode<synchronous>, transform_indices = @transform_3, window_bounds = array<i64: 128, 384>}, {transform_indices = @transform_4, window_bounds = array<i64: 26, 384>}]} {
    %c0 = arith.constant 0 : index
    %c0_0 = arith.constant 0 : index
    %0 = vector.load %arg1[%c0, %c0_0] : memref<26x128xf32, #tpu.memory_space<vmem>>, vector<26x128xf32>
    %c0_1 = arith.constant 0 : index
    %c0_2 = arith.constant 0 : index
    %1 = vector.load %arg2[%c0_1, %c0_2] : memref<1x128xf32, #tpu.memory_space<vmem>>, vector<1x128xf32>
    %c0_3 = arith.constant 0 : index
    %c0_4 = arith.constant 0 : index
    %2 = vector.load %arg3[%c0_3, %c0_4] : memref<1x128xf32, #tpu.memory_space<vmem>>, vector<1x128xf32>
    %cst = arith.constant dense<0.000000e+00> : vector<26xf32>
    %3 = vector.multi_reduction <add>, %0, %cst [1] : vector<26x128xf32> to vector<26xf32>
    %4 = vector.shape_cast %3 : vector<26xf32> to vector<26x1xf32>
    %cst_5 = arith.constant 1.280000e+02 : f32
    %5 = vector.broadcast %cst_5 : f32 to vector<26x1xf32>
    %6 = arith.divf %4, %5 : vector<26x1xf32>
    %7 = vector.broadcast %6 : vector<26x1xf32> to vector<26x128xf32>
    %8 = arith.subf %0, %7 : vector<26x128xf32>
    %9 = arith.mulf %8, %8 : vector<26x128xf32>
    %cst_6 = arith.constant dense<0.000000e+00> : vector<26xf32>
    %10 = vector.multi_reduction <add>, %9, %cst_6 [1] : vector<26x128xf32> to vector<26xf32>
    %11 = vector.shape_cast %10 : vector<26xf32> to vector<26x1xf32>
    %cst_7 = arith.constant 1.280000e+02 : f32
    %12 = vector.broadcast %cst_7 : f32 to vector<26x1xf32>
    %13 = arith.divf %11, %12 : vector<26x1xf32>
    %cst_8 = arith.constant 9.99999974E-6 : f32
    %14 = vector.broadcast %cst_8 : f32 to vector<26x1xf32>
    %15 = arith.addf %13, %14 : vector<26x1xf32>
    %16 = math.rsqrt %15 : vector<26x1xf32>
    %17 = vector.broadcast %16 : vector<26x1xf32> to vector<26x128xf32>
    %18 = arith.mulf %8, %17 : vector<26x128xf32>
    %19 = vector.broadcast %1 : vector<1x128xf32> to vector<26x128xf32>
    %20 = arith.mulf %18, %19 : vector<26x128xf32>
    %21 = vector.broadcast %2 : vector<1x128xf32> to vector<26x128xf32>
    %22 = arith.addf %20, %21 : vector<26x128xf32>
    %23 = arith.truncf %22 : vector<26x128xf32> to vector<26x128xbf16>
    %c0_9 = arith.constant 0 : index
    %c0_10 = arith.constant 0 : index
    %24 = vector.load %arg4[%c0_9, %c0_10] : memref<128x384xbf16, #tpu.memory_space<vmem>>, vector<128x384xbf16>
    %cst_11 = arith.constant dense<0.000000e+00> : vector<26x384xf32>
    %25 = tpu.matmul %23, %24, %cst_11 {dimension_numbers = #tpu.dot_dimension_numbers<[1], [0], [0], [1], [0, 0, 1, 1], [], []>} : vector<26x128xbf16>, vector<128x384xbf16>, vector<26x384xf32> -> vector<26x384xf32>
    %26 = arith.truncf %25 : vector<26x384xf32> to vector<26x384xbf16>
    %c0_12 = arith.constant 0 : index
    %c0_13 = arith.constant 0 : index
    %27 = vector.load %arg5[%c0_12, %c0_13] : memref<26x384xbf16, #tpu.memory_space<vmem>>, vector<26x384xbf16>
    tpu.vector_store %arg5[%c0_12, %c0_13], %26 {strides = array<i32>} : memref<26x384xbf16, #tpu.memory_space<vmem>>, vector<26x384xbf16>,
    return
  }
  func.func @transform_0(%arg0: i32) -> (i32, i32) {
    %c0_i32 = arith.constant 0 : i32
    %c0_i32_0 = arith.constant 0 : i32
    return %arg0, %c0_i32 : i32, i32
  }
  func.func @transform_1(%arg0: i32) -> (i32, i32) {
    %c0_i32 = arith.constant 0 : i32
    %c0_i32_0 = arith.constant 0 : i32
    %c0_i32_1 = arith.constant 0 : i32
    return %c0_i32, %c0_i32_0 : i32, i32
  }
  func.func @transform_2(%arg0: i32) -> (i32, i32) {
    %c0_i32 = arith.constant 0 : i32
    %c0_i32_0 = arith.constant 0 : i32
    %c0_i32_1 = arith.constant 0 : i32
    return %c0_i32, %c0_i32_0 : i32, i32
  }
  func.func @transform_3(%arg0: i32) -> (i32, i32) {
    %c0_i32 = arith.constant 0 : i32
    %c0_i32_0 = arith.constant 0 : i32
    %c0_i32_1 = arith.constant 0 : i32
    return %c0_i32, %c0_i32_0 : i32, i32
  }
  func.func @transform_4(%arg0: i32) -> (i32, i32) {
    %c0_i32 = arith.constant 0 : i32
    %c0_i32_0 = arith.constant 0 : i32
    return %arg0, %c0_i32 : i32, i32
  }
}

module attributes {stable_mosaic.version = 11 : i64} {
  func.func @_attn_kernel(%arg0: i32, %arg1: memref<1x4x13x32xbf16, #tpu.memory_space<vmem>>, %arg2: memref<1x4x13x32xbf16, #tpu.memory_space<vmem>>, %arg3: memref<1x4x13x32xbf16, #tpu.memory_space<vmem>>, %arg4: memref<1x13x128xf32, #tpu.memory_space<vmem>>, %arg5: memref<4x32x128xbf16, #tpu.memory_space<vmem>>, %arg6: memref<1x128xf32, #tpu.memory_space<vmem>>, %arg7: memref<1x13x128xf32, #tpu.memory_space<vmem>>) attributes {dimension_semantics = [#tpu.dimension_semantics<parallel>], iteration_bounds = array<i64: 2>, scalar_prefetch = 0 : i64, scratch_operands = 0 : i64, tpu.core_type = #tpu.core_type<tc>, window_params = [{transform_indices = @transform_0, window_bounds = array<i64: 1, 4, 13, 32>}, {transform_indices = @transform_1, window_bounds = array<i64: 1, 4, 13, 32>}, {transform_indices = @transform_2, window_bounds = array<i64: 1, 4, 13, 32>}, {transform_indices = @transform_3, window_bounds = array<i64: 1, 13, 128>}, {pipeline_mode = #tpu.pipeline_mode<synchronous>, transform_indices = @transform_4, window_bounds = array<i64: 4, 32, 128>}, {pipeline_mode = #tpu.pipeline_mode<synchronous>, transform_indices = @transform_5, window_bounds = array<i64: 1, 128>}, {transform_indices = @transform_6, window_bounds = array<i64: 1, 13, 128>}]} {
    %c0 = arith.constant 0 : index
    %c0_0 = arith.constant 0 : index
    %c0_1 = arith.constant 0 : index
    %c0_2 = arith.constant 0 : index
    %0 = vector.load %arg1[%c0, %c0_0, %c0_1, %c0_2] : memref<1x4x13x32xbf16, #tpu.memory_space<vmem>>, vector<1x4x13x32xbf16>
    %1 = vector.shape_cast %0 : vector<1x4x13x32xbf16> to vector<4x13x32xbf16>
    %c0_3 = arith.constant 0 : index
    %c0_4 = arith.constant 0 : index
    %c0_5 = arith.constant 0 : index
    %c0_6 = arith.constant 0 : index
    %2 = vector.load %arg2[%c0_3, %c0_4, %c0_5, %c0_6] : memref<1x4x13x32xbf16, #tpu.memory_space<vmem>>, vector<1x4x13x32xbf16>
    %3 = vector.shape_cast %2 : vector<1x4x13x32xbf16> to vector<4x13x32xbf16>
    %c0_7 = arith.constant 0 : index
    %c0_8 = arith.constant 0 : index
    %c0_9 = arith.constant 0 : index
    %c0_10 = arith.constant 0 : index
    %4 = vector.load %arg3[%c0_7, %c0_8, %c0_9, %c0_10] : memref<1x4x13x32xbf16, #tpu.memory_space<vmem>>, vector<1x4x13x32xbf16>
    %5 = vector.shape_cast %4 : vector<1x4x13x32xbf16> to vector<4x13x32xbf16>
    "tpu.trace_start"() <{level = 10 : i32, message = "hqd,hkd->hqk"}> : () -> ()
    %cst = arith.constant dense<0.000000e+00> : vector<4x13x13xf32>
    %6 = tpu.matmul %1, %3, %cst {dimension_numbers = #tpu.dot_dimension_numbers<[2], [2], [1], [1], [0, 0, 0, 1, 1, 1], [0], [0]>} : vector<4x13x32xbf16>, vector<4x13x32xbf16>, vector<4x13x13xf32> -> vector<4x13x13xf32>
    "tpu.trace_stop"() : () -> ()
    %cst_11 = arith.constant dense<0xFF800000> : vector<4x13xf32>
    %7 = vector.multi_reduction <maximumf>, %6, %cst_11 [2] : vector<4x13x13xf32> to vector<4x13xf32>
    %8 = vector.shape_cast %7 : vector<4x13xf32> to vector<4x13x1xf32>
    %9 = vector.broadcast %8 : vector<4x13x1xf32> to vector<4x13x13xf32>
    %10 = arith.subf %6, %9 : vector<4x13x13xf32>
    %11 = math.exp %10 : vector<4x13x13xf32>
    %cst_12 = arith.constant dense<0.000000e+00> : vector<4x13xf32>
    %12 = vector.multi_reduction <add>, %11, %cst_12 [2] : vector<4x13x13xf32> to vector<4x13xf32>
    %13 = vector.shape_cast %12 : vector<4x13xf32> to vector<4x13x1xf32>
    %14 = tpu.reciprocal %13 {approx = true} : vector<4x13x1xf32> -> vector<4x13x1xf32>
    %15 = vector.broadcast %14 : vector<4x13x1xf32> to vector<4x13x13xf32>
    %16 = arith.mulf %11, %15 : vector<4x13x13xf32>
    %17 = arith.truncf %16 : vector<4x13x13xf32> to vector<4x13x13xbf16>
    "tpu.trace_start"() <{level = 10 : i32, message = "hqk,hkd->hqd"}> : () -> ()
    %cst_13 = arith.constant dense<0.000000e+00> : vector<4x13x32xf32>
    %18 = tpu.matmul %17, %5, %cst_13 {dimension_numbers = #tpu.dot_dimension_numbers<[2], [1], [1], [2], [0, 0, 0, 1, 1, 2], [0], [0]>} : vector<4x13x13xbf16>, vector<4x13x32xbf16>, vector<4x13x32xf32> -> vector<4x13x32xf32>
    "tpu.trace_stop"() : () -> ()
    %c0_14 = arith.constant 0 : index
    %c0_15 = arith.constant 0 : index
    %c0_16 = arith.constant 0 : index
    %19 = vector.load %arg4[%c0_14, %c0_15, %c0_16] : memref<1x13x128xf32, #tpu.memory_space<vmem>>, vector<1x13x128xf32>
    %20 = vector.shape_cast %19 : vector<1x13x128xf32> to vector<13x128xf32>
    %c0_17 = arith.constant 0 : index
    %c0_18 = arith.constant 0 : index
    %21 = vector.load %arg6[%c0_17, %c0_18] : memref<1x128xf32, #tpu.memory_space<vmem>>, vector<1x128xf32>
    %22 = vector.broadcast %21 : vector<1x128xf32> to vector<13x128xf32>
    %23 = arith.addf %20, %22 : vector<13x128xf32>
    %24 = vector.extract_strided_slice %18 {offsets = [0, 0, 0], sizes = [1, 13, 32], strides = [1, 1, 1]} : vector<4x13x32xf32> to vector<1x13x32xf32>
    %25 = vector.shape_cast %24 : vector<1x13x32xf32> to vector<13x32xf32>
    %26 = arith.truncf %25 : vector<13x32xf32> to vector<13x32xbf16>
    %c0_19 = arith.constant 0 : index
    %c0_20 = arith.constant 0 : index
    %c0_21 = arith.constant 0 : index
    %27 = vector.load %arg5[%c0_19, %c0_20, %c0_21] : memref<4x32x128xbf16, #tpu.memory_space<vmem>>, vector<1x32x128xbf16>
    %28 = vector.shape_cast %27 : vector<1x32x128xbf16> to vector<32x128xbf16>
    %cst_22 = arith.constant dense<0.000000e+00> : vector<13x128xf32>
    %29 = tpu.matmul %26, %28, %cst_22 {dimension_numbers = #tpu.dot_dimension_numbers<[1], [0], [0], [1], [0, 0, 1, 1], [], []>} : vector<13x32xbf16>, vector<32x128xbf16>, vector<13x128xf32> -> vector<13x128xf32>
    %30 = arith.addf %23, %29 : vector<13x128xf32>
    %31 = vector.extract_strided_slice %18 {offsets = [1, 0, 0], sizes = [1, 13, 32], strides = [1, 1, 1]} : vector<4x13x32xf32> to vector<1x13x32xf32>
    %32 = vector.shape_cast %31 : vector<1x13x32xf32> to vector<13x32xf32>
    %33 = arith.truncf %32 : vector<13x32xf32> to vector<13x32xbf16>
    %c1 = arith.constant 1 : index
    %c0_23 = arith.constant 0 : index
    %c0_24 = arith.constant 0 : index
    %34 = vector.load %arg5[%c1, %c0_23, %c0_24] : memref<4x32x128xbf16, #tpu.memory_space<vmem>>, vector<1x32x128xbf16>
    %35 = vector.shape_cast %34 : vector<1x32x128xbf16> to vector<32x128xbf16>
    %cst_25 = arith.constant dense<0.000000e+00> : vector<13x128xf32>
    %36 = tpu.matmul %33, %35, %cst_25 {dimension_numbers = #tpu.dot_dimension_numbers<[1], [0], [0], [1], [0, 0, 1, 1], [], []>} : vector<13x32xbf16>, vector<32x128xbf16>, vector<13x128xf32> -> vector<13x128xf32>
    %37 = arith.addf %30, %36 : vector<13x128xf32>
    %38 = vector.extract_strided_slice %18 {offsets = [2, 0, 0], sizes = [1, 13, 32], strides = [1, 1, 1]} : vector<4x13x32xf32> to vector<1x13x32xf32>
    %39 = vector.shape_cast %38 : vector<1x13x32xf32> to vector<13x32xf32>
    %40 = arith.truncf %39 : vector<13x32xf32> to vector<13x32xbf16>
    %c2 = arith.constant 2 : index
    %c0_26 = arith.constant 0 : index
    %c0_27 = arith.constant 0 : index
    %41 = vector.load %arg5[%c2, %c0_26, %c0_27] : memref<4x32x128xbf16, #tpu.memory_space<vmem>>, vector<1x32x128xbf16>
    %42 = vector.shape_cast %41 : vector<1x32x128xbf16> to vector<32x128xbf16>
    %cst_28 = arith.constant dense<0.000000e+00> : vector<13x128xf32>
    %43 = tpu.matmul %40, %42, %cst_28 {dimension_numbers = #tpu.dot_dimension_numbers<[1], [0], [0], [1], [0, 0, 1, 1], [], []>} : vector<13x32xbf16>, vector<32x128xbf16>, vector<13x128xf32> -> vector<13x128xf32>
    %44 = arith.addf %37, %43 : vector<13x128xf32>
    %45 = vector.extract_strided_slice %18 {offsets = [3, 0, 0], sizes = [1, 13, 32], strides = [1, 1, 1]} : vector<4x13x32xf32> to vector<1x13x32xf32>
    %46 = vector.shape_cast %45 : vector<1x13x32xf32> to vector<13x32xf32>
    %47 = arith.truncf %46 : vector<13x32xf32> to vector<13x32xbf16>
    %c3 = arith.constant 3 : index
    %c0_29 = arith.constant 0 : index
    %c0_30 = arith.constant 0 : index
    %48 = vector.load %arg5[%c3, %c0_29, %c0_30] : memref<4x32x128xbf16, #tpu.memory_space<vmem>>, vector<1x32x128xbf16>
    %49 = vector.shape_cast %48 : vector<1x32x128xbf16> to vector<32x128xbf16>
    %cst_31 = arith.constant dense<0.000000e+00> : vector<13x128xf32>
    %50 = tpu.matmul %47, %49, %cst_31 {dimension_numbers = #tpu.dot_dimension_numbers<[1], [0], [0], [1], [0, 0, 1, 1], [], []>} : vector<13x32xbf16>, vector<32x128xbf16>, vector<13x128xf32> -> vector<13x128xf32>
    %51 = arith.addf %44, %50 : vector<13x128xf32>
    %c0_32 = arith.constant 0 : index
    %c0_33 = arith.constant 0 : index
    %c0_34 = arith.constant 0 : index
    %52 = vector.load %arg7[%c0_32, %c0_33, %c0_34] : memref<1x13x128xf32, #tpu.memory_space<vmem>>, vector<1x13x128xf32>
    %53 = vector.shape_cast %52 : vector<1x13x128xf32> to vector<13x128xf32>
    %54 = vector.shape_cast %51 : vector<13x128xf32> to vector<1x13x128xf32>
    tpu.vector_store %arg7[%c0_32, %c0_33, %c0_34], %54 {strides = array<i32>} : memref<1x13x128xf32, #tpu.memory_space<vmem>>, vector<1x13x128xf32>,
    return
  }
  func.func @transform_0(%arg0: i32) -> (i32, i32, i32, i32) {
    %c0_i32 = arith.constant 0 : i32
    %c0_i32_0 = arith.constant 0 : i32
    %c0_i32_1 = arith.constant 0 : i32
    %c0_i32_2 = arith.constant 0 : i32
    return %arg0, %c0_i32, %c0_i32_0, %c0_i32_1 : i32, i32, i32, i32
  }
  func.func @transform_1(%arg0: i32) -> (i32, i32, i32, i32) {
    %c0_i32 = arith.constant 0 : i32
    %c0_i32_0 = arith.constant 0 : i32
    %c0_i32_1 = arith.constant 0 : i32
    %c0_i32_2 = arith.constant 0 : i32
    return %arg0, %c0_i32, %c0_i32_0, %c0_i32_1 : i32, i32, i32, i32
  }
  func.func @transform_2(%arg0: i32) -> (i32, i32, i32, i32) {
    %c0_i32 = arith.constant 0 : i32
    %c0_i32_0 = arith.constant 0 : i32
    %c0_i32_1 = arith.constant 0 : i32
    %c0_i32_2 = arith.constant 0 : i32
    return %arg0, %c0_i32, %c0_i32_0, %c0_i32_1 : i32, i32, i32, i32
  }
  func.func @transform_3(%arg0: i32) -> (i32, i32, i32) {
    %c0_i32 = arith.constant 0 : i32
    %c0_i32_0 = arith.constant 0 : i32
    %c0_i32_1 = arith.constant 0 : i32
    return %arg0, %c0_i32, %c0_i32_0 : i32, i32, i32
  }
  func.func @transform_4(%arg0: i32) -> (i32, i32, i32) {
    %c0_i32 = arith.constant 0 : i32
    %c0_i32_0 = arith.constant 0 : i32
    %c0_i32_1 = arith.constant 0 : i32
    %c0_i32_2 = arith.constant 0 : i32
    return %c0_i32, %c0_i32_0, %c0_i32_1 : i32, i32, i32
  }
  func.func @transform_5(%arg0: i32) -> (i32, i32) {
    %c0_i32 = arith.constant 0 : i32
    %c0_i32_0 = arith.constant 0 : i32
    %c0_i32_1 = arith.constant 0 : i32
    return %c0_i32, %c0_i32_0 : i32, i32
  }
  func.func @transform_6(%arg0: i32) -> (i32, i32, i32) {
    %c0_i32 = arith.constant 0 : i32
    %c0_i32_0 = arith.constant 0 : i32
    %c0_i32_1 = arith.constant 0 : i32
    return %arg0, %c0_i32, %c0_i32_0 : i32, i32, i32
  }
}

module attributes {stable_mosaic.version = 11 : i64} {
  func.func @_ln_ffn_kernel(%arg0: i32, %arg1: memref<26x128xf32, #tpu.memory_space<vmem>>, %arg2: memref<1x128xf32, #tpu.memory_space<vmem>>, %arg3: memref<1x128xf32, #tpu.memory_space<vmem>>, %arg4: memref<128x512xbf16, #tpu.memory_space<vmem>>, %arg5: memref<1x512xf32, #tpu.memory_space<vmem>>, %arg6: memref<512x128xbf16, #tpu.memory_space<vmem>>, %arg7: memref<1x128xf32, #tpu.memory_space<vmem>>, %arg8: memref<26x128xf32, #tpu.memory_space<vmem>>) attributes {dimension_semantics = [#tpu.dimension_semantics<parallel>], iteration_bounds = array<i64: 1>, scalar_prefetch = 0 : i64, scratch_operands = 0 : i64, tpu.core_type = #tpu.core_type<tc>, window_params = [{transform_indices = @transform_0, window_bounds = array<i64: 26, 128>}, {pipeline_mode = #tpu.pipeline_mode<synchronous>, transform_indices = @transform_1, window_bounds = array<i64: 1, 128>}, {pipeline_mode = #tpu.pipeline_mode<synchronous>, transform_indices = @transform_2, window_bounds = array<i64: 1, 128>}, {pipeline_mode = #tpu.pipeline_mode<synchronous>, transform_indices = @transform_3, window_bounds = array<i64: 128, 512>}, {pipeline_mode = #tpu.pipeline_mode<synchronous>, transform_indices = @transform_4, window_bounds = array<i64: 1, 512>}, {pipeline_mode = #tpu.pipeline_mode<synchronous>, transform_indices = @transform_5, window_bounds = array<i64: 512, 128>}, {pipeline_mode = #tpu.pipeline_mode<synchronous>, transform_indices = @transform_6, window_bounds = array<i64: 1, 128>}, {transform_indices = @transform_7, window_bounds = array<i64: 26, 128>}]} {
    %c0 = arith.constant 0 : index
    %c0_0 = arith.constant 0 : index
    %0 = vector.load %arg1[%c0, %c0_0] : memref<26x128xf32, #tpu.memory_space<vmem>>, vector<26x128xf32>
    %c0_1 = arith.constant 0 : index
    %c0_2 = arith.constant 0 : index
    %1 = vector.load %arg2[%c0_1, %c0_2] : memref<1x128xf32, #tpu.memory_space<vmem>>, vector<1x128xf32>
    %c0_3 = arith.constant 0 : index
    %c0_4 = arith.constant 0 : index
    %2 = vector.load %arg3[%c0_3, %c0_4] : memref<1x128xf32, #tpu.memory_space<vmem>>, vector<1x128xf32>
    %cst = arith.constant dense<0.000000e+00> : vector<26xf32>
    %3 = vector.multi_reduction <add>, %0, %cst [1] : vector<26x128xf32> to vector<26xf32>
    %4 = vector.shape_cast %3 : vector<26xf32> to vector<26x1xf32>
    %cst_5 = arith.constant 1.280000e+02 : f32
    %5 = vector.broadcast %cst_5 : f32 to vector<26x1xf32>
    %6 = arith.divf %4, %5 : vector<26x1xf32>
    %7 = vector.broadcast %6 : vector<26x1xf32> to vector<26x128xf32>
    %8 = arith.subf %0, %7 : vector<26x128xf32>
    %9 = arith.mulf %8, %8 : vector<26x128xf32>
    %cst_6 = arith.constant dense<0.000000e+00> : vector<26xf32>
    %10 = vector.multi_reduction <add>, %9, %cst_6 [1] : vector<26x128xf32> to vector<26xf32>
    %11 = vector.shape_cast %10 : vector<26xf32> to vector<26x1xf32>
    %cst_7 = arith.constant 1.280000e+02 : f32
    %12 = vector.broadcast %cst_7 : f32 to vector<26x1xf32>
    %13 = arith.divf %11, %12 : vector<26x1xf32>
    %cst_8 = arith.constant 9.99999974E-6 : f32
    %14 = vector.broadcast %cst_8 : f32 to vector<26x1xf32>
    %15 = arith.addf %13, %14 : vector<26x1xf32>
    %16 = math.rsqrt %15 : vector<26x1xf32>
    %17 = vector.broadcast %16 : vector<26x1xf32> to vector<26x128xf32>
    %18 = arith.mulf %8, %17 : vector<26x128xf32>
    %19 = vector.broadcast %1 : vector<1x128xf32> to vector<26x128xf32>
    %20 = arith.mulf %18, %19 : vector<26x128xf32>
    %21 = vector.broadcast %2 : vector<1x128xf32> to vector<26x128xf32>
    %22 = arith.addf %20, %21 : vector<26x128xf32>
    %23 = arith.truncf %22 : vector<26x128xf32> to vector<26x128xbf16>
    %c0_9 = arith.constant 0 : index
    %c0_10 = arith.constant 0 : index
    %24 = vector.load %arg4[%c0_9, %c0_10] : memref<128x512xbf16, #tpu.memory_space<vmem>>, vector<128x512xbf16>
    %cst_11 = arith.constant dense<0.000000e+00> : vector<26x512xf32>
    %25 = tpu.matmul %23, %24, %cst_11 {dimension_numbers = #tpu.dot_dimension_numbers<[1], [0], [0], [1], [0, 0, 1, 1], [], []>} : vector<26x128xbf16>, vector<128x512xbf16>, vector<26x512xf32> -> vector<26x512xf32>
    %c0_12 = arith.constant 0 : index
    %c0_13 = arith.constant 0 : index
    %26 = vector.load %arg5[%c0_12, %c0_13] : memref<1x512xf32, #tpu.memory_space<vmem>>, vector<1x512xf32>
    %27 = vector.broadcast %26 : vector<1x512xf32> to vector<26x512xf32>
    %28 = arith.addf %25, %27 : vector<26x512xf32>
    %29 = arith.mulf %28, %28 : vector<26x512xf32>
    %30 = arith.mulf %28, %29 : vector<26x512xf32>
    %cst_14 = arith.constant 4.471500e-02 : f32
    %31 = vector.broadcast %cst_14 : f32 to vector<26x512xf32>
    %32 = arith.mulf %31, %30 : vector<26x512xf32>
    %33 = arith.addf %28, %32 : vector<26x512xf32>
    %cst_15 = arith.constant 0.797884583 : f32
    %34 = vector.broadcast %cst_15 : f32 to vector<26x512xf32>
    %35 = arith.mulf %34, %33 : vector<26x512xf32>
    %36 = math.tanh %35 : vector<26x512xf32>
    %cst_16 = arith.constant 1.000000e+00 : f32
    %37 = vector.broadcast %cst_16 : f32 to vector<26x512xf32>
    %38 = arith.addf %37, %36 : vector<26x512xf32>
    %cst_17 = arith.constant 5.000000e-01 : f32
    %39 = vector.broadcast %cst_17 : f32 to vector<26x512xf32>
    %40 = arith.mulf %39, %38 : vector<26x512xf32>
    %41 = arith.mulf %28, %40 : vector<26x512xf32>
    %42 = arith.truncf %41 : vector<26x512xf32> to vector<26x512xbf16>
    %c0_18 = arith.constant 0 : index
    %c0_19 = arith.constant 0 : index
    %43 = vector.load %arg6[%c0_18, %c0_19] : memref<512x128xbf16, #tpu.memory_space<vmem>>, vector<512x128xbf16>
    %cst_20 = arith.constant dense<0.000000e+00> : vector<26x128xf32>
    %44 = tpu.matmul %42, %43, %cst_20 {dimension_numbers = #tpu.dot_dimension_numbers<[1], [0], [0], [1], [0, 0, 1, 1], [], []>} : vector<26x512xbf16>, vector<512x128xbf16>, vector<26x128xf32> -> vector<26x128xf32>
    %c0_21 = arith.constant 0 : index
    %c0_22 = arith.constant 0 : index
    %45 = vector.load %arg7[%c0_21, %c0_22] : memref<1x128xf32, #tpu.memory_space<vmem>>, vector<1x128xf32>
    %46 = vector.broadcast %45 : vector<1x128xf32> to vector<26x128xf32>
    %47 = arith.addf %44, %46 : vector<26x128xf32>
    %48 = arith.addf %0, %47 : vector<26x128xf32>
    %c0_23 = arith.constant 0 : index
    %c0_24 = arith.constant 0 : index
    %49 = vector.load %arg8[%c0_23, %c0_24] : memref<26x128xf32, #tpu.memory_space<vmem>>, vector<26x128xf32>
    tpu.vector_store %arg8[%c0_23, %c0_24], %48 {strides = array<i32>} : memref<26x128xf32, #tpu.memory_space<vmem>>, vector<26x128xf32>,
    return
  }
  func.func @transform_0(%arg0: i32) -> (i32, i32) {
    %c0_i32 = arith.constant 0 : i32
    %c0_i32_0 = arith.constant 0 : i32
    return %arg0, %c0_i32 : i32, i32
  }
  func.func @transform_1(%arg0: i32) -> (i32, i32) {
    %c0_i32 = arith.constant 0 : i32
    %c0_i32_0 = arith.constant 0 : i32
    %c0_i32_1 = arith.constant 0 : i32
    return %c0_i32, %c0_i32_0 : i32, i32
  }
  func.func @transform_2(%arg0: i32) -> (i32, i32) {
    %c0_i32 = arith.constant 0 : i32
    %c0_i32_0 = arith.constant 0 : i32
    %c0_i32_1 = arith.constant 0 : i32
    return %c0_i32, %c0_i32_0 : i32, i32
  }
  func.func @transform_3(%arg0: i32) -> (i32, i32) {
    %c0_i32 = arith.constant 0 : i32
    %c0_i32_0 = arith.constant 0 : i32
    %c0_i32_1 = arith.constant 0 : i32
    return %c0_i32, %c0_i32_0 : i32, i32
  }
  func.func @transform_4(%arg0: i32) -> (i32, i32) {
    %c0_i32 = arith.constant 0 : i32
    %c0_i32_0 = arith.constant 0 : i32
    %c0_i32_1 = arith.constant 0 : i32
    return %c0_i32, %c0_i32_0 : i32, i32
  }
  func.func @transform_5(%arg0: i32) -> (i32, i32) {
    %c0_i32 = arith.constant 0 : i32
    %c0_i32_0 = arith.constant 0 : i32
    %c0_i32_1 = arith.constant 0 : i32
    return %c0_i32, %c0_i32_0 : i32, i32
  }
  func.func @transform_6(%arg0: i32) -> (i32, i32) {
    %c0_i32 = arith.constant 0 : i32
    %c0_i32_0 = arith.constant 0 : i32
    %c0_i32_1 = arith.constant 0 : i32
    return %c0_i32, %c0_i32_0 : i32, i32
  }
  func.func @transform_7(%arg0: i32) -> (i32, i32) {
    %c0_i32 = arith.constant 0 : i32
    %c0_i32_0 = arith.constant 0 : i32
    return %arg0, %c0_i32 : i32, i32
  }
}

module attributes {stable_mosaic.version = 11 : i64} {
  func.func @_conv1x1_kernel(%arg0: i32, %arg1: i32, %arg2: memref<1x128x4xf32, #tpu.memory_space<vmem>>, %arg3: memref<64x128xbf16, #tpu.memory_space<vmem>>, %arg4: memref<64x1xf32, #tpu.memory_space<vmem>>, %arg5: memref<1x64x4xf32, #tpu.memory_space<vmem>>) attributes {dimension_semantics = [#tpu.dimension_semantics<parallel>, #tpu.dimension_semantics<parallel>], iteration_bounds = array<i64: 2, 1>, scalar_prefetch = 0 : i64, scratch_operands = 0 : i64, tpu.core_type = #tpu.core_type<tc>, window_params = [{transform_indices = @transform_0, window_bounds = array<i64: 1, 128, 4>}, {pipeline_mode = #tpu.pipeline_mode<synchronous>, transform_indices = @transform_1, window_bounds = array<i64: 64, 128>}, {pipeline_mode = #tpu.pipeline_mode<synchronous>, transform_indices = @transform_2, window_bounds = array<i64: 64, 1>}, {transform_indices = @transform_3, window_bounds = array<i64: 1, 64, 4>}]} {
    %c0 = arith.constant 0 : index
    %c0_0 = arith.constant 0 : index
    %0 = vector.load %arg3[%c0, %c0_0] : memref<64x128xbf16, #tpu.memory_space<vmem>>, vector<64x128xbf16>
    %c0_1 = arith.constant 0 : index
    %c0_2 = arith.constant 0 : index
    %c0_3 = arith.constant 0 : index
    %1 = vector.load %arg2[%c0_1, %c0_2, %c0_3] : memref<1x128x4xf32, #tpu.memory_space<vmem>>, vector<1x128x4xf32>
    %2 = vector.shape_cast %1 : vector<1x128x4xf32> to vector<128x4xf32>
    %3 = arith.truncf %2 : vector<128x4xf32> to vector<128x4xbf16>
    %cst = arith.constant dense<0.000000e+00> : vector<64x4xf32>
    %4 = tpu.matmul %0, %3, %cst {dimension_numbers = #tpu.dot_dimension_numbers<[1], [0], [0], [1], [0, 0, 1, 1], [], []>} : vector<64x128xbf16>, vector<128x4xbf16>, vector<64x4xf32> -> vector<64x4xf32>
    %c0_4 = arith.constant 0 : index
    %c0_5 = arith.constant 0 : index
    %5 = vector.load %arg4[%c0_4, %c0_5] : memref<64x1xf32, #tpu.memory_space<vmem>>, vector<64x1xf32>
    %6 = vector.broadcast %5 : vector<64x1xf32> to vector<64x4xf32>
    %7 = arith.addf %4, %6 : vector<64x4xf32>
    %c0_6 = arith.constant 0 : index
    %c0_7 = arith.constant 0 : index
    %c0_8 = arith.constant 0 : index
    %8 = vector.load %arg5[%c0_6, %c0_7, %c0_8] : memref<1x64x4xf32, #tpu.memory_space<vmem>>, vector<1x64x4xf32>
    %9 = vector.shape_cast %8 : vector<1x64x4xf32> to vector<64x4xf32>
    %10 = vector.shape_cast %7 : vector<64x4xf32> to vector<1x64x4xf32>
    tpu.vector_store %arg5[%c0_6, %c0_7, %c0_8], %10 {strides = array<i32>} : memref<1x64x4xf32, #tpu.memory_space<vmem>>, vector<1x64x4xf32>,
    return
  }
  func.func @transform_0(%arg0: i32, %arg1: i32) -> (i32, i32, i32) {
    %c0_i32 = arith.constant 0 : i32
    %c0_i32_0 = arith.constant 0 : i32
    return %arg0, %c0_i32, %arg1 : i32, i32, i32
  }
  func.func @transform_1(%arg0: i32, %arg1: i32) -> (i32, i32) {
    %c0_i32 = arith.constant 0 : i32
    %c0_i32_0 = arith.constant 0 : i32
    %c0_i32_1 = arith.constant 0 : i32
    return %c0_i32, %c0_i32_0 : i32, i32
  }
  func.func @transform_2(%arg0: i32, %arg1: i32) -> (i32, i32) {
    %c0_i32 = arith.constant 0 : i32
    %c0_i32_0 = arith.constant 0 : i32
    %c0_i32_1 = arith.constant 0 : i32
    return %c0_i32, %c0_i32_0 : i32, i32
  }
  func.func @transform_3(%arg0: i32, %arg1: i32) -> (i32, i32, i32) {
    %c0_i32 = arith.constant 0 : i32
    %c0_i32_0 = arith.constant 0 : i32
    return %arg0, %c0_i32, %arg1 : i32, i32, i32
  }
}

module attributes {stable_mosaic.version = 11 : i64} {
  func.func @_conv1x1_kernel(%arg0: i32, %arg1: i32, %arg2: memref<1x64x16xf32, #tpu.memory_space<vmem>>, %arg3: memref<64x64xbf16, #tpu.memory_space<vmem>>, %arg4: memref<64x1xf32, #tpu.memory_space<vmem>>, %arg5: memref<1x64x16xf32, #tpu.memory_space<vmem>>) attributes {dimension_semantics = [#tpu.dimension_semantics<parallel>, #tpu.dimension_semantics<parallel>], iteration_bounds = array<i64: 2, 1>, scalar_prefetch = 0 : i64, scratch_operands = 0 : i64, tpu.core_type = #tpu.core_type<tc>, window_params = [{transform_indices = @transform_0, window_bounds = array<i64: 1, 64, 16>}, {pipeline_mode = #tpu.pipeline_mode<synchronous>, transform_indices = @transform_1, window_bounds = array<i64: 64, 64>}, {pipeline_mode = #tpu.pipeline_mode<synchronous>, transform_indices = @transform_2, window_bounds = array<i64: 64, 1>}, {transform_indices = @transform_3, window_bounds = array<i64: 1, 64, 16>}]} {
    %c0 = arith.constant 0 : index
    %c0_0 = arith.constant 0 : index
    %0 = vector.load %arg3[%c0, %c0_0] : memref<64x64xbf16, #tpu.memory_space<vmem>>, vector<64x64xbf16>
    %c0_1 = arith.constant 0 : index
    %c0_2 = arith.constant 0 : index
    %c0_3 = arith.constant 0 : index
    %1 = vector.load %arg2[%c0_1, %c0_2, %c0_3] : memref<1x64x16xf32, #tpu.memory_space<vmem>>, vector<1x64x16xf32>
    %2 = vector.shape_cast %1 : vector<1x64x16xf32> to vector<64x16xf32>
    %3 = arith.truncf %2 : vector<64x16xf32> to vector<64x16xbf16>
    %cst = arith.constant dense<0.000000e+00> : vector<64x16xf32>
    %4 = tpu.matmul %0, %3, %cst {dimension_numbers = #tpu.dot_dimension_numbers<[1], [0], [0], [1], [0, 0, 1, 1], [], []>} : vector<64x64xbf16>, vector<64x16xbf16>, vector<64x16xf32> -> vector<64x16xf32>
    %c0_4 = arith.constant 0 : index
    %c0_5 = arith.constant 0 : index
    %5 = vector.load %arg4[%c0_4, %c0_5] : memref<64x1xf32, #tpu.memory_space<vmem>>, vector<64x1xf32>
    %6 = vector.broadcast %5 : vector<64x1xf32> to vector<64x16xf32>
    %7 = arith.addf %4, %6 : vector<64x16xf32>
    %c0_6 = arith.constant 0 : index
    %c0_7 = arith.constant 0 : index
    %c0_8 = arith.constant 0 : index
    %8 = vector.load %arg5[%c0_6, %c0_7, %c0_8] : memref<1x64x16xf32, #tpu.memory_space<vmem>>, vector<1x64x16xf32>
    %9 = vector.shape_cast %8 : vector<1x64x16xf32> to vector<64x16xf32>
    %10 = vector.shape_cast %7 : vector<64x16xf32> to vector<1x64x16xf32>
    tpu.vector_store %arg5[%c0_6, %c0_7, %c0_8], %10 {strides = array<i32>} : memref<1x64x16xf32, #tpu.memory_space<vmem>>, vector<1x64x16xf32>,
    return
  }
  func.func @transform_0(%arg0: i32, %arg1: i32) -> (i32, i32, i32) {
    %c0_i32 = arith.constant 0 : i32
    %c0_i32_0 = arith.constant 0 : i32
    return %arg0, %c0_i32, %arg1 : i32, i32, i32
  }
  func.func @transform_1(%arg0: i32, %arg1: i32) -> (i32, i32) {
    %c0_i32 = arith.constant 0 : i32
    %c0_i32_0 = arith.constant 0 : i32
    %c0_i32_1 = arith.constant 0 : i32
    return %c0_i32, %c0_i32_0 : i32, i32
  }
  func.func @transform_2(%arg0: i32, %arg1: i32) -> (i32, i32) {
    %c0_i32 = arith.constant 0 : i32
    %c0_i32_0 = arith.constant 0 : i32
    %c0_i32_1 = arith.constant 0 : i32
    return %c0_i32, %c0_i32_0 : i32, i32
  }
  func.func @transform_3(%arg0: i32, %arg1: i32) -> (i32, i32, i32) {
    %c0_i32 = arith.constant 0 : i32
    %c0_i32_0 = arith.constant 0 : i32
    return %arg0, %c0_i32, %arg1 : i32, i32, i32
  }
}

module attributes {stable_mosaic.version = 11 : i64} {
  func.func @_conv1x1_kernel(%arg0: i32, %arg1: i32, %arg2: memref<1x64x64xf32, #tpu.memory_space<vmem>>, %arg3: memref<32x64xbf16, #tpu.memory_space<vmem>>, %arg4: memref<32x1xf32, #tpu.memory_space<vmem>>, %arg5: memref<1x32x64xf32, #tpu.memory_space<vmem>>) attributes {dimension_semantics = [#tpu.dimension_semantics<parallel>, #tpu.dimension_semantics<parallel>], iteration_bounds = array<i64: 2, 1>, scalar_prefetch = 0 : i64, scratch_operands = 0 : i64, tpu.core_type = #tpu.core_type<tc>, window_params = [{transform_indices = @transform_0, window_bounds = array<i64: 1, 64, 64>}, {pipeline_mode = #tpu.pipeline_mode<synchronous>, transform_indices = @transform_1, window_bounds = array<i64: 32, 64>}, {pipeline_mode = #tpu.pipeline_mode<synchronous>, transform_indices = @transform_2, window_bounds = array<i64: 32, 1>}, {transform_indices = @transform_3, window_bounds = array<i64: 1, 32, 64>}]} {
    %c0 = arith.constant 0 : index
    %c0_0 = arith.constant 0 : index
    %0 = vector.load %arg3[%c0, %c0_0] : memref<32x64xbf16, #tpu.memory_space<vmem>>, vector<32x64xbf16>
    %c0_1 = arith.constant 0 : index
    %c0_2 = arith.constant 0 : index
    %c0_3 = arith.constant 0 : index
    %1 = vector.load %arg2[%c0_1, %c0_2, %c0_3] : memref<1x64x64xf32, #tpu.memory_space<vmem>>, vector<1x64x64xf32>
    %2 = vector.shape_cast %1 : vector<1x64x64xf32> to vector<64x64xf32>
    %3 = arith.truncf %2 : vector<64x64xf32> to vector<64x64xbf16>
    %cst = arith.constant dense<0.000000e+00> : vector<32x64xf32>
    %4 = tpu.matmul %0, %3, %cst {dimension_numbers = #tpu.dot_dimension_numbers<[1], [0], [0], [1], [0, 0, 1, 1], [], []>} : vector<32x64xbf16>, vector<64x64xbf16>, vector<32x64xf32> -> vector<32x64xf32>
    %c0_4 = arith.constant 0 : index
    %c0_5 = arith.constant 0 : index
    %5 = vector.load %arg4[%c0_4, %c0_5] : memref<32x1xf32, #tpu.memory_space<vmem>>, vector<32x1xf32>
    %6 = vector.broadcast %5 : vector<32x1xf32> to vector<32x64xf32>
    %7 = arith.addf %4, %6 : vector<32x64xf32>
    %c0_6 = arith.constant 0 : index
    %c0_7 = arith.constant 0 : index
    %c0_8 = arith.constant 0 : index
    %8 = vector.load %arg5[%c0_6, %c0_7, %c0_8] : memref<1x32x64xf32, #tpu.memory_space<vmem>>, vector<1x32x64xf32>
    %9 = vector.shape_cast %8 : vector<1x32x64xf32> to vector<32x64xf32>
    %10 = vector.shape_cast %7 : vector<32x64xf32> to vector<1x32x64xf32>
    tpu.vector_store %arg5[%c0_6, %c0_7, %c0_8], %10 {strides = array<i32>} : memref<1x32x64xf32, #tpu.memory_space<vmem>>, vector<1x32x64xf32>,
    return
  }
  func.func @transform_0(%arg0: i32, %arg1: i32) -> (i32, i32, i32) {
    %c0_i32 = arith.constant 0 : i32
    %c0_i32_0 = arith.constant 0 : i32
    return %arg0, %c0_i32, %arg1 : i32, i32, i32
  }
  func.func @transform_1(%arg0: i32, %arg1: i32) -> (i32, i32) {
    %c0_i32 = arith.constant 0 : i32
    %c0_i32_0 = arith.constant 0 : i32
    %c0_i32_1 = arith.constant 0 : i32
    return %c0_i32, %c0_i32_0 : i32, i32
  }
  func.func @transform_2(%arg0: i32, %arg1: i32) -> (i32, i32) {
    %c0_i32 = arith.constant 0 : i32
    %c0_i32_0 = arith.constant 0 : i32
    %c0_i32_1 = arith.constant 0 : i32
    return %c0_i32, %c0_i32_0 : i32, i32
  }
  func.func @transform_3(%arg0: i32, %arg1: i32) -> (i32, i32, i32) {
    %c0_i32 = arith.constant 0 : i32
    %c0_i32_0 = arith.constant 0 : i32
    return %arg0, %c0_i32, %arg1 : i32, i32, i32
  }
}

module attributes {stable_mosaic.version = 11 : i64} {
  func.func @_conv1x1_kernel(%arg0: i32, %arg1: i32, %arg2: memref<1x32x256xf32, #tpu.memory_space<vmem>>, %arg3: memref<32x32xbf16, #tpu.memory_space<vmem>>, %arg4: memref<32x1xf32, #tpu.memory_space<vmem>>, %arg5: memref<1x32x256xf32, #tpu.memory_space<vmem>>) attributes {dimension_semantics = [#tpu.dimension_semantics<parallel>, #tpu.dimension_semantics<parallel>], iteration_bounds = array<i64: 2, 1>, scalar_prefetch = 0 : i64, scratch_operands = 0 : i64, tpu.core_type = #tpu.core_type<tc>, window_params = [{transform_indices = @transform_0, window_bounds = array<i64: 1, 32, 256>}, {pipeline_mode = #tpu.pipeline_mode<synchronous>, transform_indices = @transform_1, window_bounds = array<i64: 32, 32>}, {pipeline_mode = #tpu.pipeline_mode<synchronous>, transform_indices = @transform_2, window_bounds = array<i64: 32, 1>}, {transform_indices = @transform_3, window_bounds = array<i64: 1, 32, 256>}]} {
    %c0 = arith.constant 0 : index
    %c0_0 = arith.constant 0 : index
    %0 = vector.load %arg3[%c0, %c0_0] : memref<32x32xbf16, #tpu.memory_space<vmem>>, vector<32x32xbf16>
    %c0_1 = arith.constant 0 : index
    %c0_2 = arith.constant 0 : index
    %c0_3 = arith.constant 0 : index
    %1 = vector.load %arg2[%c0_1, %c0_2, %c0_3] : memref<1x32x256xf32, #tpu.memory_space<vmem>>, vector<1x32x256xf32>
    %2 = vector.shape_cast %1 : vector<1x32x256xf32> to vector<32x256xf32>
    %3 = arith.truncf %2 : vector<32x256xf32> to vector<32x256xbf16>
    %cst = arith.constant dense<0.000000e+00> : vector<32x256xf32>
    %4 = tpu.matmul %0, %3, %cst {dimension_numbers = #tpu.dot_dimension_numbers<[1], [0], [0], [1], [0, 0, 1, 1], [], []>} : vector<32x32xbf16>, vector<32x256xbf16>, vector<32x256xf32> -> vector<32x256xf32>
    %c0_4 = arith.constant 0 : index
    %c0_5 = arith.constant 0 : index
    %5 = vector.load %arg4[%c0_4, %c0_5] : memref<32x1xf32, #tpu.memory_space<vmem>>, vector<32x1xf32>
    %6 = vector.broadcast %5 : vector<32x1xf32> to vector<32x256xf32>
    %7 = arith.addf %4, %6 : vector<32x256xf32>
    %c0_6 = arith.constant 0 : index
    %c0_7 = arith.constant 0 : index
    %c0_8 = arith.constant 0 : index
    %8 = vector.load %arg5[%c0_6, %c0_7, %c0_8] : memref<1x32x256xf32, #tpu.memory_space<vmem>>, vector<1x32x256xf32>
    %9 = vector.shape_cast %8 : vector<1x32x256xf32> to vector<32x256xf32>
    %10 = vector.shape_cast %7 : vector<32x256xf32> to vector<1x32x256xf32>
    tpu.vector_store %arg5[%c0_6, %c0_7, %c0_8], %10 {strides = array<i32>} : memref<1x32x256xf32, #tpu.memory_space<vmem>>, vector<1x32x256xf32>,
    return
  }
  func.func @transform_0(%arg0: i32, %arg1: i32) -> (i32, i32, i32) {
    %c0_i32 = arith.constant 0 : i32
    %c0_i32_0 = arith.constant 0 : i32
    return %arg0, %c0_i32, %arg1 : i32, i32, i32
  }
  func.func @transform_1(%arg0: i32, %arg1: i32) -> (i32, i32) {
    %c0_i32 = arith.constant 0 : i32
    %c0_i32_0 = arith.constant 0 : i32
    %c0_i32_1 = arith.constant 0 : i32
    return %c0_i32, %c0_i32_0 : i32, i32
  }
  func.func @transform_2(%arg0: i32, %arg1: i32) -> (i32, i32) {
    %c0_i32 = arith.constant 0 : i32
    %c0_i32_0 = arith.constant 0 : i32
    %c0_i32_1 = arith.constant 0 : i32
    return %c0_i32, %c0_i32_0 : i32, i32
  }
  func.func @transform_3(%arg0: i32, %arg1: i32) -> (i32, i32, i32) {
    %c0_i32 = arith.constant 0 : i32
    %c0_i32_0 = arith.constant 0 : i32
    return %arg0, %c0_i32, %arg1 : i32, i32, i32
  }
}

module attributes {stable_mosaic.version = 11 : i64} {
  func.func @_conv1x1_kernel(%arg0: i32, %arg1: i32, %arg2: memref<1x32x512xf32, #tpu.memory_space<vmem>>, %arg3: memref<1x32xbf16, #tpu.memory_space<vmem>>, %arg4: memref<1x1xf32, #tpu.memory_space<vmem>>, %arg5: memref<1x1x512xf32, #tpu.memory_space<vmem>>) attributes {dimension_semantics = [#tpu.dimension_semantics<parallel>, #tpu.dimension_semantics<parallel>], iteration_bounds = array<i64: 2, 2>, scalar_prefetch = 0 : i64, scratch_operands = 0 : i64, tpu.core_type = #tpu.core_type<tc>, window_params = [{transform_indices = @transform_0, window_bounds = array<i64: 1, 32, 512>}, {pipeline_mode = #tpu.pipeline_mode<synchronous>, transform_indices = @transform_1, window_bounds = array<i64: 1, 32>}, {pipeline_mode = #tpu.pipeline_mode<synchronous>, transform_indices = @transform_2, window_bounds = array<i64: 1, 1>}, {transform_indices = @transform_3, window_bounds = array<i64: 1, 1, 512>}]} {
    %c0 = arith.constant 0 : index
    %c0_0 = arith.constant 0 : index
    %0 = vector.load %arg3[%c0, %c0_0] : memref<1x32xbf16, #tpu.memory_space<vmem>>, vector<1x32xbf16>
    %c0_1 = arith.constant 0 : index
    %c0_2 = arith.constant 0 : index
    %c0_3 = arith.constant 0 : index
    %1 = vector.load %arg2[%c0_1, %c0_2, %c0_3] : memref<1x32x512xf32, #tpu.memory_space<vmem>>, vector<1x32x512xf32>
    %2 = vector.shape_cast %1 : vector<1x32x512xf32> to vector<32x512xf32>
    %3 = arith.truncf %2 : vector<32x512xf32> to vector<32x512xbf16>
    %cst = arith.constant dense<0.000000e+00> : vector<1x512xf32>
    %4 = tpu.matmul %0, %3, %cst {dimension_numbers = #tpu.dot_dimension_numbers<[1], [0], [0], [1], [0, 0, 1, 1], [], []>} : vector<1x32xbf16>, vector<32x512xbf16>, vector<1x512xf32> -> vector<1x512xf32>
    %c0_4 = arith.constant 0 : index
    %c0_5 = arith.constant 0 : index
    %5 = vector.load %arg4[%c0_4, %c0_5] : memref<1x1xf32, #tpu.memory_space<vmem>>, vector<1x1xf32>
    %6 = vector.broadcast %5 : vector<1x1xf32> to vector<1x512xf32>
    %7 = arith.addf %4, %6 : vector<1x512xf32>
    %c0_6 = arith.constant 0 : index
    %c0_7 = arith.constant 0 : index
    %c0_8 = arith.constant 0 : index
    %8 = vector.load %arg5[%c0_6, %c0_7, %c0_8] : memref<1x1x512xf32, #tpu.memory_space<vmem>>, vector<1x1x512xf32>
    %9 = vector.shape_cast %8 : vector<1x1x512xf32> to vector<1x512xf32>
    %10 = vector.shape_cast %7 : vector<1x512xf32> to vector<1x1x512xf32>
    tpu.vector_store %arg5[%c0_6, %c0_7, %c0_8], %10 {strides = array<i32>} : memref<1x1x512xf32, #tpu.memory_space<vmem>>, vector<1x1x512xf32>,
    return
  }
  func.func @transform_0(%arg0: i32, %arg1: i32) -> (i32, i32, i32) {
    %c0_i32 = arith.constant 0 : i32
    %c0_i32_0 = arith.constant 0 : i32
    return %arg0, %c0_i32, %arg1 : i32, i32, i32
  }
  func.func @transform_1(%arg0: i32, %arg1: i32) -> (i32, i32) {
    %c0_i32 = arith.constant 0 : i32
    %c0_i32_0 = arith.constant 0 : i32
    %c0_i32_1 = arith.constant 0 : i32
    return %c0_i32, %c0_i32_0 : i32, i32
  }
  func.func @transform_2(%arg0: i32, %arg1: i32) -> (i32, i32) {
    %c0_i32 = arith.constant 0 : i32
    %c0_i32_0 = arith.constant 0 : i32
    %c0_i32_1 = arith.constant 0 : i32
    return %c0_i32, %c0_i32_0 : i32, i32
  }
  func.func @transform_3(%arg0: i32, %arg1: i32) -> (i32, i32, i32) {
    %c0_i32 = arith.constant 0 : i32
    %c0_i32_0 = arith.constant 0 : i32
    return %arg0, %c0_i32, %arg1 : i32, i32, i32
  }
}

</mosaic_0001>

<bundles_post_ra>
// kernel: depth_only_forward.12
= control target key start
LH: loop header
LB: loop body
LE: loop exit
PB: predicated region body
PF: predicated region fallthrough
CT: control target
= control target key end

     0   :  { %s334_s1 = inlined_call_operand.vmem [shape: bf16[256,128], index: 1, kind: input, shape index: {}]   ;;  %s335_s0 = inlined_call_operand.vmem [shape: f32[8,256], index: 0, kind: input, shape index: {}]   ;;  %s336_s2 = inlined_call_operand.vmem [shape: f32[1,128], index: 2, kind: input, shape index: {}]   ;;  %s337_s3 = inlined_call_operand.vmem [shape: f32[8,128], index: 3, kind: output, shape index: {}]  }
   0x1   :  { %v238_v0 = vld [vmem:[%s334_s1 + $0x78] sm:$0xff]   ;;  %v240_v2 = vld [vmem:[%s334_s1 + $0x70] sm:$0xff]   ;;  %v242_v4 = vld [vmem:[%s334_s1 + $0x68] sm:$0xff]  }
   0x2   :  { %v239_v1 = vld [vmem:[%s334_s1 + $0x38] sm:$0xff]   ;;  %216 = vmatprep.subr.bf16.mxu0 %v238_v0  ;;  %v241_v3 = vld [vmem:[%s334_s1 + $0x30] sm:$0xff]   ;;  %v243_v5 = vld [vmem:[%s334_s1 + $0x28] sm:$0xff]  }
   0x3   :  { %217 = vmatpush3.bf16.msra.mxu0 %v239_v1  ;;  %v244_v6 = vld [vmem:[%s334_s1 + $0x60] sm:$0xff]   ;;  %v246_v8 = vld [vmem:[%s334_s1 + $0x58] sm:$0xff]   ;;  %v248_v10 = vld [vmem:[%s334_s1 + $0x50] sm:$0xff]  }
   0x4   :  { %218 = vmatprep.subr.bf16.mxu0 %v240_v2  ;;  %v245_v7 = vld [vmem:[%s334_s1 + $0x20] sm:$0xff]   ;;  %v247_v9 = vld [vmem:[%s334_s1 + $0x18] sm:$0xff]   ;;  %v16_v11 = vld [vmem:[%s335_s0 + $0x8] sm:$0xff] }
   0x5   :  { %v18_v12 = vpack.c.bf16 %v16_v11, %v16_v11  ;;  %v249_v13 = vld [vmem:[%s334_s1 + $0x10] sm:$0xff]   ;;  %v250_v14 = vld [vmem:[%s334_s1 + $0x48] sm:$0xff]   ;;  %v252_v16 = vld [vmem:[%s334_s1 + $0x40] sm:$0xff]  }
   0x6   :  { %v251_v15 = vld [vmem:[%s334_s1 + $0x8] sm:$0xff]   ;;  %v253_v17 = vld [vmem:[%s334_s1] sm:$0xff]  }
   0x7   :  { %219 = vmatpush3.bf16.msra.mxu0 %v241_v3  ;;  %186 = vmatprep.mubr.bf16.mxu0 %v18_v12  ;;  %v15_v18 = vld [vmem:[%s335_s0] sm:$0xff] }
   0x8   :  { %220 = vmatprep.subr.bf16.mxu0 %v242_v4  ;;  %v17_v19 = vpack.c.bf16 %v15_v18, %v15_v18  ;;  %v199_v21 = vld [vmem:[%s336_s2] ss:$0 sm:$0xff] }
   0xb   :  { %221 = vmatpush3.bf16.msra.mxu0 %v243_v5 }
   0xc   :  { %222 = vmatprep.subr.bf16.mxu0 %v244_v6 }
   0xf   :  { %223 = vmatpush3.bf16.msra.mxu0 %v245_v7 }
  0x10   :  { %224 = vmatprep.subr.bf16.mxu0 %v246_v8 }
  0x13   :  { %225 = vmatpush3.bf16.msra.mxu0 %v247_v9 }
  0x14   :  { %226 = vmatprep.subr.bf16.mxu0 %v248_v10 }
  0x17   :  { %227 = vmatpush3.bf16.msra.mxu0 %v249_v13 }
  0x18   :  { %228 = vmatprep.subr.bf16.mxu0 %v250_v14 }
  0x1b   :  { %229 = vmatpush3.bf16.msra.mxu0 %v251_v15 }
  0x1c   :  { %230 = vmatprep.subr.bf16.mxu0 %v252_v16 }
  0x1f   :  { %231 = vmatpush3.bf16.msra.mxu0 %v253_v17 }
  0x22   :  { %187 = vmatmul.mubr.bf16.vlgmr.msra.gmra.mxu0 %v17_v19 }
  0xe2   :  { %v232_v20 = vpop.f32.mrf.mxu0 }
  0xe4   :  { %v233_v22 = vpop.f32.mrf.mxu0 }
  0xe5   :  { %v234_v23 = vadd.f32 %v233_v22, %v232_v20 }
  0xe6   :  { %v235_v24 = vpop.f32.mrf.mxu0 }
  0xe7   :  { %v189_v25 = vadd.f32 %v234_v23, %v199_v21 }
  0xe8   :  { %v236_v26 = vpop.f32.mrf.mxu0 }
  0xe9   :  { %194 = vst [vmem:[%s337_s3] sm:$0xff] %v189_v25 }

// kernel: depth_only_forward.13
= control target key start
LH: loop header
LB: loop body
LE: loop exit
PB: predicated region body
PF: predicated region fallthrough
CT: control target
= control target key end

     0   :  { %vm30_vm0 = vcmask 1041408   ;;  %v521_v41 = vmov 0   ;;  %s683_s0 = inlined_call_operand.vmem [shape: f32[26,128], index: 0, kind: input, shape index: {}]   ;;  %s684_s3 = inlined_call_operand.vmem [shape: bf16[128,384], index: 3, kind: input, shape index: {}]   ;;  %s685_s1 = inlined_call_operand.vmem [shape: f32[1,128], index: 1, kind: input, shape index: {}]   ;;  %s686_s2 = inlined_call_operand.vmem [shape: f32[1,128], index: 2, kind: input, shape index: {}]   ;;  %s687_s4 = inlined_call_operand.vmem [shape: bf16[26,384], index: 4, kind: output, shape index: {}]  }
   0x1   :  { %v18_v0 = vld [vmem:[%s683_s0] sm:$0xff]  ;;  %v21_v1 = vld [vmem:[%s683_s0 + $0x18] sm:$0x3]  ;;  %v19_v3 = vld [vmem:[%s683_s0 + $0x8] sm:$0xff]  ;;  %286 = vmatprep.mubr.bf16.mxu0 %v521_v41 }
   0x2   :  { %24 = vadd.xlane.f32.xlu0 %v18_v0  ;;  %v31_v2 = vsel %vm30_vm0, %v21_v1, 0.0  ;;  %v20_v4 = vld [vmem:[%s683_s0 + $0x10] sm:$0xff]  ;;  %v481_v5 = vld [vmem:[%s684_s3 + $0xac] ss:$12 sps:$4 sm:$0xff]   ;;  %v488_v27 = vld [vmem:[%s684_s3 + $0x7c] ss:$12 sps:$4 sm:$0xff]  }
   0x3   :  { %32 = vadd.xlane.f32.xlu1 %v31_v2  ;;  %v483_v6 = vld [vmem:[%s684_s3 + $0xa8] ss:$12 sps:$4 sm:$0xff]   ;;  %254 = vmatprep.subr.bf16.mxu0 %v481_v5  ;;  %v486_v25 = vld [vmem:[%s684_s3 + $0xb0] ss:$12 sps:$4 sm:$0xff]   ;;  %v490_v28 = vld [vmem:[%s684_s3 + $0x98] ss:$12 sps:$4 sm:$0xff]  }
   0x4   :  { %255 = vmatpush1.bf16.msra.mxu0 %v483_v6  ;;  %v484_v24 = vld [vmem:[%s684_s3 + $0x94] ss:$12 sps:$4 sm:$0xff]   ;;  %v487_v26 = vld [vmem:[%s684_s3 + $0x90] ss:$12 sps:$4 sm:$0xff]   ;;  %460 = vmatprep.subr.bf16.mxu1 %v486_v25  ;;  %v491_v29 = vld [vmem:[%s684_s3 + $0x78] ss:$12 sps:$4 sm:$0xff]  }
   0x5   :  { %256 = vmatprep.subr.bf16.mxu0 %v484_v24  ;;  %461 = vmatpush3.bf16.msra.mxu1 %v486_v25  ;;  %v492_v30 = vld [vmem:[%s684_s3 + $0x64] ss:$12 sps:$4 sm:$0xff]   ;;  %v494_v31 = vld [vmem:[%s684_s3 + $0x80] ss:$12 sps:$4 sm:$0xff]   ;;  %v498_v34 = vld [vmem:[%s684_s3 + $0x68] ss:$12 sps:$4 sm:$0xff]  }
   0x6   :  { %26 = vadd.xlane.f32.xlu0 %v19_v3  ;;  %462 = vmatprep.subr.bf16.mxu1 %v490_v28  ;;  %v495_v32 = vld [vmem:[%s684_s3 + $0x60] ss:$12 sps:$4 sm:$0xff]   ;;  %v499_v35 = vld [vmem:[%s684_s3 + $0x48] ss:$12 sps:$4 sm:$0xff]   ;;  %v502_v37 = vld [vmem:[%s684_s3 + $0x50] ss:$12 sps:$4 sm:$0xff]  }
   0x7   :  { %28 = vadd.xlane.f32.xlu1 %v20_v4  ;;  %v496_v33 = vld [vmem:[%s684_s3 + $0x4c] ss:$12 sps:$4 sm:$0xff]   ;;  %v500_v36 = vld [vmem:[%s684_s3 + $0x34] ss:$12 sps:$4 sm:$0xff]   ;;  %v503_v38 = vld [vmem:[%s684_s3 + $0x30] ss:$12 sps:$4 sm:$0xff]  }
   0x8   :  { %257 = vmatpush1.bf16.msra.mxu0 %v487_v26  ;;  %v504_v39 = vld [vmem:[%s684_s3 + $0x1c] ss:$12 sps:$4 sm:$0xff]   ;;  %v506_v40 = vld [vmem:[%s684_s3 + $0x38] ss:$12 sps:$4 sm:$0xff]   ;;  %v510_v44 = vld [vmem:[%s684_s3 + $0x20] ss:$12 sps:$4 sm:$0xff]  }
   0x9   :  { %258 = vmatprep.subr.bf16.mxu0 %v488_v27  ;;  %463 = vmatpush3.bf16.msra.mxu1 %v490_v28  ;;  %v507_v42 = vld [vmem:[%s684_s3 + $0x18] ss:$12 sps:$4 sm:$0xff]   ;;  %v511_v45 = vld [vmem:[%s684_s3] ss:$12 sps:$4 sm:$0xff]   ;;  %v512_v46 = vld [vmem:[%s684_s3 + $0x8] ss:$12 sps:$4 sm:$0xff]  }
   0xa   :  { %464 = vmatprep.subr.bf16.mxu1 %v494_v31  ;;  %v508_v43 = vld [vmem:[%s684_s3 + $0x4] ss:$12 sps:$4 sm:$0xff]   ;;  %v408_v61 = vld [vmem:[%s685_s1] ss:$0 sm:$0xff] }
   0xb   :  { %v409_v2 = vld [vmem:[%s686_s2] ss:$0 sm:$0xff] }
   0xc   :  { %259 = vmatpush1.bf16.msra.mxu0 %v491_v29 }
   0xd   :  { %260 = vmatprep.subr.bf16.mxu0 %v492_v30  ;;  %465 = vmatpush3.bf16.msra.mxu1 %v494_v31 }
   0xe   :  { %466 = vmatprep.subr.bf16.mxu1 %v498_v34 }
  0x10   :  { %261 = vmatpush1.bf16.msra.mxu0 %v495_v32 }
  0x11   :  { %262 = vmatprep.subr.bf16.mxu0 %v496_v33  ;;  %467 = vmatpush3.bf16.msra.mxu1 %v498_v34 }
  0x12   :  { %468 = vmatprep.subr.bf16.mxu1 %v502_v37 }
  0x14   :  { %263 = vmatpush1.bf16.msra.mxu0 %v499_v35 }
  0x15   :  { %264 = vmatprep.subr.bf16.mxu0 %v500_v36  ;;  %469 = vmatpush3.bf16.msra.mxu1 %v502_v37 }
  0x16   :  { %470 = vmatprep.subr.bf16.mxu1 %v506_v40 }
  0x18   :  { %265 = vmatpush1.bf16.msra.mxu0 %v503_v38 }
  0x19   :  { %266 = vmatprep.subr.bf16.mxu0 %v504_v39  ;;  %471 = vmatpush3.bf16.msra.mxu1 %v506_v40 }
  0x1a   :  { %472 = vmatprep.subr.bf16.mxu1 %v510_v44 }
  0x1c   :  { %267 = vmatpush1.bf16.msra.mxu0 %v507_v42 }
  0x1d   :  { %268 = vmatprep.subr.bf16.mxu0 %v508_v43  ;;  %473 = vmatpush3.bf16.msra.mxu1 %v510_v44 }
  0x1e   :  { %474 = vmatprep.subr.bf16.mxu1 %v512_v46 }
  0x20   :  { %269 = vmatpush1.bf16.msra.mxu0 %v511_v45 }
  0x21   :  { %475 = vmatpush3.bf16.msra.mxu1 %v512_v46 }
  0x8b   :  { %v25_v7 = vpop.xlane.xlu0 %24 }
  0x8c   :  { %v35_v8 = vmul.f32 0.0078125, %v25_v7  ;;  %v33_v9 = vpop.xlane.xlu1 %32 }
  0x8d   :  { %v38_v10 = vmul.f32 0.0078125, %v33_v9 }
  0x8e   :  { %v566_v11 = vsub.f32 %v18_v0, %v35_v8 }
  0x8f   :  { %v568_v12 = vsub.f32 %v21_v1, %v38_v10  ;;  %v27_v13 = vpop.xlane.xlu0 %26 }
  0x90   :  { %v36_v14 = vmul.f32 0.0078125, %v27_v13  ;;  %v29_v15 = vpop.xlane.xlu1 %28  ;;  %v43_v16 = vmul.f32 %v566_v11, %v566_v11 }
  0x91   :  { %v37_v17 = vmul.f32 0.0078125, %v29_v15  ;;  %v46_v20 = vmul.f32 %v568_v12, %v568_v12 }
  0x92   :  { %v572_v18 = vsub.f32 %v19_v3, %v36_v14  ;;  %47 = vadd.xlane.f32.xlu0 %v43_v16 }
  0x93   :  { %v574_v19 = vsub.f32 %v20_v4, %v37_v17  ;;  %v53_v23 = vsel %vm30_vm0, %v46_v20, 0.0 }
  0x94   :  { %v44_v21 = vmul.f32 %v572_v18, %v572_v18 }
  0x95   :  { %v45_v22 = vmul.f32 %v574_v19, %v574_v19 }
  0x96   :  { %49 = vadd.xlane.f32.xlu1 %v44_v21 }
  0x97   :  { %51 = vadd.xlane.f32.xlu0 %v45_v22 }
  0x9a   :  { %54 = vadd.xlane.f32.xlu1 %v53_v23 }
 0x11b   :  { %v48_v47 = vpop.xlane.xlu0 %47 }
 0x11c   :  { %v56_v48 = vmul.f32 0.0078125, %v48_v47 }
 0x11e   :  { %v60_v49 = vadd.f32 1e-05, %v56_v48 }
 0x11f   :  { %v50_v50 = vpop.xlane.xlu1 %49 }
 0x120   :  { %513 = vrsqrt.f32 %v60_v49  ;;  %v57_v51 = vmul.f32 0.0078125, %v50_v50  ;;  %v52_v52 = vpop.xlane.xlu0 %51 }
 0x121   :  { %v58_v53 = vmul.f32 0.0078125, %v52_v52 }
 0x122   :  { %v61_v54 = vadd.f32 1e-05, %v57_v51 }
 0x123   :  { %v62_v55 = vadd.f32 1e-05, %v58_v53  ;;  %v55_v56 = vpop.xlane.xlu1 %54 }
 0x124   :  { %515 = vrsqrt.f32 %v61_v54  ;;  %v59_v57 = vmul.f32 0.0078125, %v55_v56 }
 0x125   :  { %517 = vrsqrt.f32 %v62_v55 }
 0x126   :  { %v63_v58 = vadd.f32 1e-05, %v59_v57 }
 0x128   :  { %519 = vrsqrt.f32 %v63_v58 }
 0x12d   :  { %v514_v59 = vpop.eup %513 }
 0x12e   :  { %v68_v60 = vmul.f32 %v514_v59, %v566_v11 }
 0x130   :  { %v78_v1 = vmul.f32 %v408_v61, %v68_v60 }
 0x131   :  { %v516_v62 = vpop.eup %515 }
 0x132   :  { %v518_v63 = vpop.eup %517  ;;  %v69_v0 = vmul.f32 %v516_v62, %v572_v18  ;;  %v88_v6 = vadd.f32 %v409_v2, %v78_v1 }
 0x133   :  { %v70_v3 = vmul.f32 %v518_v63, %v574_v19 }
 0x134   :  { %v79_v4 = vmul.f32 %v408_v61, %v69_v0 }
 0x135   :  { %v520_v5 = vpop.eup %519  ;;  %v80_v9 = vmul.f32 %v408_v61, %v70_v3 }
 0x136   :  { %v89_v7 = vadd.f32 %v409_v2, %v79_v4  ;;  %v71_v8 = vmul.f32 %v520_v5, %v568_v12 }
 0x137   :  { %v90_v13 = vadd.f32 %v409_v2, %v80_v9 }
 0x138   :  { %v92_v10 = vpack.c.bf16 %v89_v7, %v88_v6  ;;  %v81_v11 = vmul.f32 %v408_v61, %v71_v8 }
 0x13a   :  { %287 = vmatmul.mubr.bf16.vlgmr.msra.gmra.mxu0 %v92_v10  ;;  %476 = vmatprep.mubr.bf16.mxu1 %v92_v10  ;;  %v91_v14 = vadd.f32 %v409_v2, %v81_v11 }
 0x13b   :  { %296 = vmatprep.mubr.bf16.mxu0 %v521_v41 }
 0x13c   :  { %v93_v15 = vpack.c.bf16 %v91_v14, %v90_v13 }
 0x13e   :  { %477 = vmatmul.mubr.bf16.vlgmr.msra.gmra.mxu1 %v93_v15 }
 0x142   :  { %297 = vmatmul.mubr.bf16.gmra.mxu0 %v93_v15 }
 0x1fa   :  { %v288_v16 = vpop.f32.mrf.mxu0 }
 0x1fc   :  { %v290_v17 = vpop.f32.mrf.mxu0 }
 0x1fd   :  { %v442_v18 = vpack.c.bf16 %v290_v17, %v288_v16 }
 0x1fe   :  { %v292_v19 = vpop.f32.mrf.mxu0  ;;  %v478_v20 = vpop.f32.mrf.mxu1 }
 0x1ff   :  { %396 = vst [vmem:[%s687_s4] sm:$0xff] %v442_v18  ;;  %v447_v12 = vpack.c.bf16 %v478_v20, %v478_v20 }
 0x200   :  { %v294_v21 = vpop.f32.mrf.mxu0  ;;  %v341_v22 = vpop.f32.mrf.mxu1 }
 0x201   :  { %401 = vst [vmem:[%s687_s4 + $0x20] sm:$0xf] %v447_v12  ;;  %v444_v23 = vpack.c.bf16 %v294_v21, %v292_v19  ;;  %v443_v24 = vpack.c.bf16 %v341_v22, %v341_v22 }
 0x202   :  { %v298_v25 = vpop.f32.mrf.mxu0  ;;  %v479_v26 = vpop.f32.mrf.mxu1 }
 0x203   :  { %398 = vst [vmem:[%s687_s4 + $0xc] sm:$0xff] %v444_v23  ;;  %397 = vst [vmem:[%s687_s4 + $0x8] sm:$0xf] %v443_v24  ;;  %v449_v27 = vpack.c.bf16 %v479_v26, %v479_v26 }
 0x204   :  { %v300_v28 = vpop.f32.mrf.mxu0  ;;  %v344_v29 = vpop.f32.mrf.mxu1 }
 0x205   :  { %403 = vst [vmem:[%s687_s4 + $0x2c] sm:$0x1] %v449_v27  ;;  %v446_v30 = vpack.c.bf16 %v300_v28, %v298_v25  ;;  %v445_v31 = vpack.c.bf16 %v344_v29, %v344_v29 }
 0x206   :  { %v302_v32 = vpop.f32.mrf.mxu0 }
 0x207   :  { %400 = vst [vmem:[%s687_s4 + $0x18] sm:$0xff] %v446_v30  ;;  %399 = vst [vmem:[%s687_s4 + $0x14] sm:$0xf] %v445_v31 }
 0x208   :  { %v304_v33 = vpop.f32.mrf.mxu0 }
 0x209   :  { %v448_v34 = vpack.c.bf16 %v304_v33, %v302_v32 }
 0x20b   :  { %402 = vst [vmem:[%s687_s4 + $0x24] sm:$0x11] %v448_v34 }

// kernel: depth_only_forward.14
= control target key start
LH: loop header
LB: loop body
LE: loop exit
PB: predicated region body
PF: predicated region fallthrough
CT: control target
= control target key end

     0   :  { %s1515_s21 = smov 0   ;;  %s1662_s0 = inlined_call_operand.vmem [shape: bf16[2,4,13,32], index: 0, kind: input, shape index: {}]   ;;  %s1663_s1 = inlined_call_operand.vmem [shape: bf16[2,4,13,32], index: 1, kind: input, shape index: {}]   ;;  %s1664_s2 = inlined_call_operand.vmem [shape: bf16[2,4,13,32], index: 2, kind: input, shape index: {}]   ;;  %s1665_s3 = inlined_call_operand.vmem [shape: f32[2,13,128], index: 3, kind: input, shape index: {}]   ;;  %s1666_s4 = inlined_call_operand.vmem [shape: bf16[4,32,128], index: 4, kind: input, shape index: {}]   ;;  %s1667_s5 = inlined_call_operand.vmem [shape: f32[1,128], index: 5, kind: input, shape index: {}]   ;;  %s1668_s6 = inlined_call_operand.vmem [shape: f32[2,13,128], index: 6, kind: output, shape index: {}]  }
   0x1 LB: > { %s1231_s22 = sadd.s32 4294967295, %s1475_s21   ;;  %p1235_p0 = scmp.ge.s32.totalorder %s1475_s21, 1  ;;  %s1475_s21 = sphi %s1515_s21, %s16_s21  }
   0x2   : > { %p242_p1 = scmp.lt.s32.totalorder %s1475_s21, 3 }
   0x4   : > { %p243_p2 = pnand %p1235_p0, %p242_p1 }
   0x5   : > { %p287_p3 = scmp.lt.s32.totalorder (!%p243_p2), %s1231_s22, 1 }
   0x6   : > { %246 = sbr.rel (%p243_p2) target bundleno = 946 (0x3b2), region = 44 }
   0xb   : > { %v1477_v0 = vmov 0.0   ;;  %s1670_s22 = smov (!%p287_p3, %s1231_s22), 1  ;;  %vm1478_vm0 = vmmov 0   ;;  %vm347_vm1 = vcmask 261120   ;;  %vm566_vm2 = vcmask 105472  }
   0xc   : > { %1326 = vmatprep.subr.bf16.mxu0 %v1477_v0  ;;  %1332 = vmatprep.subr.bf16.mxu1 %v1477_v0  ;;  %s1293_s23 = sshll.u32 %s1670_s22, 5  ;;  %vm570_vm3 = vcmask 102400   ;;  %vm668_vm4 = vcmask 1045504   ;;  %vm669_vm5 = vcmask 1046528   ;;  %s1296_s27 = sshll.u32 %s1670_s22, 4 }
   0xd   : > { %1328 = vmatprep.mubr.msk.bf16.mxu0 %vm1478_vm0, %v1477_v0  ;;  %1334 = vmatprep.mubr.msk.bf16.mxu1 %vm1478_vm0, %v1477_v0  ;;  %s296_s26 = scalar_lea.vmem %s1663_s1, %s1293_s23  ;;  %s291_s29 = scalar_lea.vmem %s1662_s0, %s1293_s23 }
   0xe   : > { %v1417_v1 = vld [vmem:[%s296_s26] sm:$0x7f]   ;;  %v1418_v2 = vld [vmem:[%s296_s26 + $0x8] sm:$0x7f]   ;;  %v1421_v6 = vld [vmem:[%s296_s26 + $0x10] sm:$0x7f]   ;;  %s1545_s8 = scalar_lea.vmem %s1664_s2, %s1293_s23  ;;  %s306_s30 = scalar_lea.vmem %s1665_s3, %s1296_s27 }
   0xf   : > { %v352_v3 = vsel %vm347_vm1, %v1417_v1, 0  ;;  %v409_v4 = vsel %vm347_vm1, %v1418_v2, 0  ;;  %v1419_v5 = vld [vmem:[%s291_s29] sm:$0x7f]   ;;  %v1422_v7 = vld [vmem:[%s296_s26 + $0x18] sm:$0x7f]   ;;  %s311_s10 = scalar_lea.vmem %s1668_s6, %s1296_s27 }
  0x10   : > { %1327 = vmatpush3.bf16.xpose.msra.mxu0 %v352_v3  ;;  %1333 = vmatpush3.bf16.xpose.msra.mxu1 %v409_v4  ;;  %v1420_v8 = vld [vmem:[%s291_s29 + $0x8] sm:$0x7f]   ;;  %v466_v9 = vsel %vm347_vm1, %v1421_v6, 0  ;;  %v523_v10 = vsel %vm347_vm1, %v1422_v7, 0  ;;  %v1423_v11 = vld [vmem:[%s291_s29 + $0x10] sm:$0x7f]  }
  0x11   : > { %1338 = vmatprep.subr.bf16.mxu0 %v1477_v0  ;;  %1344 = vmatprep.subr.bf16.mxu1 %v1477_v0  ;;  %v1424_v12 = vld [vmem:[%s291_s29 + $0x18] sm:$0x7f]  }
  0x17   : > { %1329 = vmatmul.mubr.msk.bf16.vlgmr.msra.gmra.mxu0 %vm347_vm1, %v1419_v5  ;;  %1335 = vmatmul.mubr.msk.bf16.vlgmr.msra.gmra.mxu1 %vm347_vm1, %v1420_v8 }
  0x18   : > { %1339 = vmatpush3.bf16.xpose.msra.mxu0 %v466_v9  ;;  %1345 = vmatpush3.bf16.xpose.msra.mxu1 %v523_v10 }
  0x19   : > { %1340 = vmatprep.mubr.msk.bf16.mxu0 %vm1478_vm0, %v1477_v0  ;;  %1346 = vmatprep.mubr.msk.bf16.mxu1 %vm1478_vm0, %v1477_v0 }
  0x1a   : > { %1350 = vmatprep.subr.bf16.mxu0 %v1477_v0  ;;  %1356 = vmatprep.subr.bf16.mxu1 %v1477_v0 }
  0x1f   : > { %1341 = vmatmul.mubr.msk.bf16.vlgmr.msra.gmra.mxu0 %vm347_vm1, %v1423_v11  ;;  %1347 = vmatmul.mubr.msk.bf16.vlgmr.msra.gmra.mxu1 %vm347_vm1, %v1424_v12 }
  0x20   : > { %1352 = vmatprep.mubr.msk.bf16.mxu0 %vm1478_vm0, %v1477_v0  ;;  %1358 = vmatprep.mubr.msk.bf16.mxu1 %vm1478_vm0, %v1477_v0 }
  0xd7   : > { %v388_v13 = vpop.f32.mrf.mxu0  ;;  %v445_v14 = vpop.f32.mrf.mxu1 }
  0xd8   : > { %v567_v15 = vsel %vm566_vm2, %v388_v13, -inf  ;;  %v574_v16 = vsel %vm566_vm2, %v445_v14, -inf }
  0xd9   : > { %568 = vmax.xlane.f32.xlu0 %v567_v15  ;;  %v1330_v17 = vpop.f32.mrf.mxu0  ;;  %575 = vmax.xlane.f32.xlu1 %v574_v16  ;;  %v1336_v18 = vpop.f32.mrf.mxu1  ;;  %v1479_v15 = vmov 65535  }
  0xda   : > { %v670_v16 = vsel %vm668_vm4, 4294967295, %v1479_v15 }
  0xdb   : > { %v391_v19 = vpop.f32.mrf.mxu0  ;;  %v448_v20 = vpop.f32.mrf.mxu1  ;;  %v671_v17 = vsel %vm669_vm5, %v670_v16, 0 }
  0xdc   : > { %v571_v21 = vsel %vm570_vm3, %v391_v19, -inf  ;;  %v577_v22 = vsel %vm570_vm3, %v448_v20, -inf }
  0xdd   : > { %572 = vmax.xlane.f32.xlu0 %v571_v21  ;;  %v1331_v23 = vpop.f32.mrf.mxu0  ;;  %578 = vmax.xlane.f32.xlu1 %v577_v22  ;;  %v1337_v24 = vpop.f32.mrf.mxu1 }
  0xdf   : > { %v502_v25 = vpop.f32.mrf.mxu0  ;;  %v559_v26 = vpop.f32.mrf.mxu1 }
  0xe0   : > { %v580_v27 = vsel %vm566_vm2, %v502_v25, -inf  ;;  %v586_v30 = vsel %vm566_vm2, %v559_v26, -inf }
  0xe1   : > { %581 = vmax.xlane.f32.xlu0 %v580_v27  ;;  %v1342_v28 = vpop.f32.mrf.mxu0  ;;  %v1348_v29 = vpop.f32.mrf.mxu1 }
  0xe3   : > { %v505_v31 = vpop.f32.mrf.mxu0  ;;  %v562_v32 = vpop.f32.mrf.mxu1 }
  0xe4   : > { %v583_v33 = vsel %vm570_vm3, %v505_v31, -inf  ;;  %v589_v36 = vsel %vm570_vm3, %v562_v32, -inf }
  0xe5   : > { %587 = vmax.xlane.f32.xlu0 %v586_v30  ;;  %584 = vmax.xlane.f32.xlu1 %v583_v33  ;;  %v1343_v34 = vpop.f32.mrf.mxu0  ;;  %v1349_v35 = vpop.f32.mrf.mxu1  ;;  %v1427_v30 = vld [vmem:[%s1545_s8 + $0x10] sm:$0x7f]  }
  0xe6   : > { %v777_v35 = vand.u32 %v1427_v30, %v671_v17 }
  0xe9   : > { %590 = vmax.xlane.f32.xlu1 %v589_v36  ;;  %v1428_v36 = vld [vmem:[%s1545_s8 + $0x18] sm:$0x7f]  }
 0x162   : > { %v569_v37 = vpop.xlane.xlu0 %568  ;;  %v576_v38 = vpop.xlane.xlu1 %575 }
 0x163   : > { %v592_v39 = vsub.f32 %v388_v13, %v569_v37  ;;  %v594_v40 = vsub.f32 %v445_v14, %v576_v38  ;;  %v1425_v14 = vld [vmem:[%s1545_s8] sm:$0x7f]  }
 0x164   : > { %v673_v18 = vand.u32 %v1425_v14, %v671_v17 }
 0x165   : > { %v600_v41 = vmul.f32 1.442695, %v592_v39  ;;  %v604_v42 = vmul.f32 1.442695, %v594_v40 }
 0x166   : > { %v573_v43 = vpop.xlane.xlu0 %572  ;;  %v579_v44 = vpop.xlane.xlu1 %578  ;;  %1351 = vmatpush3.bf16.msra.mxu0 %v673_v18  ;;  %v872_v18 = vld [vmem:[%s306_s30] sm:$0xff] }
 0x167   : > { %1437 = vpow2.f32 %v600_v41  ;;  %v593_v45 = vsub.f32 %v391_v19, %v573_v43  ;;  %v595_v46 = vsub.f32 %v448_v20, %v579_v44  ;;  %v1426_v19 = vld [vmem:[%s1545_s8 + $0x8] sm:$0x7f]   ;;  %1362 = vmatprep.subr.bf16.mxu0 %v1477_v0 }
 0x168   : > { %1439 = vpow2.f32 %v604_v42  ;;  %v725_v20 = vand.u32 %v1426_v19, %v671_v17  ;;  %v829_v42 = vand.u32 %v1428_v36, %v671_v17 }
 0x169   : > { %v602_v47 = vmul.f32 1.442695, %v593_v45  ;;  %v606_v48 = vmul.f32 1.442695, %v595_v46 }
 0x16a   : > { %v582_v49 = vpop.xlane.xlu0 %581  ;;  %1357 = vmatpush3.bf16.msra.mxu1 %v725_v20 }
 0x16b   : > { %1441 = vpow2.f32 %v602_v47  ;;  %v596_v50 = vsub.f32 %v502_v25, %v582_v49  ;;  %1368 = vmatprep.subr.bf16.mxu1 %v1477_v0 }
 0x16c   : > { %1443 = vpow2.f32 %v606_v48 }
 0x16d   : > { %v608_v51 = vmul.f32 1.442695, %v596_v50 }
 0x16e   : > { %v588_v52 = vpop.xlane.xlu0 %587  ;;  %v585_v53 = vpop.xlane.xlu1 %584 }
 0x16f   : > { %1445 = vpow2.f32 %v608_v51  ;;  %v598_v54 = vsub.f32 %v559_v26, %v588_v52  ;;  %v597_v55 = vsub.f32 %v505_v31, %v585_v53  ;;  %v1429_v53 = vld [vmem:[%s1666_s4 + $0x8] sm:$0xff]  }
 0x171   : > { %v612_v56 = vmul.f32 1.442695, %v598_v54  ;;  %v610_v57 = vmul.f32 1.442695, %v597_v55  ;;  %v1430_v54 = vld [vmem:[%s1666_s4] sm:$0xff]   ;;  %v1431_v55 = vld [vmem:[%s1666_s4 + $0x18] sm:$0xff]  }
 0x172   : > { %v591_v58 = vpop.xlane.xlu1 %590 }
 0x173   : > { %1447 = vpow2.f32 %v612_v56  ;;  %v599_v59 = vsub.f32 %v562_v32, %v591_v58  ;;  %v1432_v56 = vld [vmem:[%s1666_s4 + $0x10] sm:$0xff]  }
 0x174   : > { %v1438_v60 = vpop.eup %1437  ;;  %1449 = vpow2.f32 %v610_v57 }
 0x175   : > { %v614_v61 = vmul.f32 1.442695, %v599_v59  ;;  %v616_v62 = vsel %vm566_vm2, %v1438_v60, 0.0  ;;  %v1572_v63 = vpop.eup %1439 }
 0x176   : > { %617 = vadd.xlane.f32.xlu0 %v616_v62  ;;  %v622_v2 = vsel %vm566_vm2, %v1572_v63, 0.0 }
 0x177   : > { %1451 = vpow2.f32 %v614_v61  ;;  %v1433_v61 = vld [vmem:[%s1666_s4 + $0x28] sm:$0xff]  }
 0x178   : > { %v1442_v1 = vpop.eup %1441 }
 0x179   : > { %v619_v3 = vsel %vm570_vm3, %v1442_v1, 0.0  ;;  %v1444_v4 = vpop.eup %1443 }
 0x17a   : > { %623 = vadd.xlane.f32.xlu0 %v622_v2  ;;  %620 = vadd.xlane.f32.xlu1 %v619_v3  ;;  %v625_v7 = vsel %vm570_vm3, %v1444_v4, 0.0 }
 0x17c   : > { %v1577_v5 = vpop.eup %1445 }
 0x17d   : > { %v628_v6 = vsel %vm566_vm2, %v1577_v5, 0.0 }
 0x17e   : > { %629 = vadd.xlane.f32.xlu0 %v628_v6  ;;  %626 = vadd.xlane.f32.xlu1 %v625_v7 }
 0x180   : > { %v1582_v8 = vpop.eup %1447 }
 0x181   : > { %v1450_v9 = vpop.eup %1449  ;;  %v634_v10 = vsel %vm566_vm2, %v1582_v8, 0.0 }
 0x182   : > { %635 = vadd.xlane.f32.xlu0 %v634_v10  ;;  %v631_v11 = vsel %vm570_vm3, %v1450_v9, 0.0 }
 0x183   : > { %632 = vadd.xlane.f32.xlu1 %v631_v11  ;;  %v1436_v11 = vld [vmem:[%s1666_s4 + $0x30] sm:$0xff]  }
 0x184   : > { %v1452_v12 = vpop.eup %1451 }
 0x185   : > { %v637_v13 = vsel %vm570_vm3, %v1452_v12, 0.0 }
 0x187   : > { %638 = vadd.xlane.f32.xlu1 %v637_v13 }
 0x1ff   : > { %v618_v21 = vpop.xlane.xlu0 %617 }
 0x200   : > { %1453 = vrcp.f32 %v618_v21 }
 0x203   : > { %v624_v22 = vpop.xlane.xlu0 %623  ;;  %v621_v23 = vpop.xlane.xlu1 %620 }
 0x204   : > { %1455 = vrcp.f32 %v621_v23 }
 0x205   : > { %1457 = vrcp.f32 %v624_v22  ;;  %v873_v22 = vld [vmem:[%s306_s30 + $0x8] sm:$0x1f] }
 0x207   : > { %v630_v24 = vpop.xlane.xlu0 %629  ;;  %v627_v25 = vpop.xlane.xlu1 %626 }
 0x208   : > { %1459 = vrcp.f32 %v627_v25 }
 0x209   : > { %1461 = vrcp.f32 %v630_v24 }
 0x20b   : > { %v636_v26 = vpop.xlane.xlu0 %635 }
 0x20c   : > { %v633_v27 = vpop.xlane.xlu1 %632 }
 0x20d   : > { %1463 = vrcp.f32 %v633_v27  ;;  %v1454_v28 = vpop.eup %1453 }
 0x20e   : > { %1465 = vrcp.f32 %v636_v26  ;;  %v648_v32 = vmul.f32 %v1454_v28, %v1438_v60 }
 0x210   : > { %v639_v29 = vpop.xlane.xlu1 %638 }
 0x211   : > { %1467 = vrcp.f32 %v639_v29  ;;  %v1456_v31 = vpop.eup %1455 }
 0x212   : > { %v649_v33 = vmul.f32 %v1456_v31, %v1442_v1  ;;  %v1458_v34 = vpop.eup %1457 }
 0x213   : > { %v650_v39 = vmul.f32 %v1458_v34, %v1572_v63 }
 0x214   : > { %v656_v37 = vpack.c.bf16 %v649_v33, %v648_v32 }
 0x215   : > { %v1460_v38 = vpop.eup %1459 }
 0x216   : > { %1353 = vmatmul.mubr.msk.bf16.vlgmr.msra.gmra.mxu0 %vm566_vm2, %v656_v37  ;;  %v651_v40 = vmul.f32 %v1460_v38, %v1444_v4  ;;  %v1462_v41 = vpop.eup %1461  ;;  %v1434_v4 = vld [vmem:[%s1666_s4 + $0x20] sm:$0xff]  }
 0x217   : > { %1363 = vmatpush3.bf16.msra.mxu0 %v777_v35  ;;  %1364 = vmatprep.mubr.msk.bf16.mxu0 %vm1478_vm0, %v1477_v0  ;;  %v652_v45 = vmul.f32 %v1462_v41, %v1577_v5  ;;  %v1435_v5 = vld [vmem:[%s1666_s4 + $0x38] sm:$0xff]  }
 0x218   : > { %v657_v43 = vpack.c.bf16 %v651_v40, %v650_v39  ;;  %1374 = vmatprep.subr.bf16.mxu0 %v1477_v0 }
 0x21a   : > { %v1464_v44 = vpop.eup %1463  ;;  %1359 = vmatmul.mubr.msk.bf16.vlgmr.msra.gmra.mxu1 %vm566_vm2, %v657_v43 }
 0x21b   : > { %v653_v46 = vmul.f32 %v1464_v44, %v1450_v9  ;;  %v1466_v47 = vpop.eup %1465  ;;  %1369 = vmatpush3.bf16.msra.mxu1 %v829_v42  ;;  %1370 = vmatprep.mubr.msk.bf16.mxu1 %vm1478_vm0, %v1477_v0 }
 0x21c   : > { %1382 = vmatprep.subr.bf16.mxu1 %v1477_v0  ;;  %v654_v50 = vmul.f32 %v1466_v47, %v1582_v8 }
 0x21d   : > { %v658_v48 = vpack.c.bf16 %v653_v46, %v652_v45 }
 0x21e   : > { %v1468_v49 = vpop.eup %1467 }
 0x21f   : > { %v655_v51 = vmul.f32 %v1468_v49, %v1452_v12  ;;  %1365 = vmatmul.mubr.msk.bf16.vlgmr.msra.gmra.mxu0 %vm566_vm2, %v658_v48 }
 0x220   : > { %1378 = vmatprep.mubr.msk.bf16.mxu0 %vm1478_vm0, %v1477_v0  ;;  %1375 = vmatpush3.bf16.msra.mxu0 %v1429_v53 }
 0x221   : > { %v659_v52 = vpack.c.bf16 %v655_v51, %v654_v50  ;;  %1376 = vmatprep.subr.bf16.mxu0 %v1477_v0 }
 0x223   : > { %1371 = vmatmul.mubr.msk.bf16.vlgmr.msra.gmra.mxu1 %vm566_vm2, %v659_v52 }
 0x224   : > { %1386 = vmatprep.mubr.msk.bf16.mxu1 %vm1478_vm0, %v1477_v0  ;;  %1377 = vmatpush3.bf16.msra.mxu0 %v1430_v54 }
 0x225   : > { %1383 = vmatpush3.bf16.msra.mxu1 %v1431_v55  ;;  %1390 = vmatprep.subr.bf16.mxu0 %v1477_v0 }
 0x226   : > { %1384 = vmatprep.subr.bf16.mxu1 %v1477_v0 }
 0x229   : > { %1385 = vmatpush3.bf16.msra.mxu1 %v1432_v56 }
 0x22a   : > { %1398 = vmatprep.subr.bf16.mxu1 %v1477_v0 }
 0x2d6   : > { %v709_v57 = vpop.f32.mrf.mxu0 }
 0x2d8   : > { %v1354_v58 = vpop.f32.mrf.mxu0 }
 0x2da   : > { %v712_v59 = vpop.f32.mrf.mxu0  ;;  %v761_v60 = vpop.f32.mrf.mxu1 }
 0x2db   : > { %v883_v62 = vpack.c.bf16 %v712_v59, %v709_v57 }
 0x2dc   : > { %v1355_v63 = vpop.f32.mrf.mxu0  ;;  %v1360_v1 = vpop.f32.mrf.mxu1 }
 0x2dd   : > { %1379 = vmatmul.mubr.msk.bf16.vlgmr.msra.gmra.mxu0 %vm347_vm1, %v883_v62 }
 0x2de   : > { %v764_v2 = vpop.f32.mrf.mxu1  ;;  %1391 = vmatpush3.bf16.msra.mxu0 %v1433_v61  ;;  %1394 = vmatprep.mubr.msk.bf16.mxu0 %vm1478_vm0, %v1477_v0 }
 0x2df   : > { %v813_v3 = vpop.f32.mrf.mxu0  ;;  %v946_v6 = vpack.c.bf16 %v764_v2, %v761_v60  ;;  %1392 = vmatprep.subr.bf16.mxu0 %v1477_v0 }
 0x2e0   : > { %v1361_v7 = vpop.f32.mrf.mxu1 }
 0x2e1   : > { %v1366_v8 = vpop.f32.mrf.mxu0  ;;  %1387 = vmatmul.mubr.msk.bf16.vlgmr.msra.gmra.mxu1 %vm347_vm1, %v946_v6 }
 0x2e2   : > { %1393 = vmatpush3.bf16.msra.mxu0 %v1434_v4  ;;  %1399 = vmatpush3.bf16.msra.mxu1 %v1435_v5 }
 0x2e3   : > { %v816_v9 = vpop.f32.mrf.mxu0  ;;  %v865_v10 = vpop.f32.mrf.mxu1  ;;  %1400 = vmatprep.subr.bf16.mxu1 %v1477_v0  ;;  %1402 = vmatprep.mubr.msk.bf16.mxu1 %vm1478_vm0, %v1477_v0  ;;  %v1266_v0 = vld [vmem:[%s1667_s5] ss:$0 sm:$0xff] }
 0x2e4   : > { %v1010_v12 = vpack.c.bf16 %v816_v9, %v813_v3  ;;  %v881_v21 = vadd.f32 %v1266_v0, %v872_v18  ;;  %v882_v28 = vadd.f32 %v1266_v0, %v873_v22 }
 0x2e5   : > { %v1367_v13 = vpop.f32.mrf.mxu0  ;;  %v1372_v14 = vpop.f32.mrf.mxu1 }
 0x2e6   : > { %1395 = vmatmul.mubr.msk.bf16.vlgmr.msra.gmra.mxu0 %vm347_vm1, %v1010_v12  ;;  %1401 = vmatpush3.bf16.msra.mxu1 %v1436_v11 }
 0x2e7   : > { %v868_v15 = vpop.f32.mrf.mxu1 }
 0x2e8   : > { %v1074_v16 = vpack.c.bf16 %v868_v15, %v865_v10 }
 0x2e9   : > { %v1373_v17 = vpop.f32.mrf.mxu1 }
 0x2ea   : > { %1403 = vmatmul.mubr.msk.bf16.vlgmr.msra.gmra.mxu1 %vm347_vm1, %v1074_v16 }
 0x39d   : > { %v937_v19 = vpop.f32.mrf.mxu0 }
 0x39e   : > { %v944_v27 = vadd.f32 %v937_v19, %v881_v21 }
 0x39f   : > { %v1380_v20 = vpop.f32.mrf.mxu0 }
 0x3a1   : > { %v940_v23 = vpop.f32.mrf.mxu0  ;;  %v1001_v24 = vpop.f32.mrf.mxu1 }
 0x3a2   : > { %v1008_v31 = vadd.f32 %v1001_v24, %v944_v27  ;;  %v945_v34 = vadd.f32 %v940_v23, %v882_v28 }
 0x3a3   : > { %v1381_v25 = vpop.f32.mrf.mxu0  ;;  %v1388_v26 = vpop.f32.mrf.mxu1 }
 0x3a5   : > { %v1004_v29 = vpop.f32.mrf.mxu1 }
 0x3a6   : > { %v1065_v30 = vpop.f32.mrf.mxu0  ;;  %v1009_v38 = vadd.f32 %v1004_v29, %v945_v34 }
 0x3a7   : > { %v1389_v32 = vpop.f32.mrf.mxu1  ;;  %v1072_v35 = vadd.f32 %v1065_v30, %v1008_v31 }
 0x3a8   : > { %v1396_v33 = vpop.f32.mrf.mxu0 }
 0x3aa   : > { %v1068_v36 = vpop.f32.mrf.mxu0  ;;  %v1129_v37 = vpop.f32.mrf.mxu1 }
 0x3ab   : > { %v1136_v39 = vadd.f32 %v1129_v37, %v1072_v35  ;;  %v1073_v42 = vadd.f32 %v1068_v36, %v1009_v38 }
 0x3ac   : > { %v1397_v40 = vpop.f32.mrf.mxu0  ;;  %v1404_v41 = vpop.f32.mrf.mxu1 }
 0x3ad   : > { %1138 = vst [vmem:[%s311_s10] sm:$0xff] %v1136_v39 }
 0x3ae   : > { %v1132_v43 = vpop.f32.mrf.mxu1 }
 0x3af   : > { %v1137_v44 = vadd.f32 %v1132_v43, %v1073_v42 }
 0x3b0   : > { %v1405_v45 = vpop.f32.mrf.mxu1 }
 0x3b1   : > { %1139 = vst [vmem:[%s311_s10 + $0x8] sm:$0x1f] %v1137_v44 }
 0x3b2 PF: > { %s16_s21 = sadd.s32 1, %s1475_s21  }
 0x3b3   : > { %p13_p4 = scmp.ge.s32.totalorder %s16_s21, 4  }
 0x3b5   :  { %15 = sbr.rel (!%p13_p4) target bundleno = 1 (0x1), region = 86 }

// kernel: depth_only_forward.15
= control target key start
LH: loop header
LB: loop body
LE: loop exit
PB: predicated region body
PF: predicated region fallthrough
CT: control target
= control target key end

     0   :  { %vm39_vm0 = vcmask 1041408   ;;  %v1196_v48 = vmov 0   ;;  %s1635_s0 = inlined_call_operand.vmem [shape: f32[26,128], index: 0, kind: input, shape index: {}]   ;;  %s1636_s3 = inlined_call_operand.vmem [shape: bf16[128,512], index: 3, kind: input, shape index: {}]   ;;  %s1637_s1 = inlined_call_operand.vmem [shape: f32[1,128], index: 1, kind: input, shape index: {}]   ;;  %s1638_s2 = inlined_call_operand.vmem [shape: f32[1,128], index: 2, kind: input, shape index: {}]   ;;  %s1639_s5 = inlined_call_operand.vmem [shape: bf16[512,128], index: 5, kind: input, shape index: {}]   ;;  %s1640_s4 = inlined_call_operand.vmem [shape: f32[1,512], index: 4, kind: input, shape index: {}]   ;;  %s1641_s6 = inlined_call_operand.vmem [shape: f32[1,128], index: 6, kind: input, shape index: {}]   ;;  %s1642_s7 = inlined_call_operand.vmem [shape: f32[26,128], index: 7, kind: output, shape index: {}]  }
   0x1   :  { %v27_v0 = vld [vmem:[%s1635_s0] sm:$0xff]  ;;  %v30_v1 = vld [vmem:[%s1635_s0 + $0x18] sm:$0x3]  ;;  %v28_v3 = vld [vmem:[%s1635_s0 + $0x8] sm:$0xff]  ;;  %349 = vmatprep.mubr.bf16.mxu0 %v1196_v48  ;;  %402 = vmatprep.mubr.bf16.mxu1 %v1196_v48 }
   0x2   :  { %33 = vadd.xlane.f32.xlu0 %v27_v0  ;;  %v40_v2 = vsel %vm39_vm0, %v30_v1, 0.0  ;;  %v29_v4 = vld [vmem:[%s1635_s0 + $0x10] sm:$0xff]  ;;  %v1074_v6 = vld [vmem:[%s1636_s3 + $0xec] ss:$16 sps:$4 sm:$0xff]   ;;  %v1077_v8 = vld [vmem:[%s1636_s3 + $0xe8] ss:$16 sps:$4 sm:$0xff]  }
   0x3   :  { %41 = vadd.xlane.f32.xlu1 %v40_v2  ;;  %v1072_v5 = vld [vmem:[%s1636_s3 + $0xe4] ss:$16 sps:$4 sm:$0xff]   ;;  %v1076_v7 = vld [vmem:[%s1636_s3 + $0xe0] ss:$16 sps:$4 sm:$0xff]   ;;  %370 = vmatprep.subr.bf16.mxu1 %v1074_v6  ;;  %v1080_v27 = vld [vmem:[%s1636_s3 + $0xcc] ss:$16 sps:$4 sm:$0xff]  }
   0x4   :  { %317 = vmatprep.subr.bf16.mxu0 %v1072_v5  ;;  %371 = vmatpush1.bf16.msra.mxu1 %v1077_v8  ;;  %v1078_v26 = vld [vmem:[%s1636_s3 + $0xc4] ss:$16 sps:$4 sm:$0xff]   ;;  %v1082_v28 = vld [vmem:[%s1636_s3 + $0xc0] ss:$16 sps:$4 sm:$0xff]   ;;  %v1083_v29 = vld [vmem:[%s1636_s3 + $0xc8] ss:$16 sps:$4 sm:$0xff]  }
   0x5   :  { %318 = vmatpush1.bf16.msra.mxu0 %v1076_v7  ;;  %372 = vmatprep.subr.bf16.mxu1 %v1080_v27  ;;  %v1084_v30 = vld [vmem:[%s1636_s3 + $0xa4] ss:$16 sps:$4 sm:$0xff]   ;;  %v1086_v31 = vld [vmem:[%s1636_s3 + $0xac] ss:$16 sps:$4 sm:$0xff]   ;;  %v1088_v32 = vld [vmem:[%s1636_s3 + $0xa0] ss:$16 sps:$4 sm:$0xff]  }
   0x6   :  { %35 = vadd.xlane.f32.xlu0 %v28_v3  ;;  %319 = vmatprep.subr.bf16.mxu0 %v1078_v26  ;;  %v1089_v33 = vld [vmem:[%s1636_s3 + $0xa8] ss:$16 sps:$4 sm:$0xff]   ;;  %v1090_v34 = vld [vmem:[%s1636_s3 + $0x84] ss:$16 sps:$4 sm:$0xff]   ;;  %v1092_v35 = vld [vmem:[%s1636_s3 + $0x8c] ss:$16 sps:$4 sm:$0xff]  }
   0x7   :  { %37 = vadd.xlane.f32.xlu1 %v29_v4  ;;  %v1094_v36 = vld [vmem:[%s1636_s3 + $0x80] ss:$16 sps:$4 sm:$0xff]   ;;  %v1095_v37 = vld [vmem:[%s1636_s3 + $0x88] ss:$16 sps:$4 sm:$0xff]   ;;  %v1096_v38 = vld [vmem:[%s1636_s3 + $0x64] ss:$16 sps:$4 sm:$0xff]  }
   0x8   :  { %373 = vmatpush1.bf16.msra.mxu1 %v1083_v29  ;;  %v1098_v39 = vld [vmem:[%s1636_s3 + $0x6c] ss:$16 sps:$4 sm:$0xff]   ;;  %v1100_v40 = vld [vmem:[%s1636_s3 + $0x60] ss:$16 sps:$4 sm:$0xff]   ;;  %v1101_v41 = vld [vmem:[%s1636_s3 + $0x68] ss:$16 sps:$4 sm:$0xff]  }
   0x9   :  { %320 = vmatpush1.bf16.msra.mxu0 %v1082_v28  ;;  %374 = vmatprep.subr.bf16.mxu1 %v1086_v31  ;;  %v1102_v42 = vld [vmem:[%s1636_s3 + $0x44] ss:$16 sps:$4 sm:$0xff]   ;;  %v1104_v43 = vld [vmem:[%s1636_s3 + $0x4c] ss:$16 sps:$4 sm:$0xff]   ;;  %v1106_v44 = vld [vmem:[%s1636_s3 + $0x40] ss:$16 sps:$4 sm:$0xff]  }
   0xa   :  { %321 = vmatprep.subr.bf16.mxu0 %v1084_v30  ;;  %v1107_v45 = vld [vmem:[%s1636_s3 + $0x48] ss:$16 sps:$4 sm:$0xff]   ;;  %v1108_v46 = vld [vmem:[%s1636_s3 + $0x24] ss:$16 sps:$4 sm:$0xff]   ;;  %v1110_v47 = vld [vmem:[%s1636_s3 + $0x2c] ss:$16 sps:$4 sm:$0xff]  }
   0xb   :  { %v1112_v49 = vld [vmem:[%s1636_s3 + $0x20] ss:$16 sps:$4 sm:$0xff]   ;;  %v1113_v50 = vld [vmem:[%s1636_s3 + $0x28] ss:$16 sps:$4 sm:$0xff]   ;;  %v1114_v51 = vld [vmem:[%s1636_s3 + $0x4] ss:$16 sps:$4 sm:$0xff]  }
   0xc   :  { %375 = vmatpush1.bf16.msra.mxu1 %v1089_v33  ;;  %v1116_v52 = vld [vmem:[%s1636_s3 + $0xc] ss:$16 sps:$4 sm:$0xff]   ;;  %v1118_v53 = vld [vmem:[%s1636_s3] ss:$16 sps:$4 sm:$0xff]   ;;  %v1119_v54 = vld [vmem:[%s1636_s3 + $0x8] ss:$16 sps:$4 sm:$0xff]  }
   0xd   :  { %322 = vmatpush1.bf16.msra.mxu0 %v1088_v32  ;;  %376 = vmatprep.subr.bf16.mxu1 %v1092_v35  ;;  %v948_v5 = vld [vmem:[%s1637_s1] ss:$0 sm:$0xff]  ;;  %v1123_v26 = vld [vmem:[%s1639_s5 + $0xb8] sm:$0xff]   ;;  %v1124_v27 = vld [vmem:[%s1639_s5 + $0x70] sm:$0xff]  }
   0xe   :  { %323 = vmatprep.subr.bf16.mxu0 %v1090_v34  ;;  %v1125_v28 = vld [vmem:[%s1639_s5 + $0xf0] sm:$0xff]   ;;  %v1128_v31 = vld [vmem:[%s1639_s5 + $0x68] sm:$0xff]   ;;  %v1132_v35 = vld [vmem:[%s1639_s5 + $0x60] sm:$0xff]  }
   0xf   :  { %v1126_v29 = vld [vmem:[%s1639_s5 + $0x30] sm:$0xff]   ;;  %v1129_v32 = vld [vmem:[%s1639_s5 + $0xe8] sm:$0xff]  }
  0x10   :  { %377 = vmatpush1.bf16.msra.mxu1 %v1095_v37  ;;  %v1127_v30 = vld [vmem:[%s1639_s5 + $0xb0] sm:$0xff]   ;;  %v1130_v33 = vld [vmem:[%s1639_s5 + $0x28] sm:$0xff]   ;;  %v1134_v37 = vld [vmem:[%s1639_s5 + $0x20] sm:$0xff]  }
  0x11   :  { %324 = vmatpush1.bf16.msra.mxu0 %v1094_v36  ;;  %378 = vmatprep.subr.bf16.mxu1 %v1098_v39  ;;  %v1131_v34 = vld [vmem:[%s1639_s5 + $0xa8] sm:$0xff]   ;;  %v1133_v36 = vld [vmem:[%s1639_s5 + $0xe0] sm:$0xff]   ;;  %v1136_v39 = vld [vmem:[%s1639_s5 + $0x58] sm:$0xff]  }
  0x12   :  { %325 = vmatprep.subr.bf16.mxu0 %v1096_v38  ;;  %v1135_v38 = vld [vmem:[%s1639_s5 + $0xa0] sm:$0xff]  }
  0x14   :  { %379 = vmatpush1.bf16.msra.mxu1 %v1101_v41  ;;  %v1138_v41 = vld [vmem:[%s1639_s5 + $0x18] sm:$0xff]  }
  0x15   :  { %326 = vmatpush1.bf16.msra.mxu0 %v1100_v40  ;;  %380 = vmatprep.subr.bf16.mxu1 %v1104_v43  ;;  %v1137_v40 = vld [vmem:[%s1639_s5 + $0xd8] sm:$0xff]   ;;  %v1140_v43 = vld [vmem:[%s1639_s5 + $0x50] sm:$0xff]  }
  0x16   :  { %327 = vmatprep.subr.bf16.mxu0 %v1102_v42  ;;  %v1139_v42 = vld [vmem:[%s1639_s5 + $0x98] sm:$0xff]  }
  0x18   :  { %381 = vmatpush1.bf16.msra.mxu1 %v1107_v45  ;;  %v1142_v45 = vld [vmem:[%s1639_s5 + $0x10] sm:$0xff]  }
  0x19   :  { %328 = vmatpush1.bf16.msra.mxu0 %v1106_v44  ;;  %382 = vmatprep.subr.bf16.mxu1 %v1110_v47  ;;  %v1141_v44 = vld [vmem:[%s1639_s5 + $0xd0] sm:$0xff]   ;;  %v1144_v47 = vld [vmem:[%s1639_s5 + $0x48] sm:$0xff]  }
  0x1a   :  { %329 = vmatprep.subr.bf16.mxu0 %v1108_v46  ;;  %v1143_v46 = vld [vmem:[%s1639_s5 + $0x90] sm:$0xff]  }
  0x1c   :  { %383 = vmatpush1.bf16.msra.mxu1 %v1113_v50  ;;  %v1147_v50 = vld [vmem:[%s1639_s5 + $0x88] sm:$0xff]  }
  0x1d   :  { %330 = vmatpush1.bf16.msra.mxu0 %v1112_v49  ;;  %384 = vmatprep.subr.bf16.mxu1 %v1116_v52  ;;  %v1146_v49 = vld [vmem:[%s1639_s5 + $0x8] sm:$0xff]   ;;  %v1149_v52 = vld [vmem:[%s1639_s5 + $0xc0] sm:$0xff]  }
  0x1e   :  { %331 = vmatprep.subr.bf16.mxu0 %v1114_v51  ;;  %v1148_v51 = vld [vmem:[%s1639_s5 + $0x40] sm:$0xff]  }
  0x20   :  { %385 = vmatpush1.bf16.msra.mxu1 %v1119_v54  ;;  %v1151_v54 = vld [vmem:[%s1639_s5 + $0x80] sm:$0xff]  }
  0x21   :  { %332 = vmatpush1.bf16.msra.mxu0 %v1118_v53  ;;  %v1150_v53 = vld [vmem:[%s1639_s5] sm:$0xff]  }
  0x8b   :  { %v34_v9 = vpop.xlane.xlu0 %33 }
  0x8c   :  { %v44_v10 = vmul.f32 0.0078125, %v34_v9  ;;  %v42_v11 = vpop.xlane.xlu1 %41 }
  0x8d   :  { %v47_v12 = vmul.f32 0.0078125, %v42_v11 }
  0x8e   :  { %v1262_v13 = vsub.f32 %v27_v0, %v44_v10  ;;  %v949_v10 = vld [vmem:[%s1638_s2] ss:$0 sm:$0xff] }
  0x8f   :  { %v1264_v14 = vsub.f32 %v30_v1, %v47_v12  ;;  %v36_v15 = vpop.xlane.xlu0 %35 }
  0x90   :  { %v45_v16 = vmul.f32 0.0078125, %v36_v15  ;;  %v38_v17 = vpop.xlane.xlu1 %37  ;;  %v52_v18 = vmul.f32 %v1262_v13, %v1262_v13 }
  0x91   :  { %v46_v19 = vmul.f32 0.0078125, %v38_v17  ;;  %v55_v22 = vmul.f32 %v1264_v14, %v1264_v14 }
  0x92   :  { %v1268_v20 = vsub.f32 %v28_v3, %v45_v16  ;;  %56 = vadd.xlane.f32.xlu0 %v52_v18 }
  0x93   :  { %v1270_v21 = vsub.f32 %v29_v4, %v46_v19  ;;  %v62_v25 = vsel %vm39_vm0, %v55_v22, 0.0 }
  0x94   :  { %v53_v23 = vmul.f32 %v1268_v20, %v1268_v20 }
  0x95   :  { %v54_v24 = vmul.f32 %v1270_v21, %v1270_v21 }
  0x96   :  { %58 = vadd.xlane.f32.xlu1 %v53_v23 }
  0x97   :  { %60 = vadd.xlane.f32.xlu0 %v54_v24 }
  0x9a   :  { %63 = vadd.xlane.f32.xlu1 %v62_v25  ;;  %v1120_v25 = vld [vmem:[%s1639_s5 + $0x78] sm:$0xff]  }
  0x9b   :  { %1015 = vmatprep.subr.bf16.mxu0 %v1120_v25 }
 0x11b   :  { %v57_v55 = vpop.xlane.xlu0 %56 }
 0x11c   :  { %v65_v56 = vmul.f32 0.0078125, %v57_v55  ;;  %v137_v55 = vlaneseq }
 0x11e   :  { %v69_v57 = vadd.f32 1e-05, %v65_v56  ;;  %v138_v56 = vshrl.u32 %v137_v55, 7 }
 0x11f   :  { %v59_v58 = vpop.xlane.xlu1 %58 }
 0x120   :  { %1152 = vrsqrt.f32 %v69_v57  ;;  %v66_v59 = vmul.f32 0.0078125, %v59_v58  ;;  %v61_v60 = vpop.xlane.xlu0 %60  ;;  %v139_v57 = vsub.s32 0, %v138_v56  ;;  %v147_v58 = vsub.s32 2, %v138_v56 }
 0x121   :  { %v67_v61 = vmul.f32 0.0078125, %v61_v60  ;;  %v143_v60 = vsub.s32 1, %v138_v56 }
 0x122   :  { %v70_v62 = vadd.f32 1e-05, %v66_v59  ;;  %v135_v59 = vld [vmem:[%s1640_s4] sm:$0xf] }
 0x123   :  { %v71_v63 = vadd.f32 1e-05, %v67_v61  ;;  %v64_v0 = vpop.xlane.xlu1 %63  ;;  %v151_v61 = vsub.s32 3, %v138_v56 }
 0x124   :  { %1154 = vrsqrt.f32 %v70_v62  ;;  %v68_v1 = vmul.f32 0.0078125, %v64_v0  ;;  %v1472_v62 = vrot.slane %v135_v59, %v139_v57  ;;  %v1476_v0 = vrot.slane %v135_v59, %v143_v60 }
 0x125   :  { %1156 = vrsqrt.f32 %v71_v63  ;;  %v1474_v63 = vrot.slane %v135_v59, %v147_v58 }
 0x126   :  { %v72_v2 = vadd.f32 1e-05, %v68_v1  ;;  %v1478_v1 = vrot.slane %v135_v59, %v151_v61 }
 0x128   :  { %1158 = vrsqrt.f32 %v72_v2 }
 0x12d   :  { %v1153_v3 = vpop.eup %1152 }
 0x12e   :  { %v77_v4 = vmul.f32 %v1153_v3, %v1262_v13 }
 0x130   :  { %v87_v8 = vmul.f32 %v948_v5, %v77_v4 }
 0x131   :  { %v1155_v6 = vpop.eup %1154 }
 0x132   :  { %v78_v7 = vmul.f32 %v1155_v6, %v1268_v20  ;;  %v1157_v9 = vpop.eup %1156  ;;  %v97_v15 = vadd.f32 %v949_v10, %v87_v8 }
 0x133   :  { %v79_v17 = vmul.f32 %v1157_v9, %v1270_v21  ;;  %v1122_v21 = vld [vmem:[%s1639_s5 + $0x38] sm:$0xff]  }
 0x134   :  { %v88_v11 = vmul.f32 %v948_v5, %v78_v7 }
 0x135   :  { %v1159_v12 = vpop.eup %1158  ;;  %v89_v22 = vmul.f32 %v948_v5, %v79_v17 }
 0x136   :  { %v98_v16 = vadd.f32 %v949_v10, %v88_v11  ;;  %v80_v13 = vmul.f32 %v1159_v12, %v1264_v14  ;;  %v1121_v14 = vld [vmem:[%s1639_s5 + $0xf8] sm:$0xff]  }
 0x137   :  { %v99_v23 = vadd.f32 %v949_v10, %v89_v22  ;;  %1043 = vmatprep.subr.bf16.mxu1 %v1121_v14 }
 0x138   :  { %v101_v18 = vpack.c.bf16 %v98_v16, %v97_v15  ;;  %v90_v19 = vmul.f32 %v948_v5, %v80_v13 }
 0x13a   :  { %350 = vmatmul.mubr.bf16.vlgmr.msra.gmra.mxu0 %v101_v18  ;;  %403 = vmatmul.mubr.bf16.vlgmr.msra.gmra.mxu1 %v101_v18  ;;  %v100_v20 = vadd.f32 %v949_v10, %v90_v19 }
 0x13b   :  { %359 = vmatprep.mubr.bf16.mxu0 %v1196_v48  ;;  %412 = vmatprep.mubr.bf16.mxu1 %v1196_v48  ;;  %v1145_v48 = vld [vmem:[%s1639_s5 + $0xc8] sm:$0xff]  }
 0x13c   :  { %v102_v24 = vpack.c.bf16 %v100_v20, %v99_v23  ;;  %1016 = vmatpush3.bf16.msra.mxu0 %v1122_v21  ;;  %1044 = vmatpush3.bf16.msra.mxu1 %v1123_v26 }
 0x13d   :  { %1017 = vmatprep.subr.bf16.mxu0 %v1124_v27  ;;  %1045 = vmatprep.subr.bf16.mxu1 %v1125_v28 }
 0x140   :  { %1018 = vmatpush3.bf16.msra.mxu0 %v1126_v29  ;;  %1046 = vmatpush3.bf16.msra.mxu1 %v1127_v30 }
 0x141   :  { %1019 = vmatprep.subr.bf16.mxu0 %v1128_v31  ;;  %1047 = vmatprep.subr.bf16.mxu1 %v1129_v32 }
 0x142   :  { %360 = vmatmul.mubr.bf16.gmra.mxu0 %v102_v24  ;;  %413 = vmatmul.mubr.bf16.gmra.mxu1 %v102_v24 }
 0x144   :  { %1020 = vmatpush3.bf16.msra.mxu0 %v1130_v33  ;;  %1048 = vmatpush3.bf16.msra.mxu1 %v1131_v34 }
 0x145   :  { %1021 = vmatprep.subr.bf16.mxu0 %v1132_v35  ;;  %1049 = vmatprep.subr.bf16.mxu1 %v1133_v36 }
 0x148   :  { %1022 = vmatpush3.bf16.msra.mxu0 %v1134_v37  ;;  %1050 = vmatpush3.bf16.msra.mxu1 %v1135_v38 }
 0x149   :  { %1023 = vmatprep.subr.bf16.mxu0 %v1136_v39  ;;  %1051 = vmatprep.subr.bf16.mxu1 %v1137_v40 }
 0x14c   :  { %1024 = vmatpush3.bf16.msra.mxu0 %v1138_v41  ;;  %1052 = vmatpush3.bf16.msra.mxu1 %v1139_v42 }
 0x14d   :  { %1025 = vmatprep.subr.bf16.mxu0 %v1140_v43  ;;  %1053 = vmatprep.subr.bf16.mxu1 %v1141_v44 }
 0x150   :  { %1026 = vmatpush3.bf16.msra.mxu0 %v1142_v45  ;;  %1054 = vmatpush3.bf16.msra.mxu1 %v1143_v46 }
 0x151   :  { %1027 = vmatprep.subr.bf16.mxu0 %v1144_v47  ;;  %1055 = vmatprep.subr.bf16.mxu1 %v1145_v48 }
 0x154   :  { %1028 = vmatpush3.bf16.msra.mxu0 %v1146_v49  ;;  %1056 = vmatpush3.bf16.msra.mxu1 %v1147_v50 }
 0x155   :  { %1029 = vmatprep.subr.bf16.mxu0 %v1148_v51  ;;  %1057 = vmatprep.subr.bf16.mxu1 %v1149_v52 }
 0x158   :  { %1030 = vmatpush3.bf16.msra.mxu0 %v1150_v53  ;;  %1058 = vmatpush3.bf16.msra.mxu1 %v1151_v54 }
 0x1fa   :  { %v351_v2 = vpop.f32.mrf.mxu0  ;;  %v404_v3 = vpop.f32.mrf.mxu1 }
 0x1fb   :  { %v1481_v4 = vadd.f32 %v351_v2, %v1472_v62  ;;  %v1484_v5 = vadd.f32 %v404_v3, %v1474_v63 }
 0x1fc   :  { %v353_v6 = vpop.f32.mrf.mxu0  ;;  %v406_v7 = vpop.f32.mrf.mxu1 }
 0x1fd   :  { %v423_v8 = vmul.f32 %v1481_v4, %v1481_v4  ;;  %v425_v9 = vmul.f32 %v1484_v5, %v1484_v5  ;;  %v1491_v10 = vadd.f32 %v353_v6, %v1476_v0  ;;  %v1494_v11 = vadd.f32 %v406_v7, %v1478_v1 }
 0x1fe   :  { %v355_v12 = vpop.f32.mrf.mxu0  ;;  %v408_v15 = vpop.f32.mrf.mxu1 }
 0x1ff   :  { %v439_v16 = vmul.f32 %v423_v8, %v1481_v4  ;;  %v441_v17 = vmul.f32 %v425_v9, %v1484_v5  ;;  %v424_v13 = vmul.f32 %v1491_v10, %v1491_v10  ;;  %v426_v18 = vmul.f32 %v1494_v11, %v1494_v11 }
 0x200   :  { %v1503_v19 = vadd.f32 %v355_v12, %v1472_v62  ;;  %v1506_v22 = vadd.f32 %v408_v15, %v1474_v63  ;;  %v357_v20 = vpop.f32.mrf.mxu0  ;;  %v410_v23 = vpop.f32.mrf.mxu1 }
 0x201   :  { %v455_v24 = vmul.f32 0.044715, %v439_v16  ;;  %v457_v25 = vmul.f32 0.044715, %v441_v17  ;;  %v440_v14 = vmul.f32 %v424_v13, %v1491_v10  ;;  %v442_v21 = vmul.f32 %v426_v18, %v1494_v11 }
 0x202   :  { %v427_v26 = vmul.f32 %v1503_v19, %v1503_v19  ;;  %v429_v27 = vmul.f32 %v1506_v22, %v1506_v22  ;;  %v1515_v28 = vadd.f32 %v357_v20, %v1476_v0  ;;  %v1518_v29 = vadd.f32 %v410_v23, %v1478_v1  ;;  %v361_v30 = vpop.f32.mrf.mxu0  ;;  %v414_v31 = vpop.f32.mrf.mxu1 }
 0x203   :  { %v471_v32 = vadd.f32 %v455_v24, %v1481_v4  ;;  %v473_v33 = vadd.f32 %v457_v25, %v1484_v5  ;;  %v456_v34 = vmul.f32 0.044715, %v440_v14  ;;  %v458_v35 = vmul.f32 0.044715, %v442_v21 }
 0x204   :  { %v443_v36 = vmul.f32 %v427_v26, %v1503_v19  ;;  %v445_v37 = vmul.f32 %v429_v27, %v1506_v22  ;;  %v428_v38 = vmul.f32 %v1515_v28, %v1515_v28  ;;  %v430_v39 = vmul.f32 %v1518_v29, %v1518_v29  ;;  %v363_v44 = vpop.f32.mrf.mxu0  ;;  %v416_v49 = vpop.f32.mrf.mxu1 }
 0x205   :  { %v487_v40 = vmul.f32 0.7978846, %v471_v32  ;;  %v489_v41 = vmul.f32 0.7978846, %v473_v33  ;;  %v472_v42 = vadd.f32 %v456_v34, %v1491_v10  ;;  %v474_v43 = vadd.f32 %v458_v35, %v1494_v11 }
 0x206   :  { %v459_v45 = vmul.f32 0.044715, %v443_v36  ;;  %v461_v46 = vmul.f32 0.044715, %v445_v37  ;;  %v444_v47 = vmul.f32 %v428_v38, %v1515_v28  ;;  %v446_v48 = vmul.f32 %v430_v39, %v1518_v29  ;;  %v365_v59 = vpop.f32.mrf.mxu0  ;;  %v418_v3 = vpop.f32.mrf.mxu1 }
 0x207   :  { %1160 = vtanh.f32 %v487_v40  ;;  %v488_v50 = vmul.f32 0.7978846, %v472_v42  ;;  %v490_v51 = vmul.f32 0.7978846, %v474_v43  ;;  %v1533_v52 = vadd.f32 %v361_v30, %v1472_v62 }
 0x208   :  { %1162 = vtanh.f32 %v489_v41  ;;  %v475_v53 = vadd.f32 %v459_v45, %v1503_v19  ;;  %v477_v54 = vadd.f32 %v461_v46, %v1506_v22  ;;  %v460_v55 = vmul.f32 0.044715, %v444_v47  ;;  %v367_v20 = vpop.f32.mrf.mxu0  ;;  %v420_v14 = vpop.f32.mrf.mxu1 }
 0x209   :  { %1164 = vtanh.f32 %v488_v50  ;;  %v462_v56 = vmul.f32 0.044715, %v446_v48  ;;  %v431_v57 = vmul.f32 %v1533_v52, %v1533_v52  ;;  %v1540_v58 = vadd.f32 %v414_v31, %v1474_v63 }
 0x20a   :  { %1166 = vtanh.f32 %v490_v51  ;;  %v491_v60 = vmul.f32 0.7978846, %v475_v53  ;;  %v493_v61 = vmul.f32 0.7978846, %v477_v54  ;;  %v476_v2 = vadd.f32 %v460_v55, %v1515_v28 }
 0x20b   :  { %v478_v6 = vadd.f32 %v462_v56, %v1518_v29  ;;  %v447_v7 = vmul.f32 %v431_v57, %v1533_v52  ;;  %v433_v8 = vmul.f32 %v1540_v58, %v1540_v58  ;;  %v1548_v9 = vadd.f32 %v363_v44, %v1476_v0 }
 0x20c   :  { %1168 = vtanh.f32 %v491_v60  ;;  %v492_v12 = vmul.f32 0.7978846, %v476_v2  ;;  %v1551_v15 = vadd.f32 %v416_v49, %v1478_v1  ;;  %v1554_v16 = vadd.f32 %v365_v59, %v1472_v62 }
 0x20d   :  { %1170 = vtanh.f32 %v493_v61  ;;  %v494_v17 = vmul.f32 0.7978846, %v478_v6  ;;  %v463_v13 = vmul.f32 0.044715, %v447_v7  ;;  %v449_v18 = vmul.f32 %v433_v8, %v1540_v58 }
 0x20e   :  { %1172 = vtanh.f32 %v492_v12  ;;  %v432_v23 = vmul.f32 %v1548_v9, %v1548_v9  ;;  %v434_v24 = vmul.f32 %v1551_v15, %v1551_v15  ;;  %v435_v25 = vmul.f32 %v1554_v16, %v1554_v16 }
 0x20f   :  { %1174 = vtanh.f32 %v494_v17  ;;  %v479_v62 = vadd.f32 %v463_v13, %v1533_v52  ;;  %v465_v21 = vmul.f32 0.044715, %v449_v18  ;;  %v1565_v26 = vadd.f32 %v418_v3, %v1474_v63 }
 0x210   :  { %v448_v27 = vmul.f32 %v432_v23, %v1548_v9  ;;  %v450_v30 = vmul.f32 %v434_v24, %v1551_v15  ;;  %v451_v31 = vmul.f32 %v435_v25, %v1554_v16  ;;  %v1571_v32 = vadd.f32 %v367_v20, %v1476_v0 }
 0x211   :  { %v495_v33 = vmul.f32 0.7978846, %v479_v62  ;;  %v481_v34 = vadd.f32 %v465_v21, %v1540_v58  ;;  %v437_v35 = vmul.f32 %v1565_v26, %v1565_v26  ;;  %v1577_v36 = vadd.f32 %v420_v14, %v1478_v1 }
 0x212   :  { %v464_v63 = vmul.f32 0.044715, %v448_v27  ;;  %v466_v37 = vmul.f32 0.044715, %v450_v30  ;;  %v467_v38 = vmul.f32 0.044715, %v451_v31  ;;  %v436_v39 = vmul.f32 %v1571_v32, %v1571_v32 }
 0x213   :  { %v497_v40 = vmul.f32 0.7978846, %v481_v34  ;;  %v453_v41 = vmul.f32 %v437_v35, %v1565_v26  ;;  %v438_v0 = vmul.f32 %v1577_v36, %v1577_v36  ;;  %1176 = vtanh.f32 %v495_v33 }
 0x214   :  { %v1161_v42 = vpop.eup %1160  ;;  %v480_v43 = vadd.f32 %v464_v63, %v1548_v9  ;;  %v482_v44 = vadd.f32 %v466_v37, %v1551_v15  ;;  %v483_v1 = vadd.f32 %v467_v38, %v1554_v16  ;;  %v452_v45 = vmul.f32 %v436_v39, %v1571_v32 }
 0x215   :  { %v1163_v46 = vpop.eup %1162  ;;  %v469_v47 = vmul.f32 0.044715, %v453_v41  ;;  %v454_v48 = vmul.f32 %v438_v0, %v1577_v36  ;;  %1178 = vtanh.f32 %v497_v40  ;;  %v519_v61 = vadd.f32 1.0, %v1161_v42 }
 0x216   :  { %v1165_v49 = vpop.eup %1164  ;;  %v496_v50 = vmul.f32 0.7978846, %v480_v43  ;;  %v498_v51 = vmul.f32 0.7978846, %v482_v44  ;;  %v499_v54 = vmul.f32 0.7978846, %v483_v1 }
 0x217   :  { %v1167_v53 = vpop.eup %1166  ;;  %v485_v55 = vadd.f32 %v469_v47, %v1565_v26  ;;  %v468_v56 = vmul.f32 0.044715, %v452_v45  ;;  %v470_v57 = vmul.f32 0.044715, %v454_v48  ;;  %v520_v59 = vadd.f32 1.0, %v1165_v49 }
 0x218   :  { %1180 = vtanh.f32 %v496_v50  ;;  %v521_v7 = vadd.f32 1.0, %v1163_v46  ;;  %v522_v62 = vadd.f32 1.0, %v1167_v53  ;;  %v535_v21 = vmul.f32 0.5, %v519_v61 }
 0x219   :  { %v1169_v60 = vpop.eup %1168  ;;  %1182 = vtanh.f32 %v498_v51  ;;  %v501_v2 = vmul.f32 0.7978846, %v485_v55  ;;  %v484_v3 = vadd.f32 %v468_v56, %v1571_v32  ;;  %v486_v12 = vadd.f32 %v470_v57, %v1577_v36 }
 0x21a   :  { %v1171_v6 = vpop.eup %1170  ;;  %v523_v8 = vadd.f32 1.0, %v1169_v60  ;;  %1184 = vtanh.f32 %v499_v54  ;;  %v536_v20 = vmul.f32 0.5, %v520_v59  ;;  %v537_v31 = vmul.f32 0.5, %v521_v7 }
 0x21b   :  { %v1173_v17 = vpop.eup %1172  ;;  %v525_v13 = vadd.f32 1.0, %v1171_v6  ;;  %1186 = vtanh.f32 %v501_v2  ;;  %v500_v18 = vmul.f32 0.7978846, %v484_v3  ;;  %v502_v25 = vmul.f32 0.7978846, %v486_v12 }
 0x21c   :  { %v1175_v23 = vpop.eup %1174  ;;  %v539_v24 = vmul.f32 0.5, %v523_v8  ;;  %v524_v14 = vadd.f32 1.0, %v1173_v17  ;;  %v538_v34 = vmul.f32 0.5, %v522_v62  ;;  %v552_v38 = vmul.f32 %v536_v20, %v1491_v10 }
 0x21d   :  { %v541_v27 = vmul.f32 0.5, %v525_v13  ;;  %1188 = vtanh.f32 %v500_v18  ;;  %v526_v30 = vadd.f32 1.0, %v1175_v23  ;;  %v551_v40 = vmul.f32 %v535_v21, %v1481_v4 }
 0x21e   :  { %1190 = vtanh.f32 %v502_v25  ;;  %v540_v33 = vmul.f32 0.5, %v524_v14  ;;  %v555_v35 = vmul.f32 %v539_v24, %v1503_v19  ;;  %v554_v41 = vmul.f32 %v538_v34, %v1494_v11  ;;  %v1192_v34 = vld [vmem:[%s1635_s0] sm:$0xff] }
 0x21f   :  { %v542_v63 = vmul.f32 0.5, %v526_v30  ;;  %v557_v37 = vmul.f32 %v541_v27, %v1506_v22  ;;  %v553_v42 = vmul.f32 %v537_v31, %v1484_v5 }
 0x220   :  { %v556_v39 = vmul.f32 %v540_v33, %v1515_v28  ;;  %v1177_v44 = vpop.eup %1176  ;;  %v567_v1 = vpack.c.bf16 %v555_v35, %v551_v40 }
 0x221   :  { %v558_v0 = vmul.f32 %v542_v63, %v1518_v29  ;;  %v569_v46 = vpack.c.bf16 %v557_v37, %v553_v42  ;;  %v527_v48 = vadd.f32 1.0, %v1177_v44 }
 0x222   :  { %v568_v43 = vpack.c.bf16 %v556_v39, %v552_v38  ;;  %v1179_v19 = vpop.eup %1178  ;;  %v1193_v39 = vld [vmem:[%s1635_s0 + $0x8] sm:$0xff] }
 0x223   :  { %v570_v45 = vpack.c.bf16 %v558_v0, %v554_v41  ;;  %v529_v49 = vadd.f32 1.0, %v1179_v19  ;;  %v543_v60 = vmul.f32 0.5, %v527_v48 }
 0x224   :  { %870 = vmatprep.mubr.bf16.mxu0 %v568_v43 }
 0x225   :  { %v1181_v22 = vpop.eup %1180  ;;  %919 = vmatprep.mubr.bf16.mxu1 %v570_v45  ;;  %871 = vmatmul.mubr.bf16.vlgmr.msra.gmra.mxu0 %v567_v1  ;;  %v545_v2 = vmul.f32 0.5, %v529_v49  ;;  %v559_v18 = vmul.f32 %v543_v60, %v1533_v52 }
 0x226   :  { %v1183_v10 = vpop.eup %1182  ;;  %920 = vmatmul.mubr.bf16.vlgmr.msra.gmra.mxu1 %v569_v46  ;;  %v528_v4 = vadd.f32 1.0, %v1181_v22 }
 0x227   :  { %v1185_v28 = vpop.eup %1184  ;;  %v530_v11 = vadd.f32 1.0, %v1183_v10  ;;  %v561_v23 = vmul.f32 %v545_v2, %v1540_v58 }
 0x228   :  { %v1187_v47 = vpop.eup %1186  ;;  %v531_v29 = vadd.f32 1.0, %v1185_v28  ;;  %v544_v55 = vmul.f32 0.5, %v528_v4 }
 0x229   :  { %v533_v5 = vadd.f32 1.0, %v1187_v47  ;;  %v546_v59 = vmul.f32 0.5, %v530_v11  ;;  %v1194_v47 = vld [vmem:[%s1635_s0 + $0x10] sm:$0xff] }
 0x22a   :  { %v1189_v50 = vpop.eup %1188  ;;  %v547_v51 = vmul.f32 0.5, %v531_v29  ;;  %v560_v7 = vmul.f32 %v544_v55, %v1548_v9 }
 0x22b   :  { %v1191_v53 = vpop.eup %1190  ;;  %v532_v54 = vadd.f32 1.0, %v1189_v50  ;;  %v549_v56 = vmul.f32 0.5, %v533_v5  ;;  %v562_v17 = vmul.f32 %v546_v59, %v1551_v15  ;;  %v982_v15 = vld [vmem:[%s1641_s6] ss:$0 sm:$0xff]  ;;  %v1195_v5 = vld [vmem:[%s1635_s0 + $0x18] sm:$0x3] }
 0x22c   :  { %v534_v57 = vadd.f32 1.0, %v1191_v53  ;;  %v563_v6 = vmul.f32 %v547_v51, %v1554_v16 }
 0x22d   :  { %v548_v61 = vmul.f32 0.5, %v532_v54  ;;  %v565_v12 = vmul.f32 %v549_v56, %v1565_v26 }
 0x22e   :  { %v550_v3 = vmul.f32 0.5, %v534_v57  ;;  %v571_v25 = vpack.c.bf16 %v563_v6, %v559_v18 }
 0x22f   :  { %v564_v8 = vmul.f32 %v548_v61, %v1571_v32  ;;  %v573_v14 = vpack.c.bf16 %v565_v12, %v561_v23 }
 0x230   :  { %v566_v13 = vmul.f32 %v550_v3, %v1577_v36 }
 0x231   :  { %v572_v20 = vpack.c.bf16 %v564_v8, %v560_v7 }
 0x232   :  { %v574_v24 = vpack.c.bf16 %v566_v13, %v562_v17 }
 0x233   :  { %878 = vmatprep.mubr.bf16.mxu0 %v572_v20 }
 0x234   :  { %927 = vmatprep.mubr.bf16.mxu1 %v574_v24  ;;  %879 = vmatmul.mubr.bf16.gmra.mxu0 %v571_v25 }
 0x235   :  { %928 = vmatmul.mubr.bf16.gmra.mxu1 %v573_v14 }
 0x2e5   :  { %v1031_v9 = vpop.f32.mrf.mxu0 }
 0x2e6   :  { %v1059_v16 = vpop.f32.mrf.mxu1 }
 0x2e7   :  { %v1032_v26 = vpop.f32.mrf.mxu0 }
 0x2e8   :  { %v1033_v32 = vadd.f32 %v1032_v26, %v1031_v9  ;;  %v1060_v36 = vpop.f32.mrf.mxu1 }
 0x2e9   :  { %v1034_v52 = vpop.f32.mrf.mxu0  ;;  %v1061_v21 = vadd.f32 %v1060_v36, %v1059_v16 }
 0x2ea   :  { %v873_v62 = vadd.f32 %v1033_v32, %v982_v15  ;;  %v1062_v58 = vpop.f32.mrf.mxu1 }
 0x2eb   :  { %v1035_v27 = vpop.f32.mrf.mxu0 }
 0x2ec   :  { %v922_v30 = vadd.f32 %v1061_v21, %v873_v62  ;;  %v1036_v31 = vadd.f32 %v1035_v27, %v1034_v52  ;;  %v1063_v33 = vpop.f32.mrf.mxu1 }
 0x2ed   :  { %v1064_v37 = vadd.f32 %v1063_v33, %v1062_v58 }
 0x2ee   :  { %v936_v35 = vadd.f32 %v1192_v34, %v922_v30  ;;  %v876_v63 = vadd.f32 %v1036_v31, %v982_v15 }
 0x2f0   :  { %940 = vst [vmem:[%s1642_s7] sm:$0xff] %v936_v35  ;;  %v925_v38 = vadd.f32 %v1064_v37, %v876_v63 }
 0x2f2   :  { %v937_v40 = vadd.f32 %v1193_v39, %v925_v38 }
 0x2f4   :  { %941 = vst [vmem:[%s1642_s7 + $0x8] sm:$0xff] %v937_v40  ;;  %v1037_v41 = vpop.f32.mrf.mxu0 }
 0x2f5   :  { %v1065_v0 = vpop.f32.mrf.mxu1 }
 0x2f6   :  { %v1038_v42 = vpop.f32.mrf.mxu0 }
 0x2f7   :  { %v1039_v43 = vadd.f32 %v1038_v42, %v1037_v41  ;;  %v1066_v44 = vpop.f32.mrf.mxu1 }
 0x2f8   :  { %v1040_v1 = vpop.f32.mrf.mxu0  ;;  %v1067_v19 = vadd.f32 %v1066_v44, %v1065_v0 }
 0x2f9   :  { %v881_v45 = vadd.f32 %v1039_v43, %v982_v15  ;;  %v1068_v46 = vpop.f32.mrf.mxu1 }
 0x2fa   :  { %v1041_v22 = vpop.f32.mrf.mxu0 }
 0x2fb   :  { %v930_v10 = vadd.f32 %v1067_v19, %v881_v45  ;;  %v1042_v28 = vadd.f32 %v1041_v22, %v1040_v1  ;;  %v1069_v4 = vpop.f32.mrf.mxu1 }
 0x2fc   :  { %v1070_v29 = vadd.f32 %v1069_v4, %v1068_v46 }
 0x2fd   :  { %v938_v11 = vadd.f32 %v1194_v47, %v930_v10  ;;  %v884_v48 = vadd.f32 %v1042_v28, %v982_v15 }
 0x2ff   :  { %942 = vst [vmem:[%s1642_s7 + $0x10] sm:$0xff] %v938_v11  ;;  %v933_v49 = vadd.f32 %v1070_v29, %v884_v48 }
 0x301   :  { %v939_v50 = vadd.f32 %v1195_v5, %v933_v49 }
 0x303   :  { %943 = vst [vmem:[%s1642_s7 + $0x18] sm:$0x3] %v939_v50 }

// kernel: depth_only_forward.19
= control target key start
LH: loop header
LB: loop body
LE: loop exit
PB: predicated region body
PF: predicated region fallthrough
CT: control target
= control target key end

     0   :  { %s609_s12 = smov 0   ;;  %s611_s13 = smov 0   ;;  %s708_s0 = inlined_call_operand.vmem [shape: f32[2,128,4], index: 0, kind: input, shape index: {}]   ;;  %s709_s1 = inlined_call_operand.vmem [shape: bf16[64,128], index: 1, kind: input, shape index: {}]   ;;  %s710_s2 = inlined_call_operand.vmem [shape: f32[64,1], index: 2, kind: input, shape index: {}]   ;;  %s711_s3 = inlined_call_operand.vmem [shape: f32[2,64,4], index: 3, kind: output, shape index: {}]  }
   0x1   :  { %s613_s14 = smov 0  }
   0x2 LB: > { %s25_s15 = sadd.s32 1, %s582_s13  ;;  %p468_p0 = scmp.ge.s32.totalorder %s586_s14, 1  ;;  %s586_s14 = sphi %s613_s14, %s13_s14   ;;  %s582_s13 = sphi %s611_s13, %s713_s13   ;;  %s578_s12 = sphi %s609_s12, %s712_s12  }
   0x3   : > { %p27_p1 = scmp.ge.s32.totalorder %s25_s15, 2  ;;  %p156_p2 = scmp.lt.s32.totalorder %s586_s14, 3 }
   0x5   : > { %s715_s15 = smov (%p27_p1, %s25_s15), 0  ;;  %p157_p3 = pnand %p468_p0, %p156_p2 }
   0x6   : > { %p186_p4 = scmp.lt.s32.totalorder (!%p157_p3), %s578_s12, 1 }
   0x7   : > { %160 = sbr.rel (%p157_p3) target bundleno = 252 (0xfc), region = 32 }
   0xc   : > { %v560_v0 = vld [vmem:[%s709_s1] sm:$0xff]   ;;  %v561_v1 = vld [vmem:[%s709_s1 + $0x10] sm:$0xff]   ;;  %s717_s12 = smov (!%p186_p4, %s578_s12), 1  ;;  %v588_v2 = vmov 0   ;;  %v238_v13 = vld [vmem:[%s710_s2 + $0x18] sm:$0xff]  ;;  %vm372_vm0 = vcmask 31744  }
   0xd   : > { %509 = vmatprep.mubr.bf16.mxu0 %v560_v0  ;;  %559 = vset.pattern.permute.xlu1 %v588_v2  ;;  %s479_s20 = sshll.u32 %s717_s12, 7  ;;  %v237_v3 = vld [vmem:[%s710_s2 + $0x10] sm:$0xff]  ;;  %v235_v4 = vld [vmem:[%s710_s2] sm:$0xff]  ;;  %v236_v14 = vld [vmem:[%s710_s2 + $0x8] sm:$0xff]  ;;  %s480_s21 = sshll.u32 %s717_s12, 6 }
   0xe   : > { %513 = vmatprep.mubr.bf16.mxu1 %v561_v1  ;;  %558 = vset.pattern.permute.xlu0 %v588_v2  ;;  %s645_s27 = scalar_lea.vmem %s708_s0, %s479_s20  ;;  %v240_v18 = vld [vmem:[%s710_s2 + $0x28] sm:$0xff]  ;;  %v239_v19 = vld [vmem:[%s710_s2 + $0x20] sm:$0xff]  ;;  %v242_v23 = vld [vmem:[%s710_s2 + $0x38] sm:$0xff]  ;;  %s201_s24 = scalar_lea.vmem %s711_s3, %s480_s21 }
   0xf   : > { %255 = vperm.xlu1 %559, %v237_v3   ;;  %245 = vperm.xlu0 %558, %v235_v4   ;;  %v225_v5 = vld [vmem:[%s645_s27 + $0x70] sm:$0xff]  ;;  %v226_v6 = vld [vmem:[%s645_s27 + $0x78] sm:$0xff]  ;;  %v223_v7 = vld [vmem:[%s645_s27 + $0x60] sm:$0xff] }
  0x10   : > { %v234_v8 = vpack.c.bf16 %v226_v6, %v225_v5  ;;  %v224_v9 = vld [vmem:[%s645_s27 + $0x68] sm:$0xff]  ;;  %v221_v11 = vld [vmem:[%s645_s27 + $0x50] sm:$0xff]  ;;  %v222_v12 = vld [vmem:[%s645_s27 + $0x58] sm:$0xff] }
  0x11   : > { %v233_v10 = vpack.c.bf16 %v224_v9, %v223_v7  ;;  %v232_v15 = vpack.c.bf16 %v222_v12, %v221_v11  ;;  %v219_v16 = vld [vmem:[%s645_s27 + $0x40] sm:$0xff]  ;;  %v220_v17 = vld [vmem:[%s645_s27 + $0x48] sm:$0xff]  ;;  %v217_v21 = vld [vmem:[%s645_s27 + $0x30] sm:$0xff] }
  0x12   : > { %493 = vmatprep.subr.bf16.mxu0 %v234_v8  ;;  %517 = vmatprep.subr.bf16.mxu1 %v234_v8  ;;  %v231_v20 = vpack.c.bf16 %v220_v17, %v219_v16  ;;  %v218_v22 = vld [vmem:[%s645_s27 + $0x38] sm:$0xff]  ;;  %v241_v24 = vld [vmem:[%s710_s2 + $0x30] sm:$0xff]  ;;  %v215_v26 = vld [vmem:[%s645_s27 + $0x20] sm:$0xff] }
  0x13   : > { %494 = vmatpush3.bf16.msra.mxu0 %v234_v8  ;;  %525 = vmatpush3.bf16.msra.mxu1 %v234_v8  ;;  %v230_v25 = vpack.c.bf16 %v218_v22, %v217_v21  ;;  %v216_v27 = vld [vmem:[%s645_s27 + $0x28] sm:$0xff]  ;;  %v213_v29 = vld [vmem:[%s645_s27 + $0x10] sm:$0xff]  ;;  %v214_v30 = vld [vmem:[%s645_s27 + $0x18] sm:$0xff] }
  0x14   : > { %495 = vmatprep.subr.bf16.mxu0 %v233_v10  ;;  %518 = vmatprep.subr.bf16.mxu1 %v233_v10  ;;  %v229_v28 = vpack.c.bf16 %v216_v27, %v215_v26  ;;  %v228_v31 = vpack.c.bf16 %v214_v30, %v213_v29  ;;  %v211_v32 = vld [vmem:[%s645_s27] sm:$0xff]  ;;  %v212_v33 = vld [vmem:[%s645_s27 + $0x8] sm:$0xff]  ;;  %v563_v36 = vld [vmem:[%s709_s1 + $0x18] sm:$0xff]  }
  0x15   : > { %260 = vperm.xlu1 %559, %v238_v13   ;;  %250 = vperm.xlu0 %558, %v236_v14   ;;  %v227_v34 = vpack.c.bf16 %v212_v33, %v211_v32  ;;  %v562_v35 = vld [vmem:[%s709_s1 + $0x8] sm:$0xff]  }
  0x17   : > { %496 = vmatpush3.bf16.msra.mxu0 %v233_v10  ;;  %526 = vmatpush3.bf16.msra.mxu1 %v233_v10 }
  0x18   : > { %497 = vmatprep.subr.bf16.mxu0 %v232_v15  ;;  %519 = vmatprep.subr.bf16.mxu1 %v232_v15 }
  0x19   : > { %270 = vperm.xlu1 %559, %v240_v18   ;;  %265 = vperm.xlu0 %558, %v239_v19  }
  0x1b   : > { %498 = vmatpush3.bf16.msra.mxu0 %v232_v15  ;;  %527 = vmatpush3.bf16.msra.mxu1 %v232_v15 }
  0x1c   : > { %499 = vmatprep.subr.bf16.mxu0 %v231_v20  ;;  %520 = vmatprep.subr.bf16.mxu1 %v231_v20 }
  0x1d   : > { %280 = vperm.xlu1 %559, %v242_v23   ;;  %275 = vperm.xlu0 %558, %v241_v24  }
  0x1f   : > { %500 = vmatpush3.bf16.msra.mxu0 %v231_v20  ;;  %528 = vmatpush3.bf16.msra.mxu1 %v231_v20 }
  0x20   : > { %501 = vmatprep.subr.bf16.mxu0 %v230_v25  ;;  %521 = vmatprep.subr.bf16.mxu1 %v230_v25 }
  0x23   : > { %502 = vmatpush3.bf16.msra.mxu0 %v230_v25  ;;  %529 = vmatpush3.bf16.msra.mxu1 %v230_v25 }
  0x24   : > { %503 = vmatprep.subr.bf16.mxu0 %v229_v28  ;;  %522 = vmatprep.subr.bf16.mxu1 %v229_v28 }
  0x27   : > { %504 = vmatpush3.bf16.msra.mxu0 %v229_v28  ;;  %530 = vmatpush3.bf16.msra.mxu1 %v229_v28 }
  0x28   : > { %505 = vmatprep.subr.bf16.mxu0 %v228_v31  ;;  %523 = vmatprep.subr.bf16.mxu1 %v228_v31 }
  0x2b   : > { %506 = vmatpush3.bf16.msra.mxu0 %v228_v31  ;;  %531 = vmatpush3.bf16.msra.mxu1 %v228_v31 }
  0x2c   : > { %507 = vmatprep.subr.bf16.mxu0 %v227_v34  ;;  %524 = vmatprep.subr.bf16.mxu1 %v227_v34 }
  0x2f   : > { %508 = vmatpush3.bf16.msra.mxu0 %v227_v34  ;;  %532 = vmatpush3.bf16.msra.mxu1 %v227_v34 }
  0x32   : > { %510 = vmatmul.mubr.bf16.vlgmr.msra.gmra.mxu0 %v562_v35  ;;  %514 = vmatmul.mubr.bf16.vlgmr.msra.gmra.mxu1 %v563_v36 }
  0x8a   : > { %v246_v37 = vpop.permute.xlu0 %245  ;;  %v256_v38 = vpop.permute.xlu1 %255 }
  0x90   : > { %v251_v39 = vpop.permute.xlu0 %250  ;;  %v261_v40 = vpop.permute.xlu1 %260 }
  0x94   : > { %v266_v41 = vpop.permute.xlu0 %265  ;;  %v271_v42 = vpop.permute.xlu1 %270 }
  0x98   : > { %v276_v43 = vpop.permute.xlu0 %275  ;;  %v281_v50 = vpop.permute.xlu1 %280 }
  0xf2   : > { %v511_v44 = vpop.f32.mrf.mxu0  ;;  %v515_v45 = vpop.f32.mrf.mxu1 }
  0xf3   : > { %v350_v46 = vadd.f32 %v511_v44, %v256_v38  ;;  %v366_v47 = vadd.f32 %v515_v45, %v276_v43 }
  0xf4   : > { %v341_v48 = vpop.f32.mrf.mxu0  ;;  %v357_v49 = vpop.f32.mrf.mxu1 }
  0xf5   : > { %375 = vst.msk [vmem:[%s201_s24 + $0x10] sm:$0xff] %vm372_vm0, %v350_v46  ;;  %379 = vst.msk [vmem:[%s201_s24 + $0x30] sm:$0xff] %vm372_vm0, %v366_v47  ;;  %v342_v51 = vadd.f32 %v341_v48, %v246_v37  ;;  %v358_v52 = vadd.f32 %v357_v49, %v266_v41 }
  0xf6   : > { %v512_v53 = vpop.f32.mrf.mxu0  ;;  %v516_v54 = vpop.f32.mrf.mxu1 }
  0xf7   : > { %373 = vst.msk [vmem:[%s201_s24] sm:$0xff] %vm372_vm0, %v342_v51  ;;  %377 = vst.msk [vmem:[%s201_s24 + $0x20] sm:$0xff] %vm372_vm0, %v358_v52  ;;  %v353_v55 = vadd.f32 %v512_v53, %v261_v40  ;;  %v369_v56 = vadd.f32 %v516_v54, %v281_v50 }
  0xf8   : > { %v344_v57 = vpop.f32.mrf.mxu0  ;;  %v360_v58 = vpop.f32.mrf.mxu1 }
  0xf9   : > { %376 = vst.msk [vmem:[%s201_s24 + $0x18] sm:$0xff] %vm372_vm0, %v353_v55  ;;  %380 = vst.msk [vmem:[%s201_s24 + $0x38] sm:$0xff] %vm372_vm0, %v369_v56  ;;  %v345_v59 = vadd.f32 %v344_v57, %v251_v39  ;;  %v361_v60 = vadd.f32 %v360_v58, %v271_v42 }
  0xfb   : > { %374 = vst.msk [vmem:[%s201_s24 + $0x8] sm:$0xff] %vm372_vm0, %v345_v59  ;;  %378 = vst.msk [vmem:[%s201_s24 + $0x28] sm:$0xff] %vm372_vm0, %v361_v60 }
  0xfc PF: > { %s13_s14 = sadd.s32 1, %s586_s14   ;;  %s712_s12 = smov %s582_s13 }
  0xfd   : > { %p10_p5 = scmp.ge.s32.totalorder %s13_s14, 4   ;;  %s713_s13 = smov %s715_s15 }
  0xff   :  { %12 = sbr.rel (!%p10_p5) target bundleno = 2 (0x2), region = 62 }

// kernel: depth_only_forward.20
= control target key start
LH: loop header
LB: loop body
LE: loop exit
PB: predicated region body
PF: predicated region fallthrough
CT: control target
= control target key end

     0   :  { %s590_s12 = smov 0   ;;  %s592_s13 = smov 0   ;;  %s678_s0 = inlined_call_operand.vmem [shape: f32[2,64,16], index: 0, kind: input, shape index: {}]   ;;  %s679_s1 = inlined_call_operand.vmem [shape: bf16[64,64], index: 1, kind: input, shape index: {}]   ;;  %s680_s2 = inlined_call_operand.vmem [shape: f32[64,1], index: 2, kind: input, shape index: {}]   ;;  %s681_s3 = inlined_call_operand.vmem [shape: f32[2,64,16], index: 3, kind: output, shape index: {}]  }
   0x1   :  { %s594_s14 = smov 0  }
   0x2 LB: > { %s25_s15 = sadd.s32 1, %s563_s13  ;;  %p465_p0 = scmp.ge.s32.totalorder %s567_s14, 1  ;;  %s567_s14 = sphi %s594_s14, %s13_s14   ;;  %s563_s13 = sphi %s592_s13, %s683_s13   ;;  %s559_s12 = sphi %s590_s12, %s682_s12  }
   0x3   : > { %p27_p1 = scmp.ge.s32.totalorder %s25_s15, 2  ;;  %p156_p2 = scmp.lt.s32.totalorder %s567_s14, 3 }
   0x5   : > { %s685_s15 = smov (%p27_p1, %s25_s15), 0  ;;  %p157_p3 = pnand %p465_p0, %p156_p2 }
   0x6   : > { %p186_p4 = scmp.lt.s32.totalorder (!%p157_p3), %s559_s12, 1 }
   0x7   : > { %160 = sbr.rel (%p157_p3) target bundleno = 236 (0xec), region = 32 }
   0xc   : > { %v541_v0 = vld [vmem:[%s679_s1] sm:$0xff]   ;;  %vm291_vm0 = vcmask 523264   ;;  %v542_v1 = vld [vmem:[%s679_s1 + $0x10] sm:$0xff]   ;;  %s687_s12 = smov (!%p186_p4, %s559_s12), 1  ;;  %v569_v2 = vmov 0   ;;  %v226_v13 = vld [vmem:[%s680_s2 + $0x18] sm:$0xff] }
   0xd   : > { %498 = vmatprep.mubr.msk.bf16.mxu0 %vm291_vm0, %v541_v0  ;;  %502 = vmatprep.mubr.msk.bf16.mxu1 %vm291_vm0, %v542_v1  ;;  %s480_s20 = sshll.u32 %s687_s12, 6  ;;  %v225_v3 = vld [vmem:[%s680_s2 + $0x10] sm:$0xff]  ;;  %v223_v4 = vld [vmem:[%s680_s2] sm:$0xff]  ;;  %v224_v14 = vld [vmem:[%s680_s2 + $0x8] sm:$0xff]  ;;  %vm369_vm1 = vcmask 130048  }
   0xe   : > { %540 = vset.pattern.permute.xlu1 %v569_v2  ;;  %539 = vset.pattern.permute.xlu0 %v569_v2  ;;  %s193_s27 = scalar_lea.vmem %s678_s0, %s480_s20  ;;  %v228_v18 = vld [vmem:[%s680_s2 + $0x28] sm:$0xff]  ;;  %v227_v19 = vld [vmem:[%s680_s2 + $0x20] sm:$0xff]  ;;  %v230_v21 = vld [vmem:[%s680_s2 + $0x38] sm:$0xff]  ;;  %s201_s24 = scalar_lea.vmem %s681_s3, %s480_s20 }
   0xf   : > { %243 = vperm.xlu1 %540, %v225_v3   ;;  %233 = vperm.xlu0 %539, %v223_v4   ;;  %v217_v5 = vld [vmem:[%s193_s27 + $0x30] sm:$0xff]  ;;  %v218_v6 = vld [vmem:[%s193_s27 + $0x38] sm:$0xff]  ;;  %v215_v7 = vld [vmem:[%s193_s27 + $0x20] sm:$0xff] }
  0x10   : > { %v222_v8 = vpack.c.bf16 %v218_v6, %v217_v5  ;;  %v216_v9 = vld [vmem:[%s193_s27 + $0x28] sm:$0xff]  ;;  %v213_v11 = vld [vmem:[%s193_s27 + $0x10] sm:$0xff]  ;;  %v214_v12 = vld [vmem:[%s193_s27 + $0x18] sm:$0xff] }
  0x11   : > { %v221_v10 = vpack.c.bf16 %v216_v9, %v215_v7  ;;  %v220_v15 = vpack.c.bf16 %v214_v12, %v213_v11  ;;  %v211_v16 = vld [vmem:[%s193_s27] sm:$0xff]  ;;  %v212_v17 = vld [vmem:[%s193_s27 + $0x8] sm:$0xff]  ;;  %v229_v22 = vld [vmem:[%s680_s2 + $0x30] sm:$0xff] }
  0x12   : > { %490 = vmatprep.subr.bf16.mxu0 %v222_v8  ;;  %506 = vmatprep.subr.bf16.mxu1 %v222_v8  ;;  %v219_v20 = vpack.c.bf16 %v212_v17, %v211_v16  ;;  %v543_v23 = vld [vmem:[%s679_s1 + $0x8] sm:$0xff]   ;;  %v544_v24 = vld [vmem:[%s679_s1 + $0x18] sm:$0xff]  }
  0x13   : > { %491 = vmatpush3.bf16.msra.mxu0 %v222_v8  ;;  %510 = vmatpush3.bf16.msra.mxu1 %v222_v8 }
  0x14   : > { %492 = vmatprep.subr.bf16.mxu0 %v221_v10  ;;  %507 = vmatprep.subr.bf16.mxu1 %v221_v10 }
  0x15   : > { %248 = vperm.xlu1 %540, %v226_v13   ;;  %238 = vperm.xlu0 %539, %v224_v14  }
  0x17   : > { %493 = vmatpush3.bf16.msra.mxu0 %v221_v10  ;;  %511 = vmatpush3.bf16.msra.mxu1 %v221_v10 }
  0x18   : > { %494 = vmatprep.subr.bf16.mxu0 %v220_v15  ;;  %508 = vmatprep.subr.bf16.mxu1 %v220_v15 }
  0x19   : > { %258 = vperm.xlu1 %540, %v228_v18   ;;  %253 = vperm.xlu0 %539, %v227_v19  }
  0x1b   : > { %495 = vmatpush3.bf16.msra.mxu0 %v220_v15  ;;  %512 = vmatpush3.bf16.msra.mxu1 %v220_v15 }
  0x1c   : > { %496 = vmatprep.subr.bf16.mxu0 %v219_v20  ;;  %509 = vmatprep.subr.bf16.mxu1 %v219_v20 }
  0x1d   : > { %268 = vperm.xlu1 %540, %v230_v21   ;;  %263 = vperm.xlu0 %539, %v229_v22  }
  0x1f   : > { %497 = vmatpush3.bf16.msra.mxu0 %v219_v20  ;;  %513 = vmatpush3.bf16.msra.mxu1 %v219_v20 }
  0x22   : > { %499 = vmatmul.mubr.msk.bf16.vlgmr.msra.gmra.mxu0 %vm291_vm0, %v543_v23  ;;  %503 = vmatmul.mubr.msk.bf16.vlgmr.msra.gmra.mxu1 %vm291_vm0, %v544_v24 }
  0x8a   : > { %v234_v25 = vpop.permute.xlu0 %233  ;;  %v244_v26 = vpop.permute.xlu1 %243 }
  0x90   : > { %v239_v27 = vpop.permute.xlu0 %238  ;;  %v249_v28 = vpop.permute.xlu1 %248 }
  0x94   : > { %v254_v29 = vpop.permute.xlu0 %253  ;;  %v259_v30 = vpop.permute.xlu1 %258 }
  0x98   : > { %v264_v31 = vpop.permute.xlu0 %263  ;;  %v269_v38 = vpop.permute.xlu1 %268 }
  0xe2   : > { %v500_v32 = vpop.f32.mrf.mxu0  ;;  %v504_v33 = vpop.f32.mrf.mxu1 }
  0xe3   : > { %v347_v34 = vadd.f32 %v500_v32, %v244_v26  ;;  %v363_v35 = vadd.f32 %v504_v33, %v264_v31 }
  0xe4   : > { %v338_v36 = vpop.f32.mrf.mxu0  ;;  %v354_v37 = vpop.f32.mrf.mxu1 }
  0xe5   : > { %372 = vst.msk [vmem:[%s201_s24 + $0x10] sm:$0xff] %vm369_vm1, %v347_v34  ;;  %376 = vst.msk [vmem:[%s201_s24 + $0x30] sm:$0xff] %vm369_vm1, %v363_v35  ;;  %v339_v39 = vadd.f32 %v338_v36, %v234_v25  ;;  %v355_v40 = vadd.f32 %v354_v37, %v254_v29 }
  0xe6   : > { %v501_v41 = vpop.f32.mrf.mxu0  ;;  %v505_v42 = vpop.f32.mrf.mxu1 }
  0xe7   : > { %370 = vst.msk [vmem:[%s201_s24] sm:$0xff] %vm369_vm1, %v339_v39  ;;  %374 = vst.msk [vmem:[%s201_s24 + $0x20] sm:$0xff] %vm369_vm1, %v355_v40  ;;  %v350_v43 = vadd.f32 %v501_v41, %v249_v28  ;;  %v366_v44 = vadd.f32 %v505_v42, %v269_v38 }
  0xe8   : > { %v341_v45 = vpop.f32.mrf.mxu0  ;;  %v357_v46 = vpop.f32.mrf.mxu1 }
  0xe9   : > { %373 = vst.msk [vmem:[%s201_s24 + $0x18] sm:$0xff] %vm369_vm1, %v350_v43  ;;  %377 = vst.msk [vmem:[%s201_s24 + $0x38] sm:$0xff] %vm369_vm1, %v366_v44  ;;  %v342_v47 = vadd.f32 %v341_v45, %v239_v27  ;;  %v358_v48 = vadd.f32 %v357_v46, %v259_v30 }
  0xeb   : > { %371 = vst.msk [vmem:[%s201_s24 + $0x8] sm:$0xff] %vm369_vm1, %v342_v47  ;;  %375 = vst.msk [vmem:[%s201_s24 + $0x28] sm:$0xff] %vm369_vm1, %v358_v48 }
  0xec PF: > { %s13_s14 = sadd.s32 1, %s567_s14   ;;  %s682_s12 = smov %s563_s13 }
  0xed   : > { %p10_p5 = scmp.ge.s32.totalorder %s13_s14, 4   ;;  %s683_s13 = smov %s685_s15 }
  0xef   :  { %12 = sbr.rel (!%p10_p5) target bundleno = 2 (0x2), region = 62 }

// kernel: depth_only_forward.21
= control target key start
LH: loop header
LB: loop body
LE: loop exit
PB: predicated region body
PF: predicated region fallthrough
CT: control target
= control target key end

     0   :  { %s505_s12 = smov 0   ;;  %s507_s13 = smov 0   ;;  %s566_s0 = inlined_call_operand.vmem [shape: f32[2,64,64], index: 0, kind: input, shape index: {}]   ;;  %s567_s1 = inlined_call_operand.vmem [shape: bf16[32,64], index: 1, kind: input, shape index: {}]   ;;  %s568_s2 = inlined_call_operand.vmem [shape: f32[32,1], index: 2, kind: input, shape index: {}]   ;;  %s569_s3 = inlined_call_operand.vmem [shape: f32[2,32,64], index: 3, kind: output, shape index: {}]  }
   0x1   :  { %s509_s14 = smov 0  }
   0x2 LB: > { %s25_s15 = sadd.s32 1, %s478_s13  ;;  %p400_p0 = scmp.ge.s32.totalorder %s482_s14, 1  ;;  %s482_s14 = sphi %s509_s14, %s13_s14   ;;  %s478_s13 = sphi %s507_s13, %s571_s13   ;;  %s474_s12 = sphi %s505_s12, %s570_s12  }
   0x3   : > { %p27_p1 = scmp.ge.s32.totalorder %s25_s15, 2  ;;  %p156_p2 = scmp.lt.s32.totalorder %s482_s14, 3 }
   0x5   : > { %s573_s15 = smov (%p27_p1, %s25_s15), 0  ;;  %p157_p3 = pnand %p400_p0, %p156_p2 }
   0x6   : > { %p186_p4 = scmp.lt.s32.totalorder (!%p157_p3), %s474_s12, 1 }
   0x7   : > { %160 = sbr.rel (%p157_p3) target bundleno = 236 (0xec), region = 32 }
   0xc   : > { %v458_v0 = vld [vmem:[%s567_s1] sm:$0xff]   ;;  %vm253_vm0 = vcmask 523264   ;;  %s575_s12 = smov (!%p186_p4, %s474_s12), 1  ;;  %v221_v1 = vld [vmem:[%s568_s2 + $0x10] sm:$0xff]  ;;  %v484_v3 = vmov 0   ;;  %v222_v4 = vld [vmem:[%s568_s2 + $0x18] sm:$0xff] }
   0xd   : > { %427 = vmatprep.mubr.msk.bf16.mxu0 %vm253_vm0, %v458_v0  ;;  %v219_v2 = vld [vmem:[%s568_s2] sm:$0xff]  ;;  %457 = vset.pattern.permute.xlu1 %v484_v3  ;;  %s411_s22 = sshll.u32 %s575_s12, 6  ;;  %v220_v5 = vld [vmem:[%s568_s2 + $0x8] sm:$0xff]  ;;  %s412_s5 = sshll.u32 %s575_s12, 5 }
   0xe   : > { %456 = vset.pattern.permute.xlu0 %v484_v3  ;;  %235 = vperm.xlu1 %457, %v221_v1   ;;  %s193_s25 = scalar_lea.vmem %s566_s0, %s411_s22  ;;  %v459_v18 = vld [vmem:[%s567_s1 + $0x8] sm:$0xff]   ;;  %s201_s8 = scalar_lea.vmem %s569_s3, %s412_s5 }
   0xf   : > { %225 = vperm.xlu0 %456, %v219_v2   ;;  %v213_v6 = vld [vmem:[%s193_s25 + $0x30] sm:$0xff]  ;;  %v214_v7 = vld [vmem:[%s193_s25 + $0x38] sm:$0xff]  ;;  %v211_v8 = vld [vmem:[%s193_s25 + $0x20] sm:$0xff] }
  0x10   : > { %v218_v9 = vpack.c.bf16 %v214_v7, %v213_v6  ;;  %v212_v10 = vld [vmem:[%s193_s25 + $0x28] sm:$0xff]  ;;  %v209_v12 = vld [vmem:[%s193_s25 + $0x10] sm:$0xff]  ;;  %v210_v13 = vld [vmem:[%s193_s25 + $0x18] sm:$0xff] }
  0x11   : > { %v217_v11 = vpack.c.bf16 %v212_v10, %v211_v8  ;;  %v216_v14 = vpack.c.bf16 %v210_v13, %v209_v12  ;;  %v207_v15 = vld [vmem:[%s193_s25] sm:$0xff]  ;;  %v208_v16 = vld [vmem:[%s193_s25 + $0x8] sm:$0xff] }
  0x12   : > { %240 = vperm.xlu1 %457, %v222_v4   ;;  %419 = vmatprep.subr.bf16.mxu0 %v218_v9  ;;  %v215_v17 = vpack.c.bf16 %v208_v16, %v207_v15 }
  0x13   : > { %230 = vperm.xlu0 %456, %v220_v5   ;;  %420 = vmatpush3.bf16.msra.mxu0 %v218_v9 }
  0x14   : > { %421 = vmatprep.subr.bf16.mxu0 %v217_v11 }
  0x17   : > { %422 = vmatpush3.bf16.msra.mxu0 %v217_v11 }
  0x18   : > { %423 = vmatprep.subr.bf16.mxu0 %v216_v14 }
  0x1b   : > { %424 = vmatpush3.bf16.msra.mxu0 %v216_v14 }
  0x1c   : > { %425 = vmatprep.subr.bf16.mxu0 %v215_v17 }
  0x1f   : > { %426 = vmatpush3.bf16.msra.mxu0 %v215_v17 }
  0x22   : > { %428 = vmatmul.mubr.msk.bf16.vlgmr.msra.gmra.mxu0 %vm253_vm0, %v459_v18 }
  0x89   : > { %v236_v19 = vpop.permute.xlu1 %235 }
  0x8a   : > { %v226_v20 = vpop.permute.xlu0 %225 }
  0x8d   : > { %v241_v25 = vpop.permute.xlu1 %240 }
  0x8e   : > { %v231_v28 = vpop.permute.xlu0 %230 }
  0xe2   : > { %v429_v21 = vpop.f32.mrf.mxu0 }
  0xe3   : > { %v303_v22 = vadd.f32 %v429_v21, %v236_v19 }
  0xe4   : > { %v294_v23 = vpop.f32.mrf.mxu0 }
  0xe5   : > { %311 = vst.msk [vmem:[%s201_s8 + $0x10] sm:$0xff] %vm253_vm0, %v303_v22  ;;  %v295_v24 = vadd.f32 %v294_v23, %v226_v20 }
  0xe6   : > { %v430_v26 = vpop.f32.mrf.mxu0 }
  0xe7   : > { %309 = vst.msk [vmem:[%s201_s8] sm:$0xff] %vm253_vm0, %v295_v24  ;;  %v306_v27 = vadd.f32 %v430_v26, %v241_v25 }
  0xe8   : > { %v297_v29 = vpop.f32.mrf.mxu0 }
  0xe9   : > { %312 = vst.msk [vmem:[%s201_s8 + $0x18] sm:$0xff] %vm253_vm0, %v306_v27  ;;  %v298_v30 = vadd.f32 %v297_v29, %v231_v28 }
  0xeb   : > { %310 = vst.msk [vmem:[%s201_s8 + $0x8] sm:$0xff] %vm253_vm0, %v298_v30 }
  0xec PF: > { %s13_s14 = sadd.s32 1, %s482_s14   ;;  %s570_s12 = smov %s478_s13 }
  0xed   : > { %p10_p5 = scmp.ge.s32.totalorder %s13_s14, 4   ;;  %s571_s13 = smov %s573_s15 }
  0xef   :  { %12 = sbr.rel (!%p10_p5) target bundleno = 2 (0x2), region = 62 }

// kernel: depth_only_forward.22
= control target key start
LH: loop header
LB: loop body
LE: loop exit
PB: predicated region body
PF: predicated region fallthrough
CT: control target
= control target key end

     0   :  { %s511_s12 = smov 0   ;;  %s513_s13 = smov 0   ;;  %s569_s0 = inlined_call_operand.vmem [shape: f32[2,32,256], index: 0, kind: input, shape index: {}]   ;;  %s570_s1 = inlined_call_operand.vmem [shape: bf16[32,32], index: 1, kind: input, shape index: {}]   ;;  %s571_s2 = inlined_call_operand.vmem [shape: f32[32,1], index: 2, kind: input, shape index: {}]   ;;  %s572_s3 = inlined_call_operand.vmem [shape: f32[2,32,256], index: 3, kind: output, shape index: {}]  }
   0x1   :  { %s515_s14 = smov 0  }
   0x2 LB: > { %s25_s15 = sadd.s32 1, %s484_s13  ;;  %p420_p0 = scmp.ge.s32.totalorder %s488_s14, 1  ;;  %s488_s14 = sphi %s515_s14, %s13_s14   ;;  %s484_s13 = sphi %s513_s13, %s574_s13   ;;  %s480_s12 = sphi %s511_s12, %s573_s12  }
   0x3   : > { %p27_p1 = scmp.ge.s32.totalorder %s25_s15, 2  ;;  %p158_p2 = scmp.lt.s32.totalorder %s488_s14, 3 }
   0x5   : > { %s576_s15 = smov (%p27_p1, %s25_s15), 0  ;;  %p159_p3 = pnand %p420_p0, %p158_p2 }
   0x6   : > { %p191_p4 = scmp.lt.s32.totalorder (!%p159_p3), %s480_s12, 1 }
   0x7   : > { %162 = sbr.rel (%p159_p3) target bundleno = 229 (0xe5), region = 32 }
   0xc   : > { %v490_v0 = vmov 0   ;;  %s578_s12 = smov (!%p191_p4, %s480_s12), 1  ;;  %v229_v1 = vld [vmem:[%s571_s2 + $0x10] sm:$0xff]  ;;  %v227_v2 = vld [vmem:[%s571_s2] sm:$0xff]  ;;  %v230_v3 = vld [vmem:[%s571_s2 + $0x18] sm:$0xff]  ;;  %vm261_vm0 = vcmask 261120  }
   0xd   : > { %300 = vmatprep.mubr.bf16.mxu0 %v490_v0  ;;  %310 = vmatprep.mubr.bf16.mxu1 %v490_v0  ;;  %s431_s20 = sshll.u32 %s578_s12, 6  ;;  %v228_v4 = vld [vmem:[%s571_s2 + $0x8] sm:$0xff]  ;;  %v464_v17 = vld [vmem:[%s570_s1] sm:$0xff]  }
   0xe   : > { %463 = vset.pattern.permute.xlu1 %v490_v0  ;;  %462 = vset.pattern.permute.xlu0 %v490_v0  ;;  %s198_s27 = scalar_lea.vmem %s569_s0, %s431_s20  ;;  %v465_v18 = vld [vmem:[%s570_s1 + $0x8] sm:$0xff]   ;;  %s208_s7 = scalar_lea.vmem %s572_s3, %s431_s20 }
   0xf   : > { %243 = vperm.xlu1 %463, %v229_v1   ;;  %233 = vperm.xlu0 %462, %v227_v2   ;;  %v220_v5 = vld [vmem:[%s198_s27 + $0x28] sm:$0xff]  ;;  %v222_v6 = vld [vmem:[%s198_s27 + $0x38] sm:$0xff]  ;;  %v219_v7 = vld [vmem:[%s198_s27 + $0x20] sm:$0xff] }
  0x10   : > { %v226_v8 = vpack.c.bf16 %v222_v6, %v220_v5  ;;  %v221_v9 = vld [vmem:[%s198_s27 + $0x30] sm:$0xff]  ;;  %v216_v10 = vld [vmem:[%s198_s27 + $0x8] sm:$0xff]  ;;  %v218_v11 = vld [vmem:[%s198_s27 + $0x18] sm:$0xff] }
  0x11   : > { %v225_v12 = vpack.c.bf16 %v221_v9, %v219_v7  ;;  %v224_v13 = vpack.c.bf16 %v218_v11, %v216_v10  ;;  %v215_v14 = vld [vmem:[%s198_s27] sm:$0xff]  ;;  %v217_v15 = vld [vmem:[%s198_s27 + $0x10] sm:$0xff] }
  0x12   : > { %280 = vmatprep.subr.bf16.mxu0 %v226_v8  ;;  %433 = vmatprep.subr.bf16.mxu1 %v226_v8  ;;  %v223_v16 = vpack.c.bf16 %v217_v15, %v215_v14 }
  0x13   : > { %248 = vperm.xlu1 %463, %v230_v3   ;;  %238 = vperm.xlu0 %462, %v228_v4  }
  0x14   : > { %281 = vmatpush1.bf16.msra.mxu0 %v225_v12  ;;  %435 = vmatpush1.bf16.msra.mxu1 %v225_v12 }
  0x15   : > { %282 = vmatprep.subr.bf16.mxu0 %v224_v13  ;;  %434 = vmatprep.subr.bf16.mxu1 %v224_v13 }
  0x18   : > { %283 = vmatpush1.bf16.msra.mxu0 %v223_v16  ;;  %436 = vmatpush1.bf16.msra.mxu1 %v223_v16 }
  0x1b   : > { %427 = vmatmul.mubr.msk.bf16.vlgmr.msra.gmra.mxu0 %vm261_vm0, %v464_v17  ;;  %428 = vmatmul.mubr.msk.bf16.vlgmr.msra.gmra.mxu1 %vm261_vm0, %v465_v18 }
  0x8a   : > { %v244_v19 = vpop.permute.xlu1 %243  ;;  %v234_v20 = vpop.permute.xlu0 %233 }
  0x8e   : > { %v249_v27 = vpop.permute.xlu1 %248  ;;  %v239_v28 = vpop.permute.xlu0 %238 }
  0xdb   : > { %v302_v21 = vpop.f32.mrf.mxu0  ;;  %v312_v22 = vpop.f32.mrf.mxu1 }
  0xdc   : > { %v303_v23 = vadd.f32 %v302_v21, %v234_v20  ;;  %v313_v24 = vadd.f32 %v312_v22, %v244_v19 }
  0xdd   : > { %v304_v25 = vpop.f32.mrf.mxu0  ;;  %v314_v26 = vpop.f32.mrf.mxu1 }
  0xde   : > { %321 = vst [vmem:[%s208_s7] sm:$0xff] %v303_v23  ;;  %325 = vst [vmem:[%s208_s7 + $0x20] sm:$0xff] %v313_v24  ;;  %v305_v29 = vadd.f32 %v304_v25, %v234_v20  ;;  %v315_v30 = vadd.f32 %v314_v26, %v244_v19 }
  0xdf   : > { %v306_v31 = vpop.f32.mrf.mxu0  ;;  %v316_v32 = vpop.f32.mrf.mxu1 }
  0xe0   : > { %322 = vst [vmem:[%s208_s7 + $0x8] sm:$0xff] %v305_v29  ;;  %326 = vst [vmem:[%s208_s7 + $0x28] sm:$0xff] %v315_v30  ;;  %v307_v33 = vadd.f32 %v306_v31, %v239_v28  ;;  %v317_v34 = vadd.f32 %v316_v32, %v249_v27 }
  0xe1   : > { %v308_v35 = vpop.f32.mrf.mxu0  ;;  %v318_v36 = vpop.f32.mrf.mxu1 }
  0xe2   : > { %323 = vst [vmem:[%s208_s7 + $0x10] sm:$0xff] %v307_v33  ;;  %327 = vst [vmem:[%s208_s7 + $0x30] sm:$0xff] %v317_v34  ;;  %v309_v37 = vadd.f32 %v308_v35, %v239_v28  ;;  %v319_v38 = vadd.f32 %v318_v36, %v249_v27 }
  0xe4   : > { %324 = vst [vmem:[%s208_s7 + $0x18] sm:$0xff] %v309_v37  ;;  %328 = vst [vmem:[%s208_s7 + $0x38] sm:$0xff] %v319_v38 }
  0xe5 PF: > { %s13_s14 = sadd.s32 1, %s488_s14   ;;  %s573_s12 = smov %s484_s13 }
  0xe6   : > { %p10_p5 = scmp.ge.s32.totalorder %s13_s14, 4   ;;  %s574_s13 = smov %s576_s15 }
  0xe8   :  { %12 = sbr.rel (!%p10_p5) target bundleno = 2 (0x2), region = 62 }

// kernel: depth_only_forward.23
= control target key start
LH: loop header
LB: loop body
LE: loop exit
PB: predicated region body
PF: predicated region fallthrough
CT: control target
= control target key end

     0   :  { %s759_s0 = inlined_call_operand.vmem [shape: f32[2,32,1024], index: 0, kind: input, shape index: {}]   ;;  %s760_s1 = inlined_call_operand.vmem [shape: bf16[1,32], index: 1, kind: input, shape index: {}]   ;;  %s761_s2 = inlined_call_operand.<no memory space> [shape: f32[1,1], index: 2, kind: input, shape index: {}]   ;;  %s762_s3 = inlined_call_operand.vmem [shape: f32[2,1,1024], index: 3, kind: output, shape index: {}]  }
   0x1   :  { %v8_v0 = vstv %s761_s2 }
   0x2   :  { %9 = vst [vmem:[#allocation2] sm:$0x1] %v8_v0 }
   0x3   :  { %s648_s14 = smov 0   ;;  %s650_s15 = smov 0  }
   0x4   :  { %s652_s16 = smov 0   ;;  %s654_s17 = smov 0  }
   0x5   :  { %s656_s18 = smov 0   ;;  %s658_s19 = smov 0  }
   0x6   :  { %s660_s20 = smov 0  }
   0x7 LB: > { %s24_s2 = sadd.s32 1, %s613_s18  ;;  %s27_s21 = sadd.s32 1, %s617_s19  ;;  %s621_s20 = sphi %s660_s20, %s15_s20   ;;  %s617_s19 = sphi %s658_s19, %s768_s19   ;;  %s613_s18 = sphi %s656_s18, %s767_s18   ;;  %s609_s17 = sphi %s654_s17, %s766_s17   ;;  %s605_s16 = sphi %s652_s16, %s765_s16   ;;  %s601_s15 = sphi %s650_s15, %s764_s15   ;;  %s597_s14 = sphi %s648_s14, %s763_s14  }
   0x8   : > { %p25_p0 = scmp.ge.s32.totalorder %s24_s2, 2  ;;  %p43_p1 = scmp.ne.s32.totalorder %s601_s15, %s597_s14 }
   0x9   : > { %p44_p2 = scmp.eq.s32.totalorder %s621_s20, 0  ;;  %s36_s25 = sadd.s32 1, %s601_s15 }
   0xa   : > { %s770_s2 = smov (%p25_p0, %s24_s2), 0  ;;  %s772_s21 = smov (!%p25_p0, %s27_s21), %s617_s19 }
   0xb   : > { %p45_p3 = por %p44_p2, %p43_p1  ;;  %p29_p4 = scmp.ge.s32.totalorder %s772_s21, 2 }
   0xc   : > { %s32_s22 = ssub.s32 %s613_s18, %s770_s2  ;;  %p495_p6 = scmp.ge.s32.totalorder %s621_s20, 4 }
   0xd   : > { %s774_s21 = smov (%p29_p4, %s772_s21), 0 }
   0xe   : > { %s31_s23 = ssub.s32 %s617_s19, %s774_s21  ;;  %145 = sbr.rel (%p495_p6) target bundleno = 34 (0x22), region = 24 }
   0xf   : > { %s33_s24 = sor.u32 %s32_s22, %s31_s23 }
  0x10   : > { %p34_p5 = scmp.eq.s32.totalorder %s33_s24, 0 }
  0x12   : > { %s699_s26 = scalar_select %p34_p5, %s601_s15, %s36_s25  }
  0x13   : > { %148 = sbr.rel (!%p45_p3) target bundleno = 34 (0x22), region = 28  ;;  %s150_s27 = sand.u32 (%p45_p3), 1, %s601_s15  }
  0x14   : > { %s497_s28 = sshll.u32 (%p45_p3), %s613_s18, 2  ;;  %s496_s29 = sshll.u32 (%p45_p3), %s150_s27, 7 }
  0x15   : > { %s498_s30 = sshll.u32 (%p45_p3), %s617_s19, 5  ;;  %s152_s9 = scalar_lea.vmem (%p45_p3), [#allocation3], %s496_s29 }
  0x16   : > { %s155_s4 = sadd.s32 (%p45_p3), %s498_s30, %s497_s28 }
  0x17   : > { %s499_s5 = sshll.u32 (%p45_p3), %s155_s4, 3 }
  0x18   : > { %s708_s8 = scalar_lea.vmem %s759_s0, %s499_s5 }
  0x19   : > { %v170_v1 = vld [vmem:[%s708_s8] sm:$0xff]  ;;  %v172_v2 = vld [vmem:[%s708_s8 + $0x8] sm:$0xff]  ;;  %v174_v3 = vld [vmem:[%s708_s8 + $0x10] sm:$0xff] }
  0x1a   : > { %171 = vst [vmem:[%s152_s9] sm:$0xff] %v170_v1  ;;  %173 = vst [vmem:[%s152_s9 + $0x8] sm:$0xff] %v172_v2  ;;  %v176_v4 = vld [vmem:[%s708_s8 + $0x18] sm:$0xff]  ;;  %v178_v5 = vld [vmem:[%s708_s8 + $0x40] sm:$0xff] }
  0x1b   : > { %175 = vst [vmem:[%s152_s9 + $0x10] sm:$0xff] %v174_v3  ;;  %v180_v6 = vld [vmem:[%s708_s8 + $0x48] sm:$0xff]  ;;  %177 = vst [vmem:[%s152_s9 + $0x18] sm:$0xff] %v176_v4  ;;  %v182_v7 = vld [vmem:[%s708_s8 + $0x50] sm:$0xff] }
  0x1c   : > { %179 = vst [vmem:[%s152_s9 + $0x20] sm:$0xff] %v178_v5  ;;  %181 = vst [vmem:[%s152_s9 + $0x28] sm:$0xff] %v180_v6  ;;  %v184_v8 = vld [vmem:[%s708_s8 + $0x58] sm:$0xff]  ;;  %v186_v9 = vld [vmem:[%s708_s8 + $0x80] sm:$0xff] }
  0x1d   : > { %183 = vst [vmem:[%s152_s9 + $0x30] sm:$0xff] %v182_v7  ;;  %185 = vst [vmem:[%s152_s9 + $0x38] sm:$0xff] %v184_v8  ;;  %v188_v10 = vld [vmem:[%s708_s8 + $0x88] sm:$0xff]  ;;  %v190_v11 = vld [vmem:[%s708_s8 + $0x90] sm:$0xff] }
  0x1e   : > { %187 = vst [vmem:[%s152_s9 + $0x40] sm:$0xff] %v186_v9  ;;  %v192_v12 = vld [vmem:[%s708_s8 + $0x98] sm:$0xff]  ;;  %189 = vst [vmem:[%s152_s9 + $0x48] sm:$0xff] %v188_v10  ;;  %v194_v13 = vld [vmem:[%s708_s8 + $0xc0] sm:$0xff] }
  0x1f   : > { %191 = vst [vmem:[%s152_s9 + $0x50] sm:$0xff] %v190_v11  ;;  %193 = vst [vmem:[%s152_s9 + $0x58] sm:$0xff] %v192_v12  ;;  %v196_v14 = vld [vmem:[%s708_s8 + $0xc8] sm:$0xff]  ;;  %v198_v15 = vld [vmem:[%s708_s8 + $0xd0] sm:$0xff] }
  0x20   : > { %195 = vst [vmem:[%s152_s9 + $0x60] sm:$0xff] %v194_v13  ;;  %197 = vst [vmem:[%s152_s9 + $0x68] sm:$0xff] %v196_v14  ;;  %v200_v16 = vld [vmem:[%s708_s8 + $0xd8] sm:$0xff] }
  0x21   : > { %199 = vst [vmem:[%s152_s9 + $0x70] sm:$0xff] %v198_v15  ;;  %201 = vst [vmem:[%s152_s9 + $0x78] sm:$0xff] %v200_v16 }
  0x22 PF: > { %p500_p7 = scmp.ge.s32.totalorder %s621_s20, 1  ;;  %p206_p8 = scmp.lt.s32.totalorder %s621_s20, 5 }
  0x24   : > { %p207_p9 = pnand %p500_p7, %p206_p8 }
  0x25   : > { %s213_s10 = sand.u32 (!%p207_p9), 1, %s597_s14   ;;  %s502_s22 = sshll.u32 (!%p207_p9), %s605_s16, 2 }
  0x26   : > { %210 = sbr.rel (%p207_p9) target bundleno = 262 (0x106), region = 51  ;;  %s501_s11 = sshll.u32 (!%p207_p9), %s213_s10, 7 }
  0x27   : > { %s215_s12 = scalar_lea.vmem (!%p207_p9), [#allocation3], %s501_s11  ;;  %p241_p10 = scmp.lt.s32.totalorder (!%p207_p9), %s609_s17, 1 }
  0x28   : > { %p243_p11 = scmp.lt.s32.totalorder (!%p207_p9), %s502_s22, 7 }
  0x2b   : > { %v623_v17 = vmov 0   ;;  %v275_v18 = vld [vmem:[#allocation2] sm:$0x1]  ;;  %v260_v19 = vld [vmem:[%s215_s12 + $0x48] sm:$0xff]  ;;  %v259_v24 = vld [vmem:[%s215_s12 + $0x40] sm:$0xff]  ;;  %vm285_vm0 = vcmask 261120   ;;  %v281_v44 = vlaneseq }
  0x2c   : > { %321 = vmatprep.mubr.bf16.mxu0 %v623_v17  ;;  %362 = vmatprep.mubr.bf16.mxu1 %v623_v17  ;;  %v264_v20 = vld [vmem:[%s215_s12 + $0x68] sm:$0xff]  ;;  %v262_v21 = vld [vmem:[%s215_s12 + $0x58] sm:$0xff]  ;;  %v263_v25 = vld [vmem:[%s215_s12 + $0x60] sm:$0xff]  ;;  %v624_v47 = vmov 1966171168   ;;  %s776_s17 = smov (!%p241_p10, %s609_s17), 1 }
  0x2d   : > { %566 = vset.pattern.permute.xlu0 %v623_v17  ;;  %v272_v22 = vpack.c.bf16 %v264_v20, %v260_v19  ;;  %v266_v23 = vld [vmem:[%s215_s12 + $0x78] sm:$0xff]  ;;  %v271_v27 = vpack.c.bf16 %v263_v25, %v259_v24  ;;  %v261_v28 = vld [vmem:[%s215_s12 + $0x50] sm:$0xff]  ;;  %v252_v30 = vld [vmem:[%s215_s12 + $0x8] sm:$0xff]  ;;  %v282_v45 = vshrl.u32 %v281_v44, 7  ;;  %v378_v48 = vunpack.c.l.s4 %v624_v47  ;;  %s778_s22 = smov (!%p243_p11, %s502_s22), 7  ;;  %s503_s23 = sshll.u32 %s776_s17, 3 }
  0x2e   : > { %278 = vperm.xlu0 %566, %v275_v18   ;;  %v274_v26 = vpack.c.bf16 %v266_v23, %v262_v21  ;;  %v265_v29 = vld [vmem:[%s215_s12 + $0x70] sm:$0xff]  ;;  %v256_v32 = vld [vmem:[%s215_s12 + $0x28] sm:$0xff]  ;;  %v254_v33 = vld [vmem:[%s215_s12 + $0x18] sm:$0xff]  ;;  %s246_s16 = sadd.s32 %s503_s23, %s778_s22  ;;  %vm402_vm1 = vcmp.lt.s32.totalorder %v281_v44, 512 }
  0x2f   : > { %301 = vmatprep.subr.bf16.mxu0 %v272_v22  ;;  %v273_v31 = vpack.c.bf16 %v265_v29, %v261_v28  ;;  %v258_v34 = vld [vmem:[%s215_s12 + $0x38] sm:$0xff]  ;;  %v268_v35 = vpack.c.bf16 %v256_v32, %v252_v30  ;;  %v251_v37 = vld [vmem:[%s215_s12] sm:$0xff]  ;;  %v253_v39 = vld [vmem:[%s215_s12 + $0x10] sm:$0xff]  ;;  %v283_v46 = vsub.s32 0, %v282_v45  ;;  %v379_v50 = vunpack.c.0.s8 %v378_v48  ;;  %s247_s27 = scalar_lea.vmem %s762_s3, %s246_s16 }
  0x30   : > { %342 = vmatprep.subr.bf16.mxu1 %v274_v26  ;;  %302 = vmatpush1.bf16.msra.mxu0 %v271_v27  ;;  %v270_v36 = vpack.c.bf16 %v258_v34, %v254_v33  ;;  %v255_v38 = vld [vmem:[%s215_s12 + $0x20] sm:$0xff]  ;;  %v257_v41 = vld [vmem:[%s215_s12 + $0x30] sm:$0xff]  ;;  %v250_v43 = vld [vmem:[%s760_s1] sm:$0x1] }
  0x31   : > { %343 = vmatpush1.bf16.msra.mxu1 %v273_v31  ;;  %v267_v40 = vpack.c.bf16 %v255_v38, %v251_v37  ;;  %303 = vmatprep.subr.bf16.mxu0 %v268_v35  ;;  %v269_v42 = vpack.c.bf16 %v257_v41, %v253_v39  ;;  %v382_v55 = vsub.s32 %v379_v50, %v282_v45 }
  0x32   : > { %344 = vmatprep.subr.bf16.mxu1 %v270_v36 }
  0x34   : > { %304 = vmatpush1.bf16.msra.mxu0 %v267_v40 }
  0x35   : > { %345 = vmatpush1.bf16.msra.mxu1 %v269_v42 }
  0x37   : > { %504 = vmatmul.mubr.msk.bf16.vlgmr.msra.gmra.mxu0 %vm285_vm0, %v250_v43 }
  0x38   : > { %505 = vmatmul.mubr.msk.bf16.vlgmr.msra.gmra.mxu1 %vm285_vm0, %v250_v43 }
  0xa9   : > { %v279_v49 = vpop.permute.xlu0 %278 }
  0xaa   : > { %v284_v51 = vrot.slane %v279_v49, %v283_v46 }
  0xf7   : > { %v323_v52 = vpop.f32.mrf.mxu0 }
  0xf8   : > { %v364_v53 = vpop.f32.mrf.mxu1  ;;  %v324_v56 = vadd.f32 %v323_v52, %v284_v51 }
  0xf9   : > { %v325_v54 = vpop.f32.mrf.mxu0  ;;  %v365_v59 = vadd.f32 %v364_v53, %v284_v51 }
  0xfa   : > { %v326_v57 = vadd.f32 %v325_v54, %v284_v51  ;;  %v366_v58 = vpop.f32.mrf.mxu1 }
  0xfb   : > { %v367_v60 = vadd.f32 %v366_v58, %v284_v51  ;;  %v327_v61 = vpop.f32.mrf.mxu0 }
  0xfc   : > { %v375_v62 = vcombine.low %v324_v56, %v326_v57  ;;  %v368_v63 = vpop.f32.mrf.mxu1 }
  0xfd   : > { %v376_v0 = vcombine.low %v365_v59, %v367_v60  ;;  %v328_v1 = vpop.f32.mrf.mxu0 }
  0xfe   : > { %v383_v2 = vrot.slane %v375_v62, %v382_v55  ;;  %v369_v3 = vpop.f32.mrf.mxu1 }
  0xff   : > { %v390_v4 = vrot.slane %v376_v0, %v382_v55 }
 0x101   : > { %v391_v5 = vcombine.low %v383_v2, %v390_v4 }
 0x103   : > { %v398_v6 = vrot.slane %v391_v5, %v382_v55 }
 0x105   : > { %404 = vst.msk [vmem:[%s247_s27] sm:$0xf] %vm402_vm1, %v398_v6 }
 0x106 PF: > { %s15_s20 = sadd.s32 1, %s621_s20   ;;  %s763_s14 = smov %s601_s15 }
 0x107   : > { %p12_p12 = scmp.ge.s32.totalorder %s15_s20, 6   ;;  %s764_s15 = smov %s699_s26 }
 0x108   : > { %s765_s16 = smov %s613_s18  ;;  %s766_s17 = smov %s617_s19 }
 0x109   : > { %s767_s18 = smov %s770_s2  ;;  %s768_s19 = smov %s774_s21 }
 0x10a   :  { %14 = sbr.rel (!%p12_p12) target bundleno = 7 (0x7), region = 90 }

</bundles_post_ra>
